<compile_context>
chip_gen: v7x
topology: tpu7x:2x2x1
jax: 0.10.0
libtpu: 0.0.40
codegen_flags: <defaults>
</compile_context>

<pallas_src>
import jax
import jax.numpy as jnp
from jax.experimental import pallas as pl
from jax.experimental.pallas import tpu as pltpu

CONV_DTYPE = jnp.bfloat16   # MXU operand dtype (accumulation stays f32)


def _spatial_transpose(h):
    """h: [B, N, N, C] -> t with t[b, i, j, c] = h[b, j, i, c].

    Built from int-index squeezes, expand_dims and a non-minor concat (all
    robustly supported by Mosaic) instead of a 4-D lax.transpose.
    """
    B, n, _, c = h.shape
    cols = [h[:, j, :, :][:, :, None, :] for j in range(n)]   # each [B, N, 1, C]
    return jnp.concatenate(cols, axis=2)                      # [B, N, N, C]


def rn_kernel(xcat_ref, xorig_ref, q_ref,
              wv_ref, bv_ref, wq_ref, bq_ref,
              w1_ref, b1_ref, w2_ref, b2_ref, w3_ref, b3_ref,
              rm_ref, rx_ref,
              pad1, pad2, pad3):
    B = xcat_ref.shape[0]
    Nr = xcat_ref.shape[1]
    G = rm_ref.shape[3]
    M = B * Nr * Nr

    # ---- zero only the pad borders (interiors are fully overwritten below).
    #      Done every step so it is correct even when the "parallel" batch
    #      axis is sharded across TensorCores (per-core scratch).
    def zero_border(pad, off):
        _, hh, ww, cc = pad.shape
        z_row = jnp.zeros((B, off, ww, cc), pad.dtype)
        z_col = jnp.zeros((B, Nr, off, cc), pad.dtype)
        pad[:, 0:off, :, :] = z_row
        pad[:, off + Nr:, :, :] = z_row
        pad[:, off:off + Nr, 0:off, :] = z_col
        pad[:, off:off + Nr, off + Nr:, :] = z_col

    zero_border(pad1, 1)
    zero_border(pad2, 2)
    zero_border(pad3, 4)

    # ---- projections (MXU, bf16 operands, f32 accumulate) + ReLU -----------
    Din = xcat_ref.shape[2]
    xflat = xcat_ref[...].reshape(B * Nr, Din).astype(CONV_DTYPE)
    xv = jnp.maximum(
        jnp.dot(xflat, wv_ref[...], preferred_element_type=jnp.float32)
        + bv_ref[...], 0.0)                                   # [B*Nr, C]
    q2 = q_ref[...].reshape(B, q_ref.shape[2]).astype(CONV_DTYPE)
    qv = jnp.maximum(
        jnp.dot(q2, wq_ref[...], preferred_element_type=jnp.float32)
        + bq_ref[...], 0.0)                                   # [B, C]
    C = xv.shape[1]
    xp = xv.reshape(B, Nr, C) + qv[:, None, :]                # [B, Nr, C]

    # ---- pairwise map: one broadcast outer product + one interior store ----
    P = xp[:, :, None, :] * xp[:, None, :, :]                 # [B, Nr, Nr, C]
    pad1[:, 1:1 + Nr, 1:1 + Nr, :] = P.astype(pad1.dtype)

    # ---- dilated 3x3 "same" conv as a single im2col matmul per layer -------
    def conv_im2col(pad, d, wf_ref, b_ref):
        cin = pad.shape[3]
        cout = wf_ref.shape[1]
        taps = [pad[:, ky * d:ky * d + Nr, kx * d:kx * d + Nr, :]
                for ky in range(3) for kx in range(3)]
        col = jnp.concatenate(taps, axis=3)                   # [B,Nr,Nr,9*cin]
        col = col.reshape(M, 9 * cin).astype(CONV_DTYPE)
        acc = jnp.dot(col, wf_ref[...], preferred_element_type=jnp.float32)
        # bias + ReLU (dropout is identity in eval mode)
        acc = jnp.maximum(acc + b_ref[...], 0.0)
        return acc.reshape(B, Nr, Nr, cout)

    # fused stacks: channels [0:half] = r_conv1/2/3, [half:] = r_conv01/02/03
    h1 = conv_im2col(pad1, 1, w1_ref, b1_ref)                 # [B,Nr,Nr,2*C1]
    pad2[:, 2:2 + Nr, 2:2 + Nr, :] = h1.astype(pad2.dtype)
    h2 = conv_im2col(pad2, 2, w2_ref, b2_ref)                 # [B,Nr,Nr,2*C2]
    pad3[:, 4:4 + Nr, 4:4 + Nr, :] = h2.astype(pad3.dtype)
    h3 = conv_im2col(pad3, 4, w3_ref, b3_ref)                 # [B,Nr,Nr,2*G]

    # ---- symmetrise with the spatial transpose of the OUTPUT ---------------
    rsym = h3 + _spatial_transpose(h3)                        # [B,Nr,Nr,2G]

    # ---- softmax over all (i, j), independently per (batch, glimpse) -------
    m = jnp.max(jnp.max(rsym, axis=2, keepdims=True), axis=1, keepdims=True)
    e = jnp.exp(rsym - m)
    s = jnp.sum(jnp.sum(e, axis=2, keepdims=True), axis=1, keepdims=True)
    soft = e / s                                              # [B,Nr,Nr,2G]

    rm_ref[...] = soft[:, :, :, 0:G]                          # r_conv1/2/3 map

    # ---- relational_X = (sum over all 2G glimpse maps) @ X_ / (2G) ---------
    comb = jnp.sum(soft, axis=3)                              # [B, Nr, Nr]
    rx = jnp.einsum('bij,bjd->bid', comb, xorig_ref[...],
                    preferred_element_type=jnp.float32)
    rx_ref[...] = rx * (1.0 / (2.0 * G))


def rn_forward(X, Q, pos, params, *, block_bs=2):
    """X:[bs,Nr,v_dim], Q:[bs,q_dim], pos:[bs,Nr,6]
       -> (relation_map [bs,G,Nr,Nr], relational_X [bs,Nr,v_dim])."""
    bs, Nr, v_dim = X.shape
    q_dim = Q.shape[1]
    assert Nr % 8 == 0, "Nr must be a multiple of 8 (sublane tiling)"
    assert bs % block_bs == 0, "block_bs must divide bs"

    C = params["Wv"].shape[1]
    C1 = params["W1"].shape[3]
    C2 = params["W2"].shape[3]
    G = params["W3"].shape[3]

    # ---- glue: positional-encoding concat + Q rank-3 reshape ---------------
    Xcat = jnp.concatenate([X, pos[:, :, jnp.array([0, 1, 4, 5])]], axis=2)
    Din = Xcat.shape[2]
    Q3 = Q.reshape(bs, 1, q_dim)

    # ---- glue: fuse the two conv stacks and flatten to im2col form ---------
    def block_diag_hwio(a, b):
        za = jnp.zeros(a.shape[:2] + (a.shape[2], b.shape[3]), a.dtype)
        zb = jnp.zeros(b.shape[:2] + (b.shape[2], a.shape[3]), b.dtype)
        top = jnp.concatenate([a, za], axis=3)
        bot = jnp.concatenate([zb, b], axis=3)
        return jnp.concatenate([top, bot], axis=2)

    w1c = jnp.concatenate([params["W1"], params["W01"]], axis=3)   # [3,3,C,2C1]
    w2c = block_diag_hwio(params["W2"], params["W02"])             # [3,3,2C1,2C2]
    w3c = block_diag_hwio(params["W3"], params["W03"])             # [3,3,2C2,2G]
    b1c = jnp.concatenate([params["b1"], params["b01"]], axis=1)
    b2c = jnp.concatenate([params["b2"], params["b02"]], axis=1)
    b3c = jnp.concatenate([params["b3"], params["b03"]], axis=1)

    w1f = w1c.reshape(9 * C, 2 * C1).astype(CONV_DTYPE)
    w2f = w2c.reshape(9 * 2 * C1, 2 * C2).astype(CONV_DTYPE)
    w3f = w3c.reshape(9 * 2 * C2, 2 * G).astype(CONV_DTYPE)
    wv = params["Wv"].astype(CONV_DTYPE)
    wq = params["Wq"].astype(CONV_DTYPE)

    weight_args = [wv, params["bv"], wq, params["bq"],
                   w1f, b1c, w2f, b2c, w3f, b3c]

    def full_spec(a):
        return pl.BlockSpec(a.shape, lambda b, _nd=a.ndim: (0,) * _nd)

    Bb = block_bs
    in_specs = [
        pl.BlockSpec((Bb, Nr, Din), lambda b: (b, 0, 0)),
        pl.BlockSpec((Bb, Nr, v_dim), lambda b: (b, 0, 0)),
        pl.BlockSpec((Bb, 1, q_dim), lambda b: (b, 0, 0)),
    ] + [full_spec(a) for a in weight_args]

    out_shape = (jax.ShapeDtypeStruct((bs, Nr, Nr, G), jnp.float32),
                 jax.ShapeDtypeStruct((bs, Nr, v_dim), jnp.float32))
    out_specs = (pl.BlockSpec((Bb, Nr, Nr, G), lambda b: (b, 0, 0, 0)),
                 pl.BlockSpec((Bb, Nr, v_dim), lambda b: (b, 0, 0)))

    rm_cl, rx = pl.pallas_call(
        rn_kernel,
        out_shape=out_shape,
        grid_spec=pltpu.PrefetchScalarGridSpec(
            num_scalar_prefetch=0,
            grid=(bs // Bb,),
            in_specs=in_specs,
            out_specs=out_specs,
            scratch_shapes=[
                pltpu.VMEM((Bb, Nr + 2, Nr + 2, C), jnp.float32),       # conv1 pad (d=1)
                pltpu.VMEM((Bb, Nr + 4, Nr + 4, 2 * C1), jnp.float32),  # conv2 pad (d=2)
                pltpu.VMEM((Bb, Nr + 8, Nr + 8, 2 * C2), jnp.float32),  # conv3 pad (d=4)
            ]),
        compiler_params=pltpu.CompilerParams(
            dimension_semantics=("parallel",)),   # batch steps are independent
    )(Xcat, X, Q3, *weight_args)

    relation_map = jnp.transpose(rm_cl, (0, 3, 1, 2))   # glue: [bs,G,Nr,Nr]
    return relation_map, rx


# ----------------------------- parameters -----------------------------------
def xavier_uniform(key, shape, fan_in, fan_out):
    limit = (6.0 / (fan_in + fan_out)) ** 0.5
    return jax.random.uniform(key, shape, jnp.float32, -limit, limit)


def make_params(key, v_dim, q_dim, C, G):
    Din = v_dim + 4                     # pe_enable: +4 positional features
    C1, C2 = C // 2, C // 4
    ks = jax.random.split(key, 8)
    p = {
        "Wv": xavier_uniform(ks[0], (Din, C), Din, C),
        "bv": jnp.zeros((1, C), jnp.float32),
        "Wq": xavier_uniform(ks[1], (q_dim, C), q_dim, C),
        "bq": jnp.zeros((1, C), jnp.float32),
        "W1": xavier_uniform(ks[2], (3, 3, C, C1), C * 9, C1 * 9),
        "b1": jnp.zeros((1, C1), jnp.float32),
        "W2": xavier_uniform(ks[3], (3, 3, C1, C2), C1 * 9, C2 * 9),
        "b2": jnp.zeros((1, C2), jnp.float32),
        "W3": xavier_uniform(ks[4], (3, 3, C2, G), C2 * 9, G * 9),
        "b3": jnp.zeros((1, G), jnp.float32),
        # r_conv01/02/03 are referenced by forward() but never defined in
        # __init__; synthesize a second stack with identical shapes.
        "W01": xavier_uniform(ks[5], (3, 3, C, C1), C * 9, C1 * 9),
        "b01": jnp.zeros((1, C1), jnp.float32),
        "W02": xavier_uniform(ks[6], (3, 3, C1, C2), C1 * 9, C2 * 9),
        "b02": jnp.zeros((1, C2), jnp.float32),
        "W03": xavier_uniform(ks[7], (3, 3, C2, G), C2 * 9, G * 9),
        "b03": jnp.zeros((1, G), jnp.float32),
    }
    return p


# --------------------------- pure-JAX reference ------------------------------
def rn_reference(X, Q, pos, p):
    HI = jax.lax.Precision.HIGHEST
    Xc = jnp.concatenate([X, pos[:, :, jnp.array([0, 1, 4, 5])]], axis=2)
    xv = jax.nn.relu(jnp.einsum("bnd,dc->bnc", Xc, p["Wv"], precision=HI) + p["bv"])
    qv = jax.nn.relu(jnp.einsum("bd,dc->bc", Q, p["Wq"], precision=HI) + p["bq"])
    xp = xv + qv[:, None, :]
    P = xp[:, :, None, :] * xp[:, None, :, :]              # [bs,i,j,c]
    Pn = jnp.transpose(P, (0, 3, 1, 2))                    # NCHW

    def conv(x, w, b, d):
        y = jax.lax.conv_general_dilated(
            x, w, window_strides=(1, 1), padding=[(d, d), (d, d)],
            rhs_dilation=(d, d), dimension_numbers=("NCHW", "HWIO", "NCHW"),
            precision=HI)
        return jax.nn.relu(y + b.reshape(1, -1, 1, 1))

    def stack(x, w1, b1, w2, b2, w3, b3):
        h = conv(x, w1, b1, 1)
        h = conv(h, w2, b2, 2)
        return conv(h, w3, b3, 4)

    def sym_softmax(r):
        r = r + jnp.swapaxes(r, 2, 3)
        bs, G, Nr, _ = r.shape
        r = jax.nn.softmax(r.reshape(bs, G, -1), axis=2)
        return r.reshape(bs, G, Nr, Nr)

    rm = sym_softmax(stack(Pn, p["W1"], p["b1"], p["W2"], p["b2"], p["W3"], p["b3"]))
    rm0 = sym_softmax(stack(Pn, p["W01"], p["b01"], p["W02"], p["b02"], p["W03"], p["b03"]))
    G = rm.shape[1]
    comb = rm.sum(axis=1) + rm0.sum(axis=1)
    rX = jnp.einsum("bij,bjd->bid", comb, X, precision=HI) / (2.0 * G)
    return rm, rX


if __name__ == "__main__":
    bs, Nr, v_dim, q_dim = 4, 8, 16, 16
    subspace_dim, relation_glimpse = 32, 2

    key = jax.random.PRNGKey(0)
    kx, kq, kp, kw = jax.random.split(key, 4)
    X = jax.random.normal(kx, (bs, Nr, v_dim), jnp.float32)
    Q = jax.random.normal(kq, (bs, q_dim), jnp.float32)
    pos = jax.random.uniform(kp, (bs, Nr, 6), jnp.float32)
    params = make_params(kw, v_dim, q_dim, subspace_dim, relation_glimpse)

    relation_map, relational_X = rn_forward(X, Q, pos, params, block_bs=2)
    jax.block_until_ready((relation_map, relational_X))

    assert relation_map.shape == (bs, relation_glimpse, Nr, Nr)
    assert relational_X.shape == (bs, Nr, v_dim)
    # each glimpse map is a softmax over all Nr*Nr entries
    sums = jnp.sum(relation_map.reshape(bs, relation_glimpse, -1), axis=-1)
    assert bool(jnp.allclose(sums, 1.0, atol=2e-3))

    rm_ref, rx_ref = rn_reference(X, Q, pos, params)
    # bf16 MXU operands (f32 accumulation) vs. the f32 HIGHEST-precision
    # reference -> slightly looser tolerances than a pure-f32 kernel.
    assert bool(jnp.allclose(relation_map, rm_ref, atol=2e-2, rtol=2e-2))
    assert bool(jnp.allclose(relational_X, rx_ref, atol=2e-2, rtol=2e-2))

    print("KERNEL_OK")
</pallas_src>

<mosaic_0001>
module attributes {stable_mosaic.version = 11 : i64} {
  func.func @rn_kernel(%arg0: i32, %arg1: memref<2x8x20xf32, #tpu.memory_space<vmem>>, %arg2: memref<2x8x16xf32, #tpu.memory_space<vmem>>, %arg3: memref<2x1x16xf32, #tpu.memory_space<vmem>>, %arg4: memref<20x32xbf16, #tpu.memory_space<vmem>>, %arg5: memref<1x32xf32, #tpu.memory_space<vmem>>, %arg6: memref<16x32xbf16, #tpu.memory_space<vmem>>, %arg7: memref<1x32xf32, #tpu.memory_space<vmem>>, %arg8: memref<288x32xbf16, #tpu.memory_space<vmem>>, %arg9: memref<1x32xf32, #tpu.memory_space<vmem>>, %arg10: memref<288x16xbf16, #tpu.memory_space<vmem>>, %arg11: memref<1x16xf32, #tpu.memory_space<vmem>>, %arg12: memref<144x4xbf16, #tpu.memory_space<vmem>>, %arg13: memref<1x4xf32, #tpu.memory_space<vmem>>, %arg14: memref<2x8x8x2xf32, #tpu.memory_space<vmem>>, %arg15: memref<2x8x16xf32, #tpu.memory_space<vmem>>, %arg16: memref<2x10x10x32xf32, #tpu.memory_space<vmem>>, %arg17: memref<2x12x12x32xf32, #tpu.memory_space<vmem>>, %arg18: memref<2x16x16x16xf32, #tpu.memory_space<vmem>>) attributes {dimension_semantics = [#tpu.dimension_semantics<parallel>], iteration_bounds = array<i64: 2>, scalar_prefetch = 0 : i64, scratch_operands = 3 : i64, tpu.core_type = #tpu.core_type<tc>, window_params = [{transform_indices = @transform_0, window_bounds = array<i64: 2, 8, 20>}, {transform_indices = @transform_1, window_bounds = array<i64: 2, 8, 16>}, {transform_indices = @transform_2, window_bounds = array<i64: 2, 1, 16>}, {pipeline_mode = #tpu.pipeline_mode<synchronous>, transform_indices = @transform_3, window_bounds = array<i64: 20, 32>}, {pipeline_mode = #tpu.pipeline_mode<synchronous>, transform_indices = @transform_4, window_bounds = array<i64: 1, 32>}, {pipeline_mode = #tpu.pipeline_mode<synchronous>, transform_indices = @transform_5, window_bounds = array<i64: 16, 32>}, {pipeline_mode = #tpu.pipeline_mode<synchronous>, transform_indices = @transform_6, window_bounds = array<i64: 1, 32>}, {pipeline_mode = #tpu.pipeline_mode<synchronous>, transform_indices = @transform_7, window_bounds = array<i64: 288, 32>}, {pipeline_mode = #tpu.pipeline_mode<synchronous>, transform_indices = @transform_8, window_bounds = array<i64: 1, 32>}, {pipeline_mode = #tpu.pipeline_mode<synchronous>, transform_indices = @transform_9, window_bounds = array<i64: 288, 16>}, {pipeline_mode = #tpu.pipeline_mode<synchronous>, transform_indices = @transform_10, window_bounds = array<i64: 1, 16>}, {pipeline_mode = #tpu.pipeline_mode<synchronous>, transform_indices = @transform_11, window_bounds = array<i64: 144, 4>}, {pipeline_mode = #tpu.pipeline_mode<synchronous>, transform_indices = @transform_12, window_bounds = array<i64: 1, 4>}, {transform_indices = @transform_13, window_bounds = array<i64: 2, 8, 8, 2>}, {transform_indices = @transform_14, window_bounds = array<i64: 2, 8, 16>}]} {
    %cst = arith.constant 0.000000e+00 : f32
    %0 = vector.broadcast %cst : f32 to vector<2x1x10x32xf32>
    %cst_0 = arith.constant 0.000000e+00 : f32
    %1 = vector.broadcast %cst_0 : f32 to vector<2x8x1x32xf32>
    %c0 = arith.constant 0 : index
    %c0_1 = arith.constant 0 : index
    %c0_2 = arith.constant 0 : index
    %c0_3 = arith.constant 0 : index
    %2 = vector.load %arg16[%c0, %c0_1, %c0_2, %c0_3] : memref<2x10x10x32xf32, #tpu.memory_space<vmem>>, vector<2x1x10x32xf32>
    tpu.vector_store %arg16[%c0, %c0_1, %c0_2, %c0_3], %0 {strides = array<i32>} : memref<2x10x10x32xf32, #tpu.memory_space<vmem>>, vector<2x1x10x32xf32>,
    %c0_4 = arith.constant 0 : index
    %c9 = arith.constant 9 : index
    %c0_5 = arith.constant 0 : index
    %c0_6 = arith.constant 0 : index
    %3 = vector.load %arg16[%c0_4, %c9, %c0_5, %c0_6] : memref<2x10x10x32xf32, #tpu.memory_space<vmem>>, vector<2x1x10x32xf32>
    tpu.vector_store %arg16[%c0_4, %c9, %c0_5, %c0_6], %0 {strides = array<i32>} : memref<2x10x10x32xf32, #tpu.memory_space<vmem>>, vector<2x1x10x32xf32>,
    %c0_7 = arith.constant 0 : index
    %c1 = arith.constant 1 : index
    %c0_8 = arith.constant 0 : index
    %c0_9 = arith.constant 0 : index
    %4 = vector.load %arg16[%c0_7, %c1, %c0_8, %c0_9] : memref<2x10x10x32xf32, #tpu.memory_space<vmem>>, vector<2x8x1x32xf32>
    tpu.vector_store %arg16[%c0_7, %c1, %c0_8, %c0_9], %1 {strides = array<i32>} : memref<2x10x10x32xf32, #tpu.memory_space<vmem>>, vector<2x8x1x32xf32>,
    %c0_10 = arith.constant 0 : index
    %c1_11 = arith.constant 1 : index
    %c9_12 = arith.constant 9 : index
    %c0_13 = arith.constant 0 : index
    %5 = vector.load %arg16[%c0_10, %c1_11, %c9_12, %c0_13] : memref<2x10x10x32xf32, #tpu.memory_space<vmem>>, vector<2x8x1x32xf32>
    tpu.vector_store %arg16[%c0_10, %c1_11, %c9_12, %c0_13], %1 {strides = array<i32>} : memref<2x10x10x32xf32, #tpu.memory_space<vmem>>, vector<2x8x1x32xf32>,
    %cst_14 = arith.constant 0.000000e+00 : f32
    %6 = vector.broadcast %cst_14 : f32 to vector<2x2x12x32xf32>
    %cst_15 = arith.constant 0.000000e+00 : f32
    %7 = vector.broadcast %cst_15 : f32 to vector<2x8x2x32xf32>
    %c0_16 = arith.constant 0 : index
    %c0_17 = arith.constant 0 : index
    %c0_18 = arith.constant 0 : index
    %c0_19 = arith.constant 0 : index
    %8 = vector.load %arg17[%c0_16, %c0_17, %c0_18, %c0_19] : memref<2x12x12x32xf32, #tpu.memory_space<vmem>>, vector<2x2x12x32xf32>
    tpu.vector_store %arg17[%c0_16, %c0_17, %c0_18, %c0_19], %6 {strides = array<i32>} : memref<2x12x12x32xf32, #tpu.memory_space<vmem>>, vector<2x2x12x32xf32>,
    %c0_20 = arith.constant 0 : index
    %c10 = arith.constant 10 : index
    %c0_21 = arith.constant 0 : index
    %c0_22 = arith.constant 0 : index
    %9 = vector.load %arg17[%c0_20, %c10, %c0_21, %c0_22] : memref<2x12x12x32xf32, #tpu.memory_space<vmem>>, vector<2x2x12x32xf32>
    tpu.vector_store %arg17[%c0_20, %c10, %c0_21, %c0_22], %6 {strides = array<i32>} : memref<2x12x12x32xf32, #tpu.memory_space<vmem>>, vector<2x2x12x32xf32>,
    %c0_23 = arith.constant 0 : index
    %c2 = arith.constant 2 : index
    %c0_24 = arith.constant 0 : index
    %c0_25 = arith.constant 0 : index
    %10 = vector.load %arg17[%c0_23, %c2, %c0_24, %c0_25] : memref<2x12x12x32xf32, #tpu.memory_space<vmem>>, vector<2x8x2x32xf32>
    tpu.vector_store %arg17[%c0_23, %c2, %c0_24, %c0_25], %7 {strides = array<i32>} : memref<2x12x12x32xf32, #tpu.memory_space<vmem>>, vector<2x8x2x32xf32>,
    %c0_26 = arith.constant 0 : index
    %c2_27 = arith.constant 2 : index
    %c10_28 = arith.constant 10 : index
    %c0_29 = arith.constant 0 : index
    %11 = vector.load %arg17[%c0_26, %c2_27, %c10_28, %c0_29] : memref<2x12x12x32xf32, #tpu.memory_space<vmem>>, vector<2x8x2x32xf32>
    tpu.vector_store %arg17[%c0_26, %c2_27, %c10_28, %c0_29], %7 {strides = array<i32>} : memref<2x12x12x32xf32, #tpu.memory_space<vmem>>, vector<2x8x2x32xf32>,
    %cst_30 = arith.constant 0.000000e+00 : f32
    %12 = vector.broadcast %cst_30 : f32 to vector<2x4x16x16xf32>
    %cst_31 = arith.constant 0.000000e+00 : f32
    %13 = vector.broadcast %cst_31 : f32 to vector<2x8x4x16xf32>
    %c0_32 = arith.constant 0 : index
    %c0_33 = arith.constant 0 : index
    %c0_34 = arith.constant 0 : index
    %c0_35 = arith.constant 0 : index
    %14 = vector.load %arg18[%c0_32, %c0_33, %c0_34, %c0_35] : memref<2x16x16x16xf32, #tpu.memory_space<vmem>>, vector<2x4x16x16xf32>
    tpu.vector_store %arg18[%c0_32, %c0_33, %c0_34, %c0_35], %12 {strides = array<i32>} : memref<2x16x16x16xf32, #tpu.memory_space<vmem>>, vector<2x4x16x16xf32>,
    %c0_36 = arith.constant 0 : index
    %c12 = arith.constant 12 : index
    %c0_37 = arith.constant 0 : index
    %c0_38 = arith.constant 0 : index
    %15 = vector.load %arg18[%c0_36, %c12, %c0_37, %c0_38] : memref<2x16x16x16xf32, #tpu.memory_space<vmem>>, vector<2x4x16x16xf32>
    tpu.vector_store %arg18[%c0_36, %c12, %c0_37, %c0_38], %12 {strides = array<i32>} : memref<2x16x16x16xf32, #tpu.memory_space<vmem>>, vector<2x4x16x16xf32>,
    %c0_39 = arith.constant 0 : index
    %c4 = arith.constant 4 : index
    %c0_40 = arith.constant 0 : index
    %c0_41 = arith.constant 0 : index
    %16 = vector.load %arg18[%c0_39, %c4, %c0_40, %c0_41] : memref<2x16x16x16xf32, #tpu.memory_space<vmem>>, vector<2x8x4x16xf32>
    tpu.vector_store %arg18[%c0_39, %c4, %c0_40, %c0_41], %13 {strides = array<i32>} : memref<2x16x16x16xf32, #tpu.memory_space<vmem>>, vector<2x8x4x16xf32>,
    %c0_42 = arith.constant 0 : index
    %c4_43 = arith.constant 4 : index
    %c12_44 = arith.constant 12 : index
    %c0_45 = arith.constant 0 : index
    %17 = vector.load %arg18[%c0_42, %c4_43, %c12_44, %c0_45] : memref<2x16x16x16xf32, #tpu.memory_space<vmem>>, vector<2x8x4x16xf32>
    tpu.vector_store %arg18[%c0_42, %c4_43, %c12_44, %c0_45], %13 {strides = array<i32>} : memref<2x16x16x16xf32, #tpu.memory_space<vmem>>, vector<2x8x4x16xf32>,
    %c0_46 = arith.constant 0 : index
    %c0_47 = arith.constant 0 : index
    %c0_48 = arith.constant 0 : index
    %18 = vector.load %arg1[%c0_46, %c0_47, %c0_48] : memref<2x8x20xf32, #tpu.memory_space<vmem>>, vector<2x8x20xf32>
    %19 = vector.shape_cast %18 : vector<2x8x20xf32> to vector<16x20xf32>
    %20 = arith.truncf %19 : vector<16x20xf32> to vector<16x20xbf16>
    %c0_49 = arith.constant 0 : index
    %c0_50 = arith.constant 0 : index
    %21 = vector.load %arg4[%c0_49, %c0_50] : memref<20x32xbf16, #tpu.memory_space<vmem>>, vector<20x32xbf16>
    %cst_51 = arith.constant dense<0.000000e+00> : vector<16x32xf32>
    %22 = tpu.matmul %20, %21, %cst_51 {dimension_numbers = #tpu.dot_dimension_numbers<[1], [0], [0], [1], [0, 0, 1, 1], [], []>} : vector<16x20xbf16>, vector<20x32xbf16>, vector<16x32xf32> -> vector<16x32xf32>
    %c0_52 = arith.constant 0 : index
    %c0_53 = arith.constant 0 : index
    %23 = vector.load %arg5[%c0_52, %c0_53] : memref<1x32xf32, #tpu.memory_space<vmem>>, vector<1x32xf32>
    %24 = vector.broadcast %23 : vector<1x32xf32> to vector<16x32xf32>
    %25 = arith.addf %22, %24 : vector<16x32xf32>
    %cst_54 = arith.constant 0.000000e+00 : f32
    %26 = vector.broadcast %cst_54 : f32 to vector<16x32xf32>
    %27 = arith.maximumf %25, %26 : vector<16x32xf32>
    %c0_55 = arith.constant 0 : index
    %c0_56 = arith.constant 0 : index
    %c0_57 = arith.constant 0 : index
    %28 = vector.load %arg3[%c0_55, %c0_56, %c0_57] : memref<2x1x16xf32, #tpu.memory_space<vmem>>, vector<2x1x16xf32>
    %29 = vector.shape_cast %28 : vector<2x1x16xf32> to vector<2x16xf32>
    %30 = arith.truncf %29 : vector<2x16xf32> to vector<2x16xbf16>
    %c0_58 = arith.constant 0 : index
    %c0_59 = arith.constant 0 : index
    %31 = vector.load %arg6[%c0_58, %c0_59] : memref<16x32xbf16, #tpu.memory_space<vmem>>, vector<16x32xbf16>
    %cst_60 = arith.constant dense<0.000000e+00> : vector<2x32xf32>
    %32 = tpu.matmul %30, %31, %cst_60 {dimension_numbers = #tpu.dot_dimension_numbers<[1], [0], [0], [1], [0, 0, 1, 1], [], []>} : vector<2x16xbf16>, vector<16x32xbf16>, vector<2x32xf32> -> vector<2x32xf32>
    %c0_61 = arith.constant 0 : index
    %c0_62 = arith.constant 0 : index
    %33 = vector.load %arg7[%c0_61, %c0_62] : memref<1x32xf32, #tpu.memory_space<vmem>>, vector<1x32xf32>
    %34 = vector.broadcast %33 : vector<1x32xf32> to vector<2x32xf32>
    %35 = arith.addf %32, %34 : vector<2x32xf32>
    %cst_63 = arith.constant 0.000000e+00 : f32
    %36 = vector.broadcast %cst_63 : f32 to vector<2x32xf32>
    %37 = arith.maximumf %35, %36 : vector<2x32xf32>
    %38 = vector.shape_cast %27 : vector<16x32xf32> to vector<2x8x32xf32>
    %39 = vector.shape_cast %37 : vector<2x32xf32> to vector<2x1x32xf32>
    %40 = vector.broadcast %39 : vector<2x1x32xf32> to vector<2x8x32xf32>
    %41 = arith.addf %38, %40 : vector<2x8x32xf32>
    %42 = vector.shape_cast %41 : vector<2x8x32xf32> to vector<2x8x1x32xf32>
    %43 = vector.shape_cast %41 : vector<2x8x32xf32> to vector<2x1x8x32xf32>
    %44 = vector.broadcast %42 : vector<2x8x1x32xf32> to vector<2x8x8x32xf32>
    %45 = vector.broadcast %43 : vector<2x1x8x32xf32> to vector<2x8x8x32xf32>
    %46 = arith.mulf %44, %45 : vector<2x8x8x32xf32>
    %c0_64 = arith.constant 0 : index
    %c1_65 = arith.constant 1 : index
    %c1_66 = arith.constant 1 : index
    %c0_67 = arith.constant 0 : index
    %47 = vector.load %arg16[%c0_64, %c1_65, %c1_66, %c0_67] : memref<2x10x10x32xf32, #tpu.memory_space<vmem>>, vector<2x8x8x32xf32>
    tpu.vector_store %arg16[%c0_64, %c1_65, %c1_66, %c0_67], %46 {strides = array<i32>} : memref<2x10x10x32xf32, #tpu.memory_space<vmem>>, vector<2x8x8x32xf32>,
    %c0_68 = arith.constant 0 : index
    %c0_69 = arith.constant 0 : index
    %c0_70 = arith.constant 0 : index
    %c0_71 = arith.constant 0 : index
    %48 = vector.load %arg16[%c0_68, %c0_69, %c0_70, %c0_71] : memref<2x10x10x32xf32, #tpu.memory_space<vmem>>, vector<2x8x8x32xf32>
    %c0_72 = arith.constant 0 : index
    %c0_73 = arith.constant 0 : index
    %c1_74 = arith.constant 1 : index
    %c0_75 = arith.constant 0 : index
    %49 = vector.load %arg16[%c0_72, %c0_73, %c1_74, %c0_75] : memref<2x10x10x32xf32, #tpu.memory_space<vmem>>, vector<2x8x8x32xf32>
    %c0_76 = arith.constant 0 : index
    %c0_77 = arith.constant 0 : index
    %c2_78 = arith.constant 2 : index
    %c0_79 = arith.constant 0 : index
    %50 = vector.load %arg16[%c0_76, %c0_77, %c2_78, %c0_79] : memref<2x10x10x32xf32, #tpu.memory_space<vmem>>, vector<2x8x8x32xf32>
    %c0_80 = arith.constant 0 : index
    %c1_81 = arith.constant 1 : index
    %c0_82 = arith.constant 0 : index
    %c0_83 = arith.constant 0 : index
    %51 = vector.load %arg16[%c0_80, %c1_81, %c0_82, %c0_83] : memref<2x10x10x32xf32, #tpu.memory_space<vmem>>, vector<2x8x8x32xf32>
    %c0_84 = arith.constant 0 : index
    %c1_85 = arith.constant 1 : index
    %c1_86 = arith.constant 1 : index
    %c0_87 = arith.constant 0 : index
    %52 = vector.load %arg16[%c0_84, %c1_85, %c1_86, %c0_87] : memref<2x10x10x32xf32, #tpu.memory_space<vmem>>, vector<2x8x8x32xf32>
    %c0_88 = arith.constant 0 : index
    %c1_89 = arith.constant 1 : index
    %c2_90 = arith.constant 2 : index
    %c0_91 = arith.constant 0 : index
    %53 = vector.load %arg16[%c0_88, %c1_89, %c2_90, %c0_91] : memref<2x10x10x32xf32, #tpu.memory_space<vmem>>, vector<2x8x8x32xf32>
    %c0_92 = arith.constant 0 : index
    %c2_93 = arith.constant 2 : index
    %c0_94 = arith.constant 0 : index
    %c0_95 = arith.constant 0 : index
    %54 = vector.load %arg16[%c0_92, %c2_93, %c0_94, %c0_95] : memref<2x10x10x32xf32, #tpu.memory_space<vmem>>, vector<2x8x8x32xf32>
    %c0_96 = arith.constant 0 : index
    %c2_97 = arith.constant 2 : index
    %c1_98 = arith.constant 1 : index
    %c0_99 = arith.constant 0 : index
    %55 = vector.load %arg16[%c0_96, %c2_97, %c1_98, %c0_99] : memref<2x10x10x32xf32, #tpu.memory_space<vmem>>, vector<2x8x8x32xf32>
    %c0_100 = arith.constant 0 : index
    %c2_101 = arith.constant 2 : index
    %c2_102 = arith.constant 2 : index
    %c0_103 = arith.constant 0 : index
    %56 = vector.load %arg16[%c0_100, %c2_101, %c2_102, %c0_103] : memref<2x10x10x32xf32, #tpu.memory_space<vmem>>, vector<2x8x8x32xf32>
    %57 = tpu.concatenate %48, %49, %50, %51, %52, %53, %54, %55, %56 in 3 : vector<2x8x8x32xf32>, vector<2x8x8x32xf32>, vector<2x8x8x32xf32>, vector<2x8x8x32xf32>, vector<2x8x8x32xf32>, vector<2x8x8x32xf32>, vector<2x8x8x32xf32>, vector<2x8x8x32xf32>, vector<2x8x8x32xf32> -> vector<2x8x8x288xf32>
    %58 = vector.shape_cast %57 : vector<2x8x8x288xf32> to vector<128x288xf32>
    %59 = arith.truncf %58 : vector<128x288xf32> to vector<128x288xbf16>
    %c0_104 = arith.constant 0 : index
    %c0_105 = arith.constant 0 : index
    %60 = vector.load %arg8[%c0_104, %c0_105] : memref<288x32xbf16, #tpu.memory_space<vmem>>, vector<288x32xbf16>
    %cst_106 = arith.constant dense<0.000000e+00> : vector<128x32xf32>
    %61 = tpu.matmul %59, %60, %cst_106 {dimension_numbers = #tpu.dot_dimension_numbers<[1], [0], [0], [1], [0, 0, 1, 1], [], []>} : vector<128x288xbf16>, vector<288x32xbf16>, vector<128x32xf32> -> vector<128x32xf32>
    %c0_107 = arith.constant 0 : index
    %c0_108 = arith.constant 0 : index
    %62 = vector.load %arg9[%c0_107, %c0_108] : memref<1x32xf32, #tpu.memory_space<vmem>>, vector<1x32xf32>
    %63 = vector.broadcast %62 : vector<1x32xf32> to vector<128x32xf32>
    %64 = arith.addf %61, %63 : vector<128x32xf32>
    %cst_109 = arith.constant 0.000000e+00 : f32
    %65 = vector.broadcast %cst_109 : f32 to vector<128x32xf32>
    %66 = arith.maximumf %64, %65 : vector<128x32xf32>
    %67 = vector.shape_cast %66 : vector<128x32xf32> to vector<2x8x8x32xf32>
    %c0_110 = arith.constant 0 : index
    %c2_111 = arith.constant 2 : index
    %c2_112 = arith.constant 2 : index
    %c0_113 = arith.constant 0 : index
    %68 = vector.load %arg17[%c0_110, %c2_111, %c2_112, %c0_113] : memref<2x12x12x32xf32, #tpu.memory_space<vmem>>, vector<2x8x8x32xf32>
    tpu.vector_store %arg17[%c0_110, %c2_111, %c2_112, %c0_113], %67 {strides = array<i32>} : memref<2x12x12x32xf32, #tpu.memory_space<vmem>>, vector<2x8x8x32xf32>,
    %c0_114 = arith.constant 0 : index
    %c0_115 = arith.constant 0 : index
    %c0_116 = arith.constant 0 : index
    %c0_117 = arith.constant 0 : index
    %69 = vector.load %arg17[%c0_114, %c0_115, %c0_116, %c0_117] : memref<2x12x12x32xf32, #tpu.memory_space<vmem>>, vector<2x8x8x32xf32>
    %c0_118 = arith.constant 0 : index
    %c0_119 = arith.constant 0 : index
    %c2_120 = arith.constant 2 : index
    %c0_121 = arith.constant 0 : index
    %70 = vector.load %arg17[%c0_118, %c0_119, %c2_120, %c0_121] : memref<2x12x12x32xf32, #tpu.memory_space<vmem>>, vector<2x8x8x32xf32>
    %c0_122 = arith.constant 0 : index
    %c0_123 = arith.constant 0 : index
    %c4_124 = arith.constant 4 : index
    %c0_125 = arith.constant 0 : index
    %71 = vector.load %arg17[%c0_122, %c0_123, %c4_124, %c0_125] : memref<2x12x12x32xf32, #tpu.memory_space<vmem>>, vector<2x8x8x32xf32>
    %c0_126 = arith.constant 0 : index
    %c2_127 = arith.constant 2 : index
    %c0_128 = arith.constant 0 : index
    %c0_129 = arith.constant 0 : index
    %72 = vector.load %arg17[%c0_126, %c2_127, %c0_128, %c0_129] : memref<2x12x12x32xf32, #tpu.memory_space<vmem>>, vector<2x8x8x32xf32>
    %c0_130 = arith.constant 0 : index
    %c2_131 = arith.constant 2 : index
    %c2_132 = arith.constant 2 : index
    %c0_133 = arith.constant 0 : index
    %73 = vector.load %arg17[%c0_130, %c2_131, %c2_132, %c0_133] : memref<2x12x12x32xf32, #tpu.memory_space<vmem>>, vector<2x8x8x32xf32>
    %c0_134 = arith.constant 0 : index
    %c2_135 = arith.constant 2 : index
    %c4_136 = arith.constant 4 : index
    %c0_137 = arith.constant 0 : index
    %74 = vector.load %arg17[%c0_134, %c2_135, %c4_136, %c0_137] : memref<2x12x12x32xf32, #tpu.memory_space<vmem>>, vector<2x8x8x32xf32>
    %c0_138 = arith.constant 0 : index
    %c4_139 = arith.constant 4 : index
    %c0_140 = arith.constant 0 : index
    %c0_141 = arith.constant 0 : index
    %75 = vector.load %arg17[%c0_138, %c4_139, %c0_140, %c0_141] : memref<2x12x12x32xf32, #tpu.memory_space<vmem>>, vector<2x8x8x32xf32>
    %c0_142 = arith.constant 0 : index
    %c4_143 = arith.constant 4 : index
    %c2_144 = arith.constant 2 : index
    %c0_145 = arith.constant 0 : index
    %76 = vector.load %arg17[%c0_142, %c4_143, %c2_144, %c0_145] : memref<2x12x12x32xf32, #tpu.memory_space<vmem>>, vector<2x8x8x32xf32>
    %c0_146 = arith.constant 0 : index
    %c4_147 = arith.constant 4 : index
    %c4_148 = arith.constant 4 : index
    %c0_149 = arith.constant 0 : index
    %77 = vector.load %arg17[%c0_146, %c4_147, %c4_148, %c0_149] : memref<2x12x12x32xf32, #tpu.memory_space<vmem>>, vector<2x8x8x32xf32>
    %78 = tpu.concatenate %69, %70, %71, %72, %73, %74, %75, %76, %77 in 3 : vector<2x8x8x32xf32>, vector<2x8x8x32xf32>, vector<2x8x8x32xf32>, vector<2x8x8x32xf32>, vector<2x8x8x32xf32>, vector<2x8x8x32xf32>, vector<2x8x8x32xf32>, vector<2x8x8x32xf32>, vector<2x8x8x32xf32> -> vector<2x8x8x288xf32>
    %79 = vector.shape_cast %78 : vector<2x8x8x288xf32> to vector<128x288xf32>
    %80 = arith.truncf %79 : vector<128x288xf32> to vector<128x288xbf16>
    %c0_150 = arith.constant 0 : index
    %c0_151 = arith.constant 0 : index
    %81 = vector.load %arg10[%c0_150, %c0_151] : memref<288x16xbf16, #tpu.memory_space<vmem>>, vector<288x16xbf16>
    %cst_152 = arith.constant dense<0.000000e+00> : vector<128x16xf32>
    %82 = tpu.matmul %80, %81, %cst_152 {dimension_numbers = #tpu.dot_dimension_numbers<[1], [0], [0], [1], [0, 0, 1, 1], [], []>} : vector<128x288xbf16>, vector<288x16xbf16>, vector<128x16xf32> -> vector<128x16xf32>
    %c0_153 = arith.constant 0 : index
    %c0_154 = arith.constant 0 : index
    %83 = vector.load %arg11[%c0_153, %c0_154] : memref<1x16xf32, #tpu.memory_space<vmem>>, vector<1x16xf32>
    %84 = vector.broadcast %83 : vector<1x16xf32> to vector<128x16xf32>
    %85 = arith.addf %82, %84 : vector<128x16xf32>
    %cst_155 = arith.constant 0.000000e+00 : f32
    %86 = vector.broadcast %cst_155 : f32 to vector<128x16xf32>
    %87 = arith.maximumf %85, %86 : vector<128x16xf32>
    %88 = vector.shape_cast %87 : vector<128x16xf32> to vector<2x8x8x16xf32>
    %c0_156 = arith.constant 0 : index
    %c4_157 = arith.constant 4 : index
    %c4_158 = arith.constant 4 : index
    %c0_159 = arith.constant 0 : index
    %89 = vector.load %arg18[%c0_156, %c4_157, %c4_158, %c0_159] : memref<2x16x16x16xf32, #tpu.memory_space<vmem>>, vector<2x8x8x16xf32>
    tpu.vector_store %arg18[%c0_156, %c4_157, %c4_158, %c0_159], %88 {strides = array<i32>} : memref<2x16x16x16xf32, #tpu.memory_space<vmem>>, vector<2x8x8x16xf32>,
    %c0_160 = arith.constant 0 : index
    %c0_161 = arith.constant 0 : index
    %c0_162 = arith.constant 0 : index
    %c0_163 = arith.constant 0 : index
    %90 = vector.load %arg18[%c0_160, %c0_161, %c0_162, %c0_163] : memref<2x16x16x16xf32, #tpu.memory_space<vmem>>, vector<2x8x8x16xf32>
    %c0_164 = arith.constant 0 : index
    %c0_165 = arith.constant 0 : index
    %c4_166 = arith.constant 4 : index
    %c0_167 = arith.constant 0 : index
    %91 = vector.load %arg18[%c0_164, %c0_165, %c4_166, %c0_167] : memref<2x16x16x16xf32, #tpu.memory_space<vmem>>, vector<2x8x8x16xf32>
    %c0_168 = arith.constant 0 : index
    %c0_169 = arith.constant 0 : index
    %c8 = arith.constant 8 : index
    %c0_170 = arith.constant 0 : index
    %92 = vector.load %arg18[%c0_168, %c0_169, %c8, %c0_170] : memref<2x16x16x16xf32, #tpu.memory_space<vmem>>, vector<2x8x8x16xf32>
    %c0_171 = arith.constant 0 : index
    %c4_172 = arith.constant 4 : index
    %c0_173 = arith.constant 0 : index
    %c0_174 = arith.constant 0 : index
    %93 = vector.load %arg18[%c0_171, %c4_172, %c0_173, %c0_174] : memref<2x16x16x16xf32, #tpu.memory_space<vmem>>, vector<2x8x8x16xf32>
    %c0_175 = arith.constant 0 : index
    %c4_176 = arith.constant 4 : index
    %c4_177 = arith.constant 4 : index
    %c0_178 = arith.constant 0 : index
    %94 = vector.load %arg18[%c0_175, %c4_176, %c4_177, %c0_178] : memref<2x16x16x16xf32, #tpu.memory_space<vmem>>, vector<2x8x8x16xf32>
    %c0_179 = arith.constant 0 : index
    %c4_180 = arith.constant 4 : index
    %c8_181 = arith.constant 8 : index
    %c0_182 = arith.constant 0 : index
    %95 = vector.load %arg18[%c0_179, %c4_180, %c8_181, %c0_182] : memref<2x16x16x16xf32, #tpu.memory_space<vmem>>, vector<2x8x8x16xf32>
    %c0_183 = arith.constant 0 : index
    %c8_184 = arith.constant 8 : index
    %c0_185 = arith.constant 0 : index
    %c0_186 = arith.constant 0 : index
    %96 = vector.load %arg18[%c0_183, %c8_184, %c0_185, %c0_186] : memref<2x16x16x16xf32, #tpu.memory_space<vmem>>, vector<2x8x8x16xf32>
    %c0_187 = arith.constant 0 : index
    %c8_188 = arith.constant 8 : index
    %c4_189 = arith.constant 4 : index
    %c0_190 = arith.constant 0 : index
    %97 = vector.load %arg18[%c0_187, %c8_188, %c4_189, %c0_190] : memref<2x16x16x16xf32, #tpu.memory_space<vmem>>, vector<2x8x8x16xf32>
    %c0_191 = arith.constant 0 : index
    %c8_192 = arith.constant 8 : index
    %c8_193 = arith.constant 8 : index
    %c0_194 = arith.constant 0 : index
    %98 = vector.load %arg18[%c0_191, %c8_192, %c8_193, %c0_194] : memref<2x16x16x16xf32, #tpu.memory_space<vmem>>, vector<2x8x8x16xf32>
    %99 = tpu.concatenate %90, %91, %92, %93, %94, %95, %96, %97, %98 in 3 : vector<2x8x8x16xf32>, vector<2x8x8x16xf32>, vector<2x8x8x16xf32>, vector<2x8x8x16xf32>, vector<2x8x8x16xf32>, vector<2x8x8x16xf32>, vector<2x8x8x16xf32>, vector<2x8x8x16xf32>, vector<2x8x8x16xf32> -> vector<2x8x8x144xf32>
    %100 = vector.shape_cast %99 : vector<2x8x8x144xf32> to vector<128x144xf32>
    %101 = arith.truncf %100 : vector<128x144xf32> to vector<128x144xbf16>
    %c0_195 = arith.constant 0 : index
    %c0_196 = arith.constant 0 : index
    %102 = vector.load %arg12[%c0_195, %c0_196] : memref<144x4xbf16, #tpu.memory_space<vmem>>, vector<144x4xbf16>
    %cst_197 = arith.constant dense<0.000000e+00> : vector<128x4xf32>
    %103 = tpu.matmul %101, %102, %cst_197 {dimension_numbers = #tpu.dot_dimension_numbers<[1], [0], [0], [1], [0, 0, 1, 1], [], []>} : vector<128x144xbf16>, vector<144x4xbf16>, vector<128x4xf32> -> vector<128x4xf32>
    %c0_198 = arith.constant 0 : index
    %c0_199 = arith.constant 0 : index
    %104 = vector.load %arg13[%c0_198, %c0_199] : memref<1x4xf32, #tpu.memory_space<vmem>>, vector<1x4xf32>
    %105 = vector.broadcast %104 : vector<1x4xf32> to vector<128x4xf32>
    %106 = arith.addf %103, %105 : vector<128x4xf32>
    %cst_200 = arith.constant 0.000000e+00 : f32
    %107 = vector.broadcast %cst_200 : f32 to vector<128x4xf32>
    %108 = arith.maximumf %106, %107 : vector<128x4xf32>
    %109 = vector.shape_cast %108 : vector<128x4xf32> to vector<2x8x8x4xf32>
    %110 = vector.extract_strided_slice %109 {offsets = [0, 0, 0, 0], sizes = [2, 1, 8, 4], strides = [1, 1, 1, 1]} : vector<2x8x8x4xf32> to vector<2x1x8x4xf32>
    %111 = vector.shape_cast %110 : vector<2x1x8x4xf32> to vector<2x8x4xf32>
    %112 = vector.shape_cast %111 : vector<2x8x4xf32> to vector<2x8x1x4xf32>
    %113 = vector.extract_strided_slice %109 {offsets = [0, 1, 0, 0], sizes = [2, 1, 8, 4], strides = [1, 1, 1, 1]} : vector<2x8x8x4xf32> to vector<2x1x8x4xf32>
    %114 = vector.shape_cast %113 : vector<2x1x8x4xf32> to vector<2x8x4xf32>
    %115 = vector.shape_cast %114 : vector<2x8x4xf32> to vector<2x8x1x4xf32>
    %116 = vector.extract_strided_slice %109 {offsets = [0, 2, 0, 0], sizes = [2, 1, 8, 4], strides = [1, 1, 1, 1]} : vector<2x8x8x4xf32> to vector<2x1x8x4xf32>
    %117 = vector.shape_cast %116 : vector<2x1x8x4xf32> to vector<2x8x4xf32>
    %118 = vector.shape_cast %117 : vector<2x8x4xf32> to vector<2x8x1x4xf32>
    %119 = vector.extract_strided_slice %109 {offsets = [0, 3, 0, 0], sizes = [2, 1, 8, 4], strides = [1, 1, 1, 1]} : vector<2x8x8x4xf32> to vector<2x1x8x4xf32>
    %120 = vector.shape_cast %119 : vector<2x1x8x4xf32> to vector<2x8x4xf32>
    %121 = vector.shape_cast %120 : vector<2x8x4xf32> to vector<2x8x1x4xf32>
    %122 = vector.extract_strided_slice %109 {offsets = [0, 4, 0, 0], sizes = [2, 1, 8, 4], strides = [1, 1, 1, 1]} : vector<2x8x8x4xf32> to vector<2x1x8x4xf32>
    %123 = vector.shape_cast %122 : vector<2x1x8x4xf32> to vector<2x8x4xf32>
    %124 = vector.shape_cast %123 : vector<2x8x4xf32> to vector<2x8x1x4xf32>
    %125 = vector.extract_strided_slice %109 {offsets = [0, 5, 0, 0], sizes = [2, 1, 8, 4], strides = [1, 1, 1, 1]} : vector<2x8x8x4xf32> to vector<2x1x8x4xf32>
    %126 = vector.shape_cast %125 : vector<2x1x8x4xf32> to vector<2x8x4xf32>
    %127 = vector.shape_cast %126 : vector<2x8x4xf32> to vector<2x8x1x4xf32>
    %128 = vector.extract_strided_slice %109 {offsets = [0, 6, 0, 0], sizes = [2, 1, 8, 4], strides = [1, 1, 1, 1]} : vector<2x8x8x4xf32> to vector<2x1x8x4xf32>
    %129 = vector.shape_cast %128 : vector<2x1x8x4xf32> to vector<2x8x4xf32>
    %130 = vector.shape_cast %129 : vector<2x8x4xf32> to vector<2x8x1x4xf32>
    %131 = vector.extract_strided_slice %109 {offsets = [0, 7, 0, 0], sizes = [2, 1, 8, 4], strides = [1, 1, 1, 1]} : vector<2x8x8x4xf32> to vector<2x1x8x4xf32>
    %132 = vector.shape_cast %131 : vector<2x1x8x4xf32> to vector<2x8x4xf32>
    %133 = vector.shape_cast %132 : vector<2x8x4xf32> to vector<2x8x1x4xf32>
    %134 = tpu.concatenate %112, %115, %118, %121, %124, %127, %130, %133 in 2 : vector<2x8x1x4xf32>, vector<2x8x1x4xf32>, vector<2x8x1x4xf32>, vector<2x8x1x4xf32>, vector<2x8x1x4xf32>, vector<2x8x1x4xf32>, vector<2x8x1x4xf32>, vector<2x8x1x4xf32> -> vector<2x8x8x4xf32>
    %135 = arith.addf %109, %134 : vector<2x8x8x4xf32>
    %cst_201 = arith.constant dense<0xFF800000> : vector<2x8x4xf32>
    %136 = vector.multi_reduction <maximumf>, %135, %cst_201 [2] : vector<2x8x8x4xf32> to vector<2x8x4xf32>
    %137 = vector.shape_cast %136 : vector<2x8x4xf32> to vector<2x8x1x4xf32>
    %cst_202 = arith.constant dense<0xFF800000> : vector<2x1x4xf32>
    %138 = vector.multi_reduction <maximumf>, %137, %cst_202 [1] : vector<2x8x1x4xf32> to vector<2x1x4xf32>
    %139 = vector.shape_cast %138 : vector<2x1x4xf32> to vector<2x1x1x4xf32>
    %140 = vector.broadcast %139 : vector<2x1x1x4xf32> to vector<2x8x8x4xf32>
    %141 = arith.subf %135, %140 : vector<2x8x8x4xf32>
    %142 = math.exp %141 : vector<2x8x8x4xf32>
    %cst_203 = arith.constant dense<0.000000e+00> : vector<2x8x4xf32>
    %143 = vector.multi_reduction <add>, %142, %cst_203 [2] : vector<2x8x8x4xf32> to vector<2x8x4xf32>
    %144 = vector.shape_cast %143 : vector<2x8x4xf32> to vector<2x8x1x4xf32>
    %cst_204 = arith.constant dense<0.000000e+00> : vector<2x1x4xf32>
    %145 = vector.multi_reduction <add>, %144, %cst_204 [1] : vector<2x8x1x4xf32> to vector<2x1x4xf32>
    %146 = vector.shape_cast %145 : vector<2x1x4xf32> to vector<2x1x1x4xf32>
    %147 = vector.broadcast %146 : vector<2x1x1x4xf32> to vector<2x8x8x4xf32>
    %148 = arith.divf %142, %147 : vector<2x8x8x4xf32>
    %149 = vector.extract_strided_slice %148 {offsets = [0, 0, 0, 0], sizes = [2, 8, 8, 2], strides = [1, 1, 1, 1]} : vector<2x8x8x4xf32> to vector<2x8x8x2xf32>
    %c0_205 = arith.constant 0 : index
    %c0_206 = arith.constant 0 : index
    %c0_207 = arith.constant 0 : index
    %c0_208 = arith.constant 0 : index
    %150 = vector.load %arg14[%c0_205, %c0_206, %c0_207, %c0_208] : memref<2x8x8x2xf32, #tpu.memory_space<vmem>>, vector<2x8x8x2xf32>
    tpu.vector_store %arg14[%c0_205, %c0_206, %c0_207, %c0_208], %149 {strides = array<i32>} : memref<2x8x8x2xf32, #tpu.memory_space<vmem>>, vector<2x8x8x2xf32>,
    %cst_209 = arith.constant dense<0.000000e+00> : vector<2x8x8xf32>
    %151 = vector.multi_reduction <add>, %148, %cst_209 [3] : vector<2x8x8x4xf32> to vector<2x8x8xf32>
    %c0_210 = arith.constant 0 : index
    %c0_211 = arith.constant 0 : index
    %c0_212 = arith.constant 0 : index
    %152 = vector.load %arg2[%c0_210, %c0_211, %c0_212] : memref<2x8x16xf32, #tpu.memory_space<vmem>>, vector<2x8x16xf32>
    "tpu.trace_start"() <{level = 10 : i32, message = "bij,bjd->bid"}> : () -> ()
    %cst_213 = arith.constant dense<0.000000e+00> : vector<2x8x16xf32>
    %153 = tpu.matmul %151, %152, %cst_213 {dimension_numbers = #tpu.dot_dimension_numbers<[2], [1], [1], [2], [0, 0, 0, 1, 1, 2], [0], [0]>} : vector<2x8x8xf32>, vector<2x8x16xf32>, vector<2x8x16xf32> -> vector<2x8x16xf32>
    "tpu.trace_stop"() : () -> ()
    %cst_214 = arith.constant 2.500000e-01 : f32
    %154 = vector.broadcast %cst_214 : f32 to vector<2x8x16xf32>
    %155 = arith.mulf %153, %154 : vector<2x8x16xf32>
    %c0_215 = arith.constant 0 : index
    %c0_216 = arith.constant 0 : index
    %c0_217 = arith.constant 0 : index
    %156 = vector.load %arg15[%c0_215, %c0_216, %c0_217] : memref<2x8x16xf32, #tpu.memory_space<vmem>>, vector<2x8x16xf32>
    tpu.vector_store %arg15[%c0_215, %c0_216, %c0_217], %155 {strides = array<i32>} : memref<2x8x16xf32, #tpu.memory_space<vmem>>, vector<2x8x16xf32>,
    return
  }
  func.func @transform_0(%arg0: i32) -> (i32, i32, i32) {
    %c0_i32 = arith.constant 0 : i32
    %c0_i32_0 = arith.constant 0 : i32
    %c0_i32_1 = arith.constant 0 : i32
    return %arg0, %c0_i32, %c0_i32_0 : i32, i32, i32
  }
  func.func @transform_1(%arg0: i32) -> (i32, i32, i32) {
    %c0_i32 = arith.constant 0 : i32
    %c0_i32_0 = arith.constant 0 : i32
    %c0_i32_1 = arith.constant 0 : i32
    return %arg0, %c0_i32, %c0_i32_0 : i32, i32, i32
  }
  func.func @transform_2(%arg0: i32) -> (i32, i32, i32) {
    %c0_i32 = arith.constant 0 : i32
    %c0_i32_0 = arith.constant 0 : i32
    %c0_i32_1 = arith.constant 0 : i32
    return %arg0, %c0_i32, %c0_i32_0 : i32, i32, i32
  }
  func.func @transform_3(%arg0: i32) -> (i32, i32) {
    %c0_i32 = arith.constant 0 : i32
    %c0_i32_0 = arith.constant 0 : i32
    %c0_i32_1 = arith.constant 0 : i32
    return %c0_i32, %c0_i32_0 : i32, i32
  }
  func.func @transform_4(%arg0: i32) -> (i32, i32) {
    %c0_i32 = arith.constant 0 : i32
    %c0_i32_0 = arith.constant 0 : i32
    %c0_i32_1 = arith.constant 0 : i32
    return %c0_i32, %c0_i32_0 : i32, i32
  }
  func.func @transform_5(%arg0: i32) -> (i32, i32) {
    %c0_i32 = arith.constant 0 : i32
    %c0_i32_0 = arith.constant 0 : i32
    %c0_i32_1 = arith.constant 0 : i32
    return %c0_i32, %c0_i32_0 : i32, i32
  }
  func.func @transform_6(%arg0: i32) -> (i32, i32) {
    %c0_i32 = arith.constant 0 : i32
    %c0_i32_0 = arith.constant 0 : i32
    %c0_i32_1 = arith.constant 0 : i32
    return %c0_i32, %c0_i32_0 : i32, i32
  }
  func.func @transform_7(%arg0: i32) -> (i32, i32) {
    %c0_i32 = arith.constant 0 : i32
    %c0_i32_0 = arith.constant 0 : i32
    %c0_i32_1 = arith.constant 0 : i32
    return %c0_i32, %c0_i32_0 : i32, i32
  }
  func.func @transform_8(%arg0: i32) -> (i32, i32) {
    %c0_i32 = arith.constant 0 : i32
    %c0_i32_0 = arith.constant 0 : i32
    %c0_i32_1 = arith.constant 0 : i32
    return %c0_i32, %c0_i32_0 : i32, i32
  }
  func.func @transform_9(%arg0: i32) -> (i32, i32) {
    %c0_i32 = arith.constant 0 : i32
    %c0_i32_0 = arith.constant 0 : i32
    %c0_i32_1 = arith.constant 0 : i32
    return %c0_i32, %c0_i32_0 : i32, i32
  }
  func.func @transform_10(%arg0: i32) -> (i32, i32) {
    %c0_i32 = arith.constant 0 : i32
    %c0_i32_0 = arith.constant 0 : i32
    %c0_i32_1 = arith.constant 0 : i32
    return %c0_i32, %c0_i32_0 : i32, i32
  }
  func.func @transform_11(%arg0: i32) -> (i32, i32) {
    %c0_i32 = arith.constant 0 : i32
    %c0_i32_0 = arith.constant 0 : i32
    %c0_i32_1 = arith.constant 0 : i32
    return %c0_i32, %c0_i32_0 : i32, i32
  }
  func.func @transform_12(%arg0: i32) -> (i32, i32) {
    %c0_i32 = arith.constant 0 : i32
    %c0_i32_0 = arith.constant 0 : i32
    %c0_i32_1 = arith.constant 0 : i32
    return %c0_i32, %c0_i32_0 : i32, i32
  }
  func.func @transform_13(%arg0: i32) -> (i32, i32, i32, i32) {
    %c0_i32 = arith.constant 0 : i32
    %c0_i32_0 = arith.constant 0 : i32
    %c0_i32_1 = arith.constant 0 : i32
    %c0_i32_2 = arith.constant 0 : i32
    return %arg0, %c0_i32, %c0_i32_0, %c0_i32_1 : i32, i32, i32, i32
  }
  func.func @transform_14(%arg0: i32) -> (i32, i32, i32) {
    %c0_i32 = arith.constant 0 : i32
    %c0_i32_0 = arith.constant 0 : i32
    %c0_i32_1 = arith.constant 0 : i32
    return %arg0, %c0_i32, %c0_i32_0 : i32, i32, i32
  }
}

</mosaic_0001>

<bundles_post_ra>
// kernel: tpu_custom_call.1
= control target key start
LH: loop header
LB: loop body
LE: loop exit
PB: predicated region body
PF: predicated region fallthrough
CT: control target
= control target key end

     0   :  { %s10539_s0 = inlined_call_operand.vmem [shape: f32[4,8,20], index: 0, kind: input, shape index: {}]   ;;  %s10540_s1 = inlined_call_operand.vmem [shape: f32[4,8,16], index: 1, kind: input, shape index: {}]   ;;  %s10541_s2 = inlined_call_operand.vmem [shape: f32[4,1,16], index: 2, kind: input, shape index: {}]   ;;  %s10542_s3 = inlined_call_operand.vmem [shape: bf16[20,32], index: 3, kind: input, shape index: {}]   ;;  %s10543_s4 = inlined_call_operand.vmem [shape: f32[1,32], index: 4, kind: input, shape index: {}]   ;;  %s10544_s5 = inlined_call_operand.vmem [shape: bf16[16,32], index: 5, kind: input, shape index: {}]   ;;  %s10545_s6 = inlined_call_operand.vmem [shape: f32[1,32], index: 6, kind: input, shape index: {}]   ;;  %s10546_s7 = inlined_call_operand.vmem [shape: bf16[288,32], index: 7, kind: input, shape index: {}]   ;;  %s10547_s8 = inlined_call_operand.vmem [shape: f32[1,32], index: 8, kind: input, shape index: {}]   ;;  %s10548_s9 = inlined_call_operand.vmem [shape: bf16[288,16], index: 9, kind: input, shape index: {}]   ;;  %s10549_s10 = inlined_call_operand.vmem [shape: f32[1,16], index: 10, kind: input, shape index: {}]   ;;  %s10550_s11 = inlined_call_operand.vmem [shape: bf16[144,4], index: 11, kind: input, shape index: {}]   ;;  %s10551_s12 = inlined_call_operand.vmem [shape: f32[1,4], index: 12, kind: input, shape index: {}]   ;;  %s10552_s13 = inlined_call_operand.vmem [shape: f32[4,8,8,2], index: 13, kind: output, shape index: {0}]   ;;  %s10553_s14 = inlined_call_operand.hbm [shape: f32[4,8,16], index: 14, kind: output, shape index: {1}]  }
   0x1   :  { %10572 = sst [smem:[#allocation12_spill]] %s10539_s0 }
   0x2   :  { %10573 = sst [smem:[#allocation13_spill]] %s10540_s1 }
   0x3   :  { %10574 = sst [smem:[#allocation14_spill]] %s10542_s3 }
   0x4   :  { %10575 = sst [smem:[#allocation15_spill]] %s10544_s5 }
   0x5   :  { %20 = vsyncpa [#allocation6], 0 }
   0x6   :  { %22 = vsyncpa [#allocation6 + $0x1], 0  ;;  %s7823_s29 = smov 0   ;;  %s7825_s30 = smov 0  }
   0x7   :  { %s7827_s15 = smov 0   ;;  %s7829_s16 = smov 0  }
   0x8 LB: > { %s7844_s17 = sadd.s32 4294967295, %s7732_s16   ;;  %s6436_s18 = sadd.s32 4294967294, %s7732_s16   ;;  %s7732_s16 = sphi %s7829_s16, %s10607_s16   ;;  %s7728_s15 = sphi %s7827_s15, %s10606_s15   ;;  %s7724_s30 = sphi %s7825_s30, %s10605_s30   ;;  %s7720_s29 = sphi %s7823_s29, %s10604_s29  }
   0x9   : > { %s7848_s19 = sadd.s32 1, %s7732_s16   ;;  %s349_s20 = sadd.s32 1, %s7728_s15 }
   0xa   : > { %s346_s21 = ssub.s32 %s7732_s16, %s7848_s19  ;;  %p359_p0 = scmp.ne.s32.totalorder %s7728_s15, %s7724_s30 }
   0xb   : > { %p347_p1 = scmp.eq.s32.totalorder %s346_s21, 0  ;;  %p360_p2 = scmp.eq.s32.totalorder %s7844_s17, 1 }
   0xc   : > { %p365_p3 = scmp.ne.s32.totalorder %s7724_s30, %s7720_s29  ;;  %p366_p4 = scmp.eq.s32.totalorder %s6436_s18, 1 }
   0xd   : > { %s7859_s22 = scalar_select %p347_p1, %s7728_s15, %s349_s20  }
   0xe   : > { %p7861_p5 = por %p360_p2, %p359_p0  ;;  %p7865_p6 = por %p366_p4, %p365_p3 }
   0xf   : > { %p6439_p7 = scmp.ge.s32.totalorder %s7732_s16, 1  ;;  %p440_p8 = scmp.lt.s32.totalorder %s7732_s16, 3 }
  0x11   : > { %p441_p9 = pnand %p6439_p7, %p440_p8 }
  0x13   : > { %444 = sbr.rel (%p441_p9) target bundleno = 2105 (0x839), region = 72 }
  0x1a   : > { %s10578_s3 = sld [smem:[#allocation14_spill]]  ;;  %v10562_v1 = vmov 0.0   ;;  %s10579_s5 = sld [smem:[#allocation15_spill]]  ;;  %vm7735_vm0 = vmmov 0   ;;  %vm717_vm1 = vcmask 1041408   ;;  %vm623_vm2 = vcmask 130048  }
  0x1b   : > { %6694 = vmatprep.subr.bf16.mxu0 %v10562_v1  ;;  %6702 = vmatprep.subr.bf16.mxu1 %v10562_v1  ;;  %s6441_s21 = sshll.u32 %s7844_s17, 1  ;;  %624 = vst.msk [vmem:[#allocation4] sm:$0xff] %vm623_vm2, %v10562_v1  ;;  %625 = vst.msk [vmem:[#allocation4 + $0x8] sm:$0xff] %vm623_vm2, %v10562_v1  ;;  %s10581_s0 = sld [smem:[#allocation12_spill]]  ;;  %vm782_vm3 = vcmask 1041409   ;;  %vm713_vm4 = vcmask 162816   ;;  %v10561_v21 = vlaneseq }
  0x1c   : > { %6704 = vmatprep.mubr.msk.bf16.mxu1 %vm7735_vm0, %v10562_v1  ;;  %p7889_p10 = scmp.lt.s32.totalorder %s6441_s21, 3  ;;  %626 = vst.msk [vmem:[#allocation4 + $0x10] sm:$0xff] %vm623_vm2, %v10562_v1  ;;  %627 = vst.msk [vmem:[#allocation4 + $0x18] sm:$0xff] %vm623_vm2, %v10562_v1  ;;  %6698 = vmatprep.mubr.msk.bf16.mxu0 %vm7735_vm0, %v10562_v1  ;;  %v7980_v17 = vld [vmem:[%s10546_s7 + $0x80] sm:$0xff]   ;;  %v7985_v18 = vld [vmem:[%s10546_s7 + $0x88] sm:$0xff]   ;;  %vm527_vm5 = vcmask 261120  }
  0x1d   : > { %628 = vst.msk [vmem:[#allocation4 + $0x20] sm:$0xff] %vm623_vm2, %v10562_v1  ;;  %629 = vst.msk [vmem:[#allocation4 + $0x28] sm:$0xff] %vm623_vm2, %v10562_v1  ;;  %vm529_vm6 = vcmask 254976   ;;  %vm539_vm7 = vcmask 253952   ;;  %v7736_v19 = vmov 1966171168  }
  0x1e   : > { %630 = vst.msk [vmem:[#allocation4 + $0x30] sm:$0xff] %vm623_vm2, %v10562_v1  ;;  %631 = vst.msk [vmem:[#allocation4 + $0x38] sm:$0xff] %vm623_vm2, %v10562_v1  ;;  %s10609_s21 = smov (!%p7889_p10, %s6441_s21), 3  ;;  %v837_v20 = vunpack.c.l.s4 %v7736_v19  ;;  %v7591_v23 = vld [vmem:[%s10546_s7 + $0x40] sm:$0xff]   ;;  %v7593_v25 = vld [vmem:[%s10546_s7 + $0x48] sm:$0xff]   ;;  %v8161_v28 = vshrl.u32 %v10561_v21, 7 }
  0x1f   : > { %632 = vst.msk [vmem:[#allocation4 + $0x100] sm:$0xff] %vm623_vm2, %v10562_v1  ;;  %633 = vst.msk [vmem:[#allocation4 + $0x108] sm:$0xff] %vm623_vm2, %v10562_v1  ;;  %s516_s28 = scalar_lea.vmem %s10541_s2, %s10609_s21  ;;  %s10554_s18 = sshll.u32 %s10609_s21, 3  ;;  %v7592_v24 = vld [vmem:[%s10546_s7] sm:$0xff]   ;;  %v7594_v32 = vld [vmem:[%s10546_s7 + $0x8] sm:$0xff]   ;;  %vm1627_vm8 = vcmask 523264  }
  0x20   : > { %v7586_v0 = vld [vmem:[%s10578_s3] sm:$0xff]   ;;  %v7588_v3 = vld [vmem:[%s10578_s3 + $0x8] ss:$0 sps:$4 sm:$0x33]   ;;  %634 = vst.msk [vmem:[#allocation4 + $0x110] sm:$0xff] %vm623_vm2, %v10562_v1  ;;  %635 = vst.msk [vmem:[#allocation4 + $0x118] sm:$0xff] %vm623_vm2, %v10562_v1  ;;  %v838_v27 = vunpack.c.0.s8 %v837_v20 }
  0x21   : > { %v7587_v2 = vld [vmem:[%s10579_s5] sm:$0xff]   ;;  %6695 = vmatpush3.bf16.msra.mxu0 %v7586_v0  ;;  %v719_v4 = vsel %vm717_vm1, %v7588_v3, 0  ;;  %636 = vst.msk [vmem:[#allocation4 + $0x120] sm:$0xff] %vm623_vm2, %v10562_v1  ;;  %637 = vst.msk [vmem:[#allocation4 + $0x128] sm:$0xff] %vm623_vm2, %v10562_v1  ;;  %s505_s5 = scalar_lea.vmem %s10581_s0, %s10554_s18  ;;  %v7595_v33 = vld [vmem:[%s10546_s7 + $0x50] sm:$0xff]   ;;  %v8186_v46 = vsub.s32 0, %v8161_v28 }
  0x22   : > { %6703 = vmatpush3.bf16.msra.mxu1 %v7587_v2  ;;  %6696 = vmatprep.subr.bf16.mxu0 %v10562_v1  ;;  %638 = vst.msk [vmem:[#allocation4 + $0x130] sm:$0xff] %vm623_vm2, %v10562_v1  ;;  %639 = vst.msk [vmem:[#allocation4 + $0x138] sm:$0xff] %vm623_vm2, %v10562_v1  ;;  %v764_v5 = vld [vmem:[%s516_s28] sm:$0x1]  ;;  %v765_v6 = vld [vmem:[%s516_s28 + $0x1] sm:$0x1]  ;;  %v8176_v37 = vsub.s32 %v838_v27, %v8161_v28 }
  0x23   : > { %641 = vst.msk [vmem:[#allocation4 + $0xc0] sm:$0xff] %vm623_vm2, %v10562_v1  ;;  %642 = vst.msk [vmem:[#allocation4 + $0xc8] sm:$0xff] %vm623_vm2, %v10562_v1  ;;  %v766_v7 = vpack.c.bf16 %v764_v5, %v764_v5  ;;  %v767_v8 = vpack.c.bf16 %v765_v6, %v765_v6  ;;  %v691_v9 = vld [vmem:[%s505_s5] sm:$0xff]  ;;  %v692_v10 = vld [vmem:[%s505_s5 + $0x8] sm:$0xff]  ;;  %6542 = vmatprep.subr.bf16.mxu1 %v7591_v23  ;;  %s10555_s26 = smov 64   ;;  %s10559_s3 = smov 32  }
  0x24   : > { %643 = vst.msk [vmem:[#allocation4 + $0xd0] sm:$0xff] %vm623_vm2, %v10562_v1  ;;  %644 = vst.msk [vmem:[#allocation4 + $0xd8] sm:$0xff] %vm623_vm2, %v10562_v1  ;;  %v693_v13 = vpack.c.bf16 %v692_v10, %v691_v9  ;;  %v6453_v30 = vld [vmem:[%s10545_s6] ss:$0 sm:$0xff]  ;;  %v7596_v40 = vld [vmem:[%s10546_s7 + $0x10] sm:$0xff]   ;;  %s10557_s18 = smov 96  }
  0x25   : > { %645 = vst.msk [vmem:[#allocation4 + $0xe0] sm:$0xff] %vm623_vm2, %v10562_v1  ;;  %646 = vst.msk [vmem:[#allocation4 + $0xe8] sm:$0xff] %vm623_vm2, %v10562_v1  ;;  %6697 = vmatpush3.bf16.msra.mxu0 %v719_v4  ;;  %v779_v11 = vunpack.c.l.b16 %v766_v7  ;;  %v780_v12 = vunpack.c.l.b16 %v767_v8  ;;  %v6449_v35 = vld [vmem:[%s10543_s4] ss:$0 sm:$0xff]  ;;  %v7597_v44 = vld [vmem:[%s10546_s7 + $0x58] sm:$0xff]   ;;  %vm1644_vm9 = vcmask 785408  }
  0x26   : > { %647 = vst.msk [vmem:[#allocation4 + $0xf0] sm:$0xff] %vm623_vm2, %v10562_v1  ;;  %648 = vst.msk [vmem:[#allocation4 + $0xf8] sm:$0xff] %vm623_vm2, %v10562_v1  ;;  %6708 = vmatprep.subr.bf16.mxu0 %v7980_v17  ;;  %v7598_v47 = vld [vmem:[%s10546_s7 + $0x18] sm:$0xff]   ;;  %v7599_v52 = vld [vmem:[%s10546_s7 + $0x60] sm:$0xff]   ;;  %vm573_vm10 = vcmask 257024   ;;  %s10586_s25 = smov 96  }
  0x27   : > { %649 = vst.msk [vmem:[#allocation4 + $0x1c0] sm:$0xff] %vm623_vm2, %v10562_v1  ;;  %650 = vst.msk [vmem:[#allocation4 + $0x1c8] sm:$0xff] %vm623_vm2, %v10562_v1  ;;  %v781_v14 = vrot.slane %v780_v12, 7  ;;  %v7600_v55 = vld [vmem:[%s10546_s7 + $0x20] sm:$0xff]   ;;  %v7601_v20 = vld [vmem:[%s10546_s7 + $0x68] sm:$0xff]   ;;  %s10587_s28 = smov 64  }
  0x28   : > { %651 = vst.msk [vmem:[#allocation4 + $0x1d0] sm:$0xff] %vm623_vm2, %v10562_v1  ;;  %652 = vst.msk [vmem:[#allocation4 + $0x1d8] sm:$0xff] %vm623_vm2, %v10562_v1  ;;  %6699 = vmatmul.mubr.msk.bf16.vlgmr.msra.gmra.mrb[0].mxu0 %vm713_vm4, %v693_v13  ;;  %s7740_s27 = smov 16   ;;  %s10570_s5 = smov 112   ;;  %vm658_vm11 = vcmask 125952   ;;  %vm3809_vm12 = vcmask 392192  }
  0x29   : > { %653 = vst.msk [vmem:[#allocation4 + $0x1e0] sm:$0xff] %vm623_vm2, %v10562_v1  ;;  %654 = vst.msk [vmem:[#allocation4 + $0x1e8] sm:$0xff] %vm623_vm2, %v10562_v1  ;;  %v783_v15 = vsel %vm782_vm3, %v781_v14, %v779_v11  ;;  %6709 = vmatpush3.bf16.msra.mxu0 %v7980_v17  ;;  %s7744_s0 = smov 80   ;;  %vm3842_vm13 = vcmask 654336   ;;  %vm3875_vm14 = vcmask 916480   ;;  %vm5500_vm15 = vcmask 1040384  }
  0x2a   : > { %655 = vst.msk [vmem:[#allocation4 + $0x1f0] sm:$0xff] %vm623_vm2, %v10562_v1  ;;  %656 = vst.msk [vmem:[#allocation4 + $0x1f8] sm:$0xff] %vm623_vm2, %v10562_v1  ;;  %v784_v16 = vpack.c.b16 %v783_v15, %v783_v15  ;;  %6710 = vmatprep.subr.bf16.mxu0 %v7985_v18  ;;  %vm5533_vm4 = vcmask 1042432   ;;  %s10601_s1 = sld [smem:[#allocation13_spill]] }
  0x2b   : > { %528 = vst.msk [vmem:[#allocation2] sm:$0xff] %vm527_vm5, %v10562_v1  ;;  %531 = vst.msk [vmem:[#allocation2 + $0xa0] sm:$0xff] %vm527_vm5, %v10562_v1 }
  0x2c   : > { %6705 = vmatmul.mubr.msk.bf16.vlgmr.msra.gmra.mrb[0].mxu1 %vm623_vm2, %v784_v16  ;;  %530 = vst.msk [vmem:[#allocation2 + $0x8] sm:$0x3] %vm529_vm6, %v10562_v1  ;;  %532 = vst.msk [vmem:[#allocation2 + $0xa8] sm:$0x3] %vm529_vm6, %v10562_v1 }
  0x2d   : > { %556 = vst.msk [vmem:[#allocation2 + $0x19] sm:$0x1] %vm539_vm7, %v10562_v1  ;;  %540 = vst.msk [vmem:[#allocation2 + $0x10] sm:$0x1] %vm539_vm7, %v10562_v1  ;;  %6711 = vmatpush3.bf16.msra.mxu0 %v7985_v18  ;;  %6543 = vmatpush3.bf16.msra.mxu1 %v7592_v24 }
  0x2e   : > { %534 = vst.msk [vmem:[#allocation2 + $0x90] sm:$0xff] %vm527_vm5, %v10562_v1  ;;  %536 = vst.msk [vmem:[#allocation2 + $0x130] sm:$0xff] %vm527_vm5, %v10562_v1  ;;  %6544 = vmatprep.subr.bf16.mxu1 %v7593_v25 }
  0x2f   : > { %535 = vst.msk [vmem:[#allocation2 + $0x98] sm:$0x3] %vm529_vm6, %v10562_v1  ;;  %537 = vst.msk [vmem:[#allocation2 + $0x138] sm:$0x3] %vm529_vm6, %v10562_v1 }
  0x30   : > { %541 = vst.msk [vmem:[#allocation2 + $0x20] sm:$0x1] %vm539_vm7, %v10562_v1  ;;  %542 = vst.msk [vmem:[#allocation2 + $0x30] sm:$0x1] %vm539_vm7, %v10562_v1 }
  0x31   : > { %543 = vst.msk [vmem:[#allocation2 + $0x40] sm:$0x1] %vm539_vm7, %v10562_v1  ;;  %544 = vst.msk [vmem:[#allocation2 + $0x50] sm:$0x1] %vm539_vm7, %v10562_v1  ;;  %6545 = vmatpush3.bf16.msra.mxu1 %v7594_v32 }
  0x32   : > { %545 = vst.msk [vmem:[#allocation2 + $0x60] sm:$0x1] %vm539_vm7, %v10562_v1  ;;  %546 = vst.msk [vmem:[#allocation2 + $0x70] sm:$0x1] %vm539_vm7, %v10562_v1  ;;  %6546 = vmatprep.subr.bf16.mxu1 %v7595_v33 }
  0x33   : > { %547 = vst.msk [vmem:[#allocation2 + $0x80] sm:$0x1] %vm539_vm7, %v10562_v1  ;;  %548 = vst.msk [vmem:[#allocation2 + $0xb0] sm:$0x1] %vm539_vm7, %v10562_v1 }
  0x34   : > { %549 = vst.msk [vmem:[#allocation2 + $0xc0] sm:$0x1] %vm539_vm7, %v10562_v1  ;;  %550 = vst.msk [vmem:[#allocation2 + $0xd0] sm:$0x1] %vm539_vm7, %v10562_v1 }
  0x35   : > { %551 = vst.msk [vmem:[#allocation2 + $0xe0] sm:$0x1] %vm539_vm7, %v10562_v1  ;;  %552 = vst.msk [vmem:[#allocation2 + $0xf0] sm:$0x1] %vm539_vm7, %v10562_v1  ;;  %6547 = vmatpush3.bf16.msra.mxu1 %v7596_v40 }
  0x36   : > { %553 = vst.msk [vmem:[#allocation2 + $0x100] sm:$0x1] %vm539_vm7, %v10562_v1  ;;  %554 = vst.msk [vmem:[#allocation2 + $0x110] sm:$0x1] %vm539_vm7, %v10562_v1  ;;  %6548 = vmatprep.subr.bf16.mxu1 %v7597_v44 }
  0x37   : > { %555 = vst.msk [vmem:[#allocation2 + $0x120] sm:$0x1] %vm539_vm7, %v10562_v1  ;;  %557 = vst.msk [vmem:[#allocation2 + $0x29] sm:$0x1] %vm539_vm7, %v10562_v1 }
  0x38   : > { %558 = vst.msk [vmem:[#allocation2 + $0x39] sm:$0x1] %vm539_vm7, %v10562_v1  ;;  %559 = vst.msk [vmem:[#allocation2 + $0x49] sm:$0x1] %vm539_vm7, %v10562_v1 }
  0x39   : > { %560 = vst.msk [vmem:[#allocation2 + $0x59] sm:$0x1] %vm539_vm7, %v10562_v1  ;;  %561 = vst.msk [vmem:[#allocation2 + $0x69] sm:$0x1] %vm539_vm7, %v10562_v1  ;;  %6549 = vmatpush3.bf16.msra.mxu1 %v7598_v47 }
  0x3a   : > { %562 = vst.msk [vmem:[#allocation2 + $0x79] sm:$0x1] %vm539_vm7, %v10562_v1  ;;  %563 = vst.msk [vmem:[#allocation2 + $0x89] sm:$0x1] %vm539_vm7, %v10562_v1  ;;  %6550 = vmatprep.subr.bf16.mxu1 %v7599_v52 }
  0x3b   : > { %564 = vst.msk [vmem:[#allocation2 + $0xb9] sm:$0x1] %vm539_vm7, %v10562_v1  ;;  %565 = vst.msk [vmem:[#allocation2 + $0xc9] sm:$0x1] %vm539_vm7, %v10562_v1 }
  0x3c   : > { %566 = vst.msk [vmem:[#allocation2 + $0xd9] sm:$0x1] %vm539_vm7, %v10562_v1  ;;  %567 = vst.msk [vmem:[#allocation2 + $0xe9] sm:$0x1] %vm539_vm7, %v10562_v1 }
  0x3d   : > { %568 = vst.msk [vmem:[#allocation2 + $0xf9] sm:$0x1] %vm539_vm7, %v10562_v1  ;;  %569 = vst.msk [vmem:[#allocation2 + $0x109] sm:$0x1] %vm539_vm7, %v10562_v1  ;;  %6551 = vmatpush3.bf16.msra.mxu1 %v7600_v55 }
  0x3e   : > { %570 = vst.msk [vmem:[#allocation2 + $0x119] sm:$0x1] %vm539_vm7, %v10562_v1  ;;  %571 = vst.msk [vmem:[#allocation2 + $0x129] sm:$0x1] %vm539_vm7, %v10562_v1  ;;  %6552 = vmatprep.subr.bf16.mxu1 %v7601_v20  ;;  %vm5584_vm7 = vcmask 1045504  }
  0x3f   : > { %572 = vst.msk [vmem:[#allocation3] sm:$0xff] %vm527_vm5, %v10562_v1  ;;  %575 = vst.msk [vmem:[#allocation3 + $0x10] sm:$0xff] %vm527_vm5, %v10562_v1 }
  0x40   : > { %577 = vst.msk [vmem:[#allocation3 + $0xc0] sm:$0xff] %vm527_vm5, %v10562_v1  ;;  %579 = vst.msk [vmem:[#allocation3 + $0xd0] sm:$0xff] %vm527_vm5, %v10562_v1 }
  0x41   : > { %582 = vst.msk [vmem:[#allocation3 + $0xa0] sm:$0xff] %vm527_vm5, %v10562_v1  ;;  %584 = vst.msk [vmem:[#allocation3 + $0xb0] sm:$0xff] %vm527_vm5, %v10562_v1 }
  0x42   : > { %586 = vst.msk [vmem:[#allocation3 + $0x160] sm:$0xff] %vm527_vm5, %v10562_v1  ;;  %588 = vst.msk [vmem:[#allocation3 + $0x170] sm:$0xff] %vm527_vm5, %v10562_v1 }
  0x43   : > { %591 = vst.msk [vmem:[#allocation3 + $0x20] sm:$0x3] %vm529_vm6, %v10562_v1  ;;  %592 = vst.msk [vmem:[#allocation3 + $0x30] sm:$0x3] %vm529_vm6, %v10562_v1 }
  0x44   : > { %593 = vst.msk [vmem:[#allocation3 + $0x40] sm:$0x3] %vm529_vm6, %v10562_v1  ;;  %594 = vst.msk [vmem:[#allocation3 + $0x50] sm:$0x3] %vm529_vm6, %v10562_v1 }
  0x45   : > { %595 = vst.msk [vmem:[#allocation3 + $0x60] sm:$0x3] %vm529_vm6, %v10562_v1  ;;  %596 = vst.msk [vmem:[#allocation3 + $0x70] sm:$0x3] %vm529_vm6, %v10562_v1 }
  0x46   : > { %597 = vst.msk [vmem:[#allocation3 + $0x80] sm:$0x3] %vm529_vm6, %v10562_v1  ;;  %598 = vst.msk [vmem:[#allocation3 + $0x90] sm:$0x3] %vm529_vm6, %v10562_v1 }
  0x47   : > { %599 = vst.msk [vmem:[#allocation3 + $0xe0] sm:$0x3] %vm529_vm6, %v10562_v1  ;;  %600 = vst.msk [vmem:[#allocation3 + $0xf0] sm:$0x3] %vm529_vm6, %v10562_v1 }
  0x48   : > { %601 = vst.msk [vmem:[#allocation3 + $0x100] sm:$0x3] %vm529_vm6, %v10562_v1  ;;  %602 = vst.msk [vmem:[#allocation3 + $0x110] sm:$0x3] %vm529_vm6, %v10562_v1 }
  0x49   : > { %603 = vst.msk [vmem:[#allocation3 + $0x120] sm:$0x3] %vm529_vm6, %v10562_v1  ;;  %604 = vst.msk [vmem:[#allocation3 + $0x130] sm:$0x3] %vm529_vm6, %v10562_v1 }
  0x4a   : > { %605 = vst.msk [vmem:[#allocation3 + $0x140] sm:$0x3] %vm529_vm6, %v10562_v1  ;;  %606 = vst.msk [vmem:[#allocation3 + $0x150] sm:$0x3] %vm529_vm6, %v10562_v1 }
  0x4b   : > { %607 = vst.msk [vmem:[#allocation3 + $0x2a] sm:$0x3] %vm529_vm6, %v10562_v1  ;;  %608 = vst.msk [vmem:[#allocation3 + $0x3a] sm:$0x3] %vm529_vm6, %v10562_v1 }
  0x4c   : > { %609 = vst.msk [vmem:[#allocation3 + $0x4a] sm:$0x3] %vm529_vm6, %v10562_v1  ;;  %610 = vst.msk [vmem:[#allocation3 + $0x5a] sm:$0x3] %vm529_vm6, %v10562_v1 }
  0x4d   : > { %611 = vst.msk [vmem:[#allocation3 + $0x6a] sm:$0x3] %vm529_vm6, %v10562_v1  ;;  %612 = vst.msk [vmem:[#allocation3 + $0x7a] sm:$0x3] %vm529_vm6, %v10562_v1 }
  0x4e   : > { %613 = vst.msk [vmem:[#allocation3 + $0x8a] sm:$0x3] %vm529_vm6, %v10562_v1  ;;  %614 = vst.msk [vmem:[#allocation3 + $0x9a] sm:$0x3] %vm529_vm6, %v10562_v1 }
  0x4f   : > { %615 = vst.msk [vmem:[#allocation3 + $0xea] sm:$0x3] %vm529_vm6, %v10562_v1  ;;  %616 = vst.msk [vmem:[#allocation3 + $0xfa] sm:$0x3] %vm529_vm6, %v10562_v1 }
  0x50   : > { %617 = vst.msk [vmem:[#allocation3 + $0x10a] sm:$0x3] %vm529_vm6, %v10562_v1  ;;  %618 = vst.msk [vmem:[#allocation3 + $0x11a] sm:$0x3] %vm529_vm6, %v10562_v1 }
  0x51   : > { %619 = vst.msk [vmem:[#allocation3 + $0x12a] sm:$0x3] %vm529_vm6, %v10562_v1  ;;  %620 = vst.msk [vmem:[#allocation3 + $0x13a] sm:$0x3] %vm529_vm6, %v10562_v1 }
  0x52   : > { %621 = vst.msk [vmem:[#allocation3 + $0x14a] sm:$0x3] %vm529_vm6, %v10562_v1  ;;  %622 = vst.msk [vmem:[#allocation3 + $0x15a] sm:$0x3] %vm529_vm6, %v10562_v1  ;;  %vm5567_vm6 = vcmask 1044480  }
  0x53   : > { %10582 = vst [vmem:[#allocation8_spill] sm:$0xff] %v8161_v28  ;;  %10583 = vst [vmem:[#allocation9_spill] sm:$0xff] %v8176_v37 }
  0x54   : > { %10584 = vst [vmem:[#allocation10_spill] sm:$0xff] %v8186_v46  ;;  %574 = vst.msk [vmem:[#allocation3 + $0x8] sm:$0xf] %vm573_vm10, %v10562_v1 }
  0x55   : > { %576 = vst.msk [vmem:[#allocation3 + $0x18] sm:$0xf] %vm573_vm10, %v10562_v1  ;;  %578 = vst.msk [vmem:[#allocation3 + $0xc8] sm:$0xf] %vm573_vm10, %v10562_v1 }
  0x56   : > { %580 = vst.msk [vmem:[#allocation3 + $0xd8] sm:$0xf] %vm573_vm10, %v10562_v1  ;;  %583 = vst.msk [vmem:[#allocation3 + $0xa8] sm:$0xf] %vm573_vm10, %v10562_v1 }
  0x57   : > { %585 = vst.msk [vmem:[#allocation3 + $0xb8] sm:$0xf] %vm573_vm10, %v10562_v1  ;;  %587 = vst.msk [vmem:[#allocation3 + $0x168] sm:$0xf] %vm573_vm10, %v10562_v1 }
  0x58   : > { %589 = vst.msk [vmem:[#allocation3 + $0x178] sm:$0xf] %vm573_vm10, %v10562_v1  ;;  %vm6095_vm10 = vcmask 1042434  }
  0xfb   : > { %v755_v22 = vpop.f32.mrb[0].mxu0 }
  0xfc   : > { %v6700_v26 = vpop.f32.mrb[1].mxu0  ;;  %v756_v42 = vadd.f32 %v6449_v35, %v755_v22  ;;  %v7602_v22 = vld [vmem:[%s10546_s7 + $0x28] sm:$0xff]  }
  0xfd   : > { %v758_v29 = vpop.f32.mrb[2].mxu0  ;;  %6553 = vmatpush3.bf16.msra.mxu1 %v7602_v22 }
  0xfe   : > { %v6701_v31 = vpop.f32.mrb[3].mxu0  ;;  %v762_v50 = vmax.f32 %v756_v42, 0.0  ;;  %v759_v51 = vadd.f32 %v6449_v35, %v758_v29  ;;  %v7604_v42 = vld [vmem:[%s10546_s7 + $0x30] sm:$0xff]  }
  0xff   : > { %v828_v34 = vpop.f32.mrb[0].mxu1 }
 0x100   : > { %v829_v36 = vadd.f32 %v6453_v30, %v828_v34  ;;  %v6706_v38 = vpop.f32.mrb[1].mxu1  ;;  %v763_v57 = vmax.f32 %v759_v51, 0.0 }
 0x101   : > { %v831_v39 = vpop.f32.mrb[2].mxu1 }
 0x102   : > { %v834_v41 = vmax.f32 %v829_v36, 0.0  ;;  %v6707_v43 = vpop.f32.mrb[3].mxu1 }
 0x104   : > { %v842_v45 = vrot.slane %v834_v41, %v8176_v37  ;;  %v7603_v41 = vld [vmem:[%s10546_s7 + $0x70] sm:$0xff]  }
 0x105   : > { %6554 = vmatprep.subr.bf16.mxu1 %v7603_v41 }
 0x106   : > { %v843_v48 = vcombine.high %v842_v45, %v842_v45  ;;  %v850_v49 = vrot.slane %v842_v45, %v8176_v37  ;;  %6555 = vmatpush3.bf16.msra.mxu1 %v7604_v42 }
 0x108   : > { %v861_v53 = vrot.slane %v850_v49, %v8186_v46  ;;  %v857_v54 = vrot.slane %v843_v48, %v8176_v37  ;;  %v1114_v48 = vld [vmem:[#allocation2 + $0x2] sm:$0xff] }
 0x109   : > { %v1098_v49 = vld [vmem:[#allocation2 + $0x1] sm:$0xff] }
 0x10a   : > { %v8200_v56 = vadd.f32 %v861_v53, %v762_v50  ;;  %v865_v58 = vrot.slane %v857_v54, %v8186_v46 }
 0x10c   : > { %v872_v59 = vcombine.high %v8200_v56, %v8200_v56  ;;  %v8205_v60 = vadd.f32 %v865_v58, %v763_v57  ;;  %v879_v61 = vrot.slane %v8200_v56, %v8176_v37 }
 0x10e   : > { %v895_v62 = vrot.slane %v879_v61, %v8176_v37  ;;  %v887_v63 = vcombine.high %v879_v61, %v879_v61  ;;  %v886_v0 = vrot.slane %v872_v59, %v8176_v37  ;;  %v928_v2 = vrot.slane %v8205_v60, %v8176_v37 }
 0x10f   : > { %v921_v3 = vcombine.high %v8205_v60, %v8205_v60 }
 0x110   : > { %v973_v4 = vrot.slane %v895_v62, %v8186_v46  ;;  %v917_v5 = vcombine.high %v895_v62, %v895_v62  ;;  %v909_v6 = vrot.slane %v887_v63, %v8176_v37  ;;  %v902_v7 = vrot.slane %v886_v0, %v8176_v37 }
 0x111   : > { %v888_v8 = vcombine.high %v886_v0, %v886_v0  ;;  %v936_v9 = vcombine.high %v928_v2, %v928_v2  ;;  %v944_v10 = vrot.slane %v928_v2, %v8176_v37  ;;  %v935_v11 = vrot.slane %v921_v3, %v8176_v37  ;;  %v7605_v0 = vld [vmem:[%s10546_s7 + $0x78] sm:$0xff]  }
 0x112   : > { %v1050_v12 = vmul.f32 %v973_v4, %v8200_v56  ;;  %v919_v13 = vcombine.high %v909_v6, %v909_v6  ;;  %v977_v14 = vrot.slane %v909_v6, %v8186_v46  ;;  %v981_v15 = vrot.slane %v917_v5, %v8186_v46  ;;  %v7606_v2 = vld [vmem:[%s10546_s7 + $0x38] sm:$0xff]   ;;  %6556 = vmatprep.subr.bf16.mxu1 %v7605_v0 }
 0x113   : > { %v989_v16 = vrot.slane %v902_v7, %v8186_v46  ;;  %v916_v17 = vrot.slane %v888_v8, %v8176_v37  ;;  %v918_v18 = vcombine.high %v902_v7, %v902_v7  ;;  %v958_v19 = vrot.slane %v936_v9, %v8176_v37  ;;  %6557 = vmatpush3.bf16.msra.mxu1 %v7606_v2 }
 0x114   : > { %1066 = vst.msk [vmem:[#allocation2 + $0x11] sm:$0xff] %vm527_vm5, %v1050_v12  ;;  %v1051_v23 = vmul.f32 %v977_v14, %v8200_v56  ;;  %v1052_v24 = vmul.f32 %v981_v15, %v8200_v56  ;;  %v985_v25 = vrot.slane %v919_v13, %v8186_v46  ;;  %v966_v26 = vcombine.high %v944_v10, %v944_v10 }
 0x115   : > { %v1054_v27 = vmul.f32 %v989_v16, %v8200_v56  ;;  %v993_v29 = vrot.slane %v916_v17, %v8186_v46  ;;  %v997_v30 = vrot.slane %v918_v18, %v8186_v46  ;;  %v920_v31 = vcombine.high %v916_v17, %v916_v17 }
 0x116   : > { %1067 = vst.msk [vmem:[#allocation2 + $0x21] sm:$0xff] %vm527_vm5, %v1051_v23  ;;  %1068 = vst.msk [vmem:[#allocation2 + $0x31] sm:$0xff] %vm527_vm5, %v1052_v24  ;;  %v1053_v32 = vmul.f32 %v985_v25, %v8200_v56  ;;  %v1009_v33 = vrot.slane %v958_v19, %v8186_v46  ;;  %v1013_v34 = vrot.slane %v966_v26, %v8186_v46 }
 0x117   : > { %v1005_v35 = vrot.slane %v944_v10, %v8186_v46  ;;  %1070 = vst.msk [vmem:[#allocation2 + $0x51] sm:$0xff] %vm527_vm5, %v1054_v27  ;;  %v1055_v36 = vmul.f32 %v993_v29, %v8200_v56  ;;  %v1056_v38 = vmul.f32 %v997_v30, %v8200_v56  ;;  %v1001_v39 = vrot.slane %v920_v31, %v8186_v46  ;;  %v1218_v29 = vld [vmem:[#allocation2 + $0x92] sm:$0xff] }
 0x118   : > { %v951_v40 = vrot.slane %v935_v11, %v8176_v37  ;;  %1069 = vst.msk [vmem:[#allocation2 + $0x41] sm:$0xff] %vm527_vm5, %v1053_v32  ;;  %v1059_v43 = vmul.f32 %v1009_v33, %v8205_v60  ;;  %v1060_v44 = vmul.f32 %v1013_v34, %v8205_v60  ;;  %v968_v47 = vcombine.high %v958_v19, %v958_v19 }
 0x119   : > { %v1058_v45 = vmul.f32 %v1005_v35, %v8205_v60  ;;  %1071 = vst.msk [vmem:[#allocation2 + $0x61] sm:$0xff] %vm527_vm5, %v1055_v36  ;;  %1072 = vst.msk [vmem:[#allocation2 + $0x71] sm:$0xff] %vm527_vm5, %v1056_v38  ;;  %v1057_v50 = vmul.f32 %v1001_v39, %v8200_v56  ;;  %v937_v52 = vcombine.high %v935_v11, %v935_v11 }
 0x11a   : > { %v1021_v51 = vrot.slane %v951_v40, %v8186_v46  ;;  %v967_v53 = vcombine.high %v951_v40, %v951_v40  ;;  %1075 = vst.msk [vmem:[#allocation2 + $0xc1] sm:$0xff] %vm527_vm5, %v1059_v43  ;;  %1076 = vst.msk [vmem:[#allocation2 + $0xd1] sm:$0xff] %vm527_vm5, %v1060_v44  ;;  %v1017_v54 = vrot.slane %v968_v47, %v8186_v46  ;;  %v1106_v44 = vld [vmem:[#allocation2 + $0xa1] sm:$0xff] }
 0x11b   : > { %1074 = vst.msk [vmem:[#allocation2 + $0xb1] sm:$0xff] %vm527_vm5, %v1058_v45  ;;  %v1115_v55 = vld [vmem:[#allocation2 + $0x12] sm:$0xff]  ;;  %1073 = vst.msk [vmem:[#allocation2 + $0x81] sm:$0xff] %vm527_vm5, %v1057_v50  ;;  %v965_v58 = vrot.slane %v937_v52, %v8176_v37 }
 0x11c   : > { %v8268_v57 = vld [vmem:[#allocation2 + $0x11] sm:$0xff]  ;;  %v1062_v56 = vmul.f32 %v1021_v51, %v8205_v60  ;;  %v1029_v59 = vrot.slane %v967_v53, %v8186_v46  ;;  %v6831_v61 = vpack.i.bf16 %v1115_v55, %v1114_v48  ;;  %v1061_v63 = vmul.f32 %v1017_v54, %v8205_v60  ;;  %v1122_v53 = vld [vmem:[#allocation2 + $0xa2] sm:$0xff] }
 0x11d   : > { %v6826_v62 = vpack.i.bf16 %v8268_v57, %v1098_v49  ;;  %v8282_v3 = vld [vmem:[#allocation2 + $0x22] sm:$0xff]  ;;  %v8284_v4 = vld [vmem:[#allocation2 + $0x32] sm:$0xff]  ;;  %v1025_v6 = vrot.slane %v965_v58, %v8186_v46  ;;  %v969_v8 = vcombine.high %v965_v58, %v965_v58 }
 0x11e   : > { %v8286_v5 = vld [vmem:[#allocation2 + $0x20] sm:$0xff]  ;;  %1078 = vst.msk [vmem:[#allocation2 + $0xf1] sm:$0xff] %vm527_vm5, %v1062_v56  ;;  %v1064_v7 = vmul.f32 %v1029_v59, %v8205_v60  ;;  %6832 = vrot.lane.b32.xlu1 %v6831_v61, %s10555_s26  ;;  %v1711_v9 = vpack.c.bf16 %v8284_v4, %v8282_v3  ;;  %v8295_v10 = vld [vmem:[#allocation2 + $0x30] sm:$0xff]  ;;  %1077 = vst.msk [vmem:[#allocation2 + $0xe1] sm:$0xff] %vm527_vm5, %v1061_v63  ;;  %v6836_v16 = vpack.i.bf16 %v8282_v3, %v1115_v55 }
 0x11f   : > { %6827 = vrot.lane.b32.xlu0 %v6826_v62, %s10559_s3  ;;  %v8298_v11 = vld [vmem:[#allocation2 + $0x42] sm:$0xff]  ;;  %v8300_v12 = vld [vmem:[#allocation2 + $0x52] sm:$0xff]  ;;  %v1063_v13 = vmul.f32 %v1025_v6, %v8205_v60  ;;  %v1033_v14 = vrot.slane %v969_v8, %v8186_v46  ;;  %v6841_v15 = vpack.i.bf16 %v8295_v10, %v8286_v5  ;;  %v6861_v41 = vpack.i.bf16 %v8284_v4, %v8282_v3 }
 0x120   : > { %1080 = vst.msk [vmem:[#allocation2 + $0x111] sm:$0xff] %vm527_vm5, %v1064_v7  ;;  %6712 = vmatprep.mubr.msk.bf16.mxu0 %vm527_vm5, %v1711_v9  ;;  %v1714_v17 = vpack.c.bf16 %v8300_v12, %v8298_v11  ;;  %v8311_v18 = vld [vmem:[#allocation2 + $0x62] sm:$0xff]  ;;  %v8313_v19 = vld [vmem:[#allocation2 + $0x72] sm:$0xff]  ;;  %v6876_v33 = vpack.i.bf16 %v8298_v11, %v8284_v4  ;;  %v6911_v8 = vpack.i.bf16 %v8300_v12, %v8298_v11 }
 0x121   : > { %v1717_v20 = vpack.c.bf16 %v8313_v19, %v8311_v18  ;;  %v8317_v22 = vld [vmem:[#allocation2 + $0x21] sm:$0xff]  ;;  %v8319_v23 = vld [vmem:[#allocation2 + $0x31] sm:$0xff]  ;;  %1079 = vst.msk [vmem:[#allocation2 + $0x101] sm:$0xff] %vm527_vm5, %v1063_v13  ;;  %v1065_v24 = vmul.f32 %v1033_v14, %v8205_v60  ;;  %v6896_v56 = vpack.i.bf16 %v8311_v18, %v8300_v12  ;;  %v6931_v12 = vpack.i.bf16 %v8313_v19, %v8311_v18 }
 0x122   : > { %6842 = vrot.lane.b32.xlu1 %v6841_v15, %s10555_s26  ;;  %6713 = vmatmul.mubr.msk.bf16.vlgmr.msra.gmra.mrb[4].mxu0 %vm527_vm5, %v1714_v17  ;;  %v8326_v25 = vld [vmem:[#allocation2 + $0x10] sm:$0xff]  ;;  %v6846_v26 = vpack.i.bf16 %v8319_v23, %v8317_v22  ;;  %v8336_v60 = vld [vmem:[#allocation2 + $0x82] sm:$0xff] }
 0x123   : > { %6837 = vrot.lane.b32.xlu0 %v6836_v16, %s10559_s3  ;;  %1081 = vst.msk [vmem:[#allocation2 + $0x121] sm:$0xff] %vm527_vm5, %v1065_v24  ;;  %6716 = vmatprep.mubr.msk.bf16.mxu0 %vm527_vm5, %v1717_v20  ;;  %v6851_v27 = vpack.i.bf16 %v8286_v5, %v8326_v25  ;;  %v8338_v30 = vld [vmem:[#allocation2 + $0xc2] sm:$0xff]  ;;  %v8340_v31 = vld [vmem:[#allocation2 + $0xd2] sm:$0xff]  ;;  %v1720_v35 = vpack.c.bf16 %v1218_v29, %v8336_v60 }
 0x124   : > { %v8349_v36 = vld [vmem:[#allocation2 + $0x40] sm:$0xff]  ;;  %v1723_v38 = vpack.c.bf16 %v8340_v31, %v8338_v30  ;;  %v8358_v40 = vld [vmem:[#allocation2 + $0x50] sm:$0xff]  ;;  %v6961_v24 = vpack.i.bf16 %v8336_v60, %v8313_v19 }
 0x125   : > { %v6881_v42 = vpack.i.bf16 %v8358_v40, %v8349_v36  ;;  %v8365_v43 = vld [vmem:[#allocation2 + $0x41] sm:$0xff]  ;;  %v8367_v45 = vld [vmem:[#allocation2 + $0xb1] sm:$0xff]  ;;  %v6891_v2 = vpack.i.bf16 %v8349_v36, %v8295_v10 }
 0x126   : > { %6852 = vrot.lane.b32.xlu1 %v6851_v27, %s10557_s18  ;;  %v8371_v47 = vld [vmem:[#allocation2 + $0xe2] sm:$0xff]  ;;  %v8373_v48 = vld [vmem:[#allocation2 + $0x51] sm:$0xff]  ;;  %v6866_v50 = vpack.i.bf16 %v8367_v45, %v1106_v44 }
 0x127   : > { %6847 = vrot.lane.b32.xlu0 %v6846_v26, %s10557_s18  ;;  %v8342_v32 = vld [vmem:[#allocation2 + $0x112] sm:$0xff]  ;;  %v6886_v49 = vpack.i.bf16 %v8373_v48, %v8365_v43  ;;  %v8390_v59 = vld [vmem:[#allocation2 + $0x60] sm:$0xff]  ;;  %v6986_v60 = vpack.i.bf16 %v8371_v47, %v8340_v31 }
 0x128   : > { %v8346_v34 = vld [vmem:[#allocation2 + $0x102] sm:$0xff]  ;;  %v8378_v51 = vld [vmem:[#allocation2 + $0xf2] sm:$0xff]  ;;  %v6921_v15 = vpack.i.bf16 %v8390_v59, %v8358_v40 }
 0x129   : > { %v7041_v39 = vpack.i.bf16 %v8342_v32, %v8346_v34  ;;  %v1726_v52 = vpack.c.bf16 %v8378_v51, %v8371_v47  ;;  %v1123_v54 = vld [vmem:[#allocation2 + $0xb2] sm:$0xff]  ;;  %v1729_v55 = vpack.c.bf16 %v8342_v32, %v8346_v34  ;;  %v8403_v4 = vld [vmem:[#allocation2 + $0x61] sm:$0xff] }
 0x12a   : > { %6857 = vrot.lane.b32.xlu1 %v6846_v26, %s10559_s3  ;;  %6717 = vmatmul.mubr.msk.bf16.gmra.mrb[8].mxu0 %vm527_vm5, %v1720_v35  ;;  %v6871_v58 = vpack.i.bf16 %v1123_v54, %v1122_v53  ;;  %v8392_v61 = vld [vmem:[#allocation2 + $0x70] sm:$0xff]  ;;  %v8396_v62 = vld [vmem:[#allocation2 + $0x122] sm:$0xff]  ;;  %v6936_v9 = vpack.i.bf16 %v8338_v30, %v1123_v54 }
 0x12b   : > { %6877 = vrot.lane.b32.xlu0 %v6876_v33, %s10559_s3  ;;  %6720 = vmatprep.mubr.msk.bf16.mxu0 %vm527_vm5, %v1723_v38  ;;  %v1226_v63 = vld [vmem:[#allocation2 + $0x132] sm:$0xff]  ;;  %v6906_v0 = vpack.i.bf16 %v8392_v61, %v8390_v59  ;;  %v8417_v13 = vld [vmem:[#allocation2 + $0xc0] sm:$0xff] }
 0x12c   : > { %v1732_v3 = vpack.c.bf16 %v1226_v63, %v8396_v62  ;;  %v8405_v6 = vld [vmem:[#allocation2 + $0x71] sm:$0xff]  ;;  %v8427_v17 = vld [vmem:[#allocation2 + $0xc1] sm:$0xff] }
 0x12d   : > { %v6916_v7 = vpack.i.bf16 %v8405_v6, %v8403_v4  ;;  %v8419_v14 = vld [vmem:[#allocation2 + $0xd0] sm:$0xff]  ;;  %v1185_v26 = vld [vmem:[#allocation2 + $0x80] sm:$0xff] }
 0x12e   : > { %6862 = vrot.lane.b32.xlu1 %v6861_v41, %s10555_s26  ;;  %v6941_v16 = vpack.i.bf16 %v8419_v14, %v8417_v13  ;;  %v8429_v20 = vld [vmem:[#allocation2 + $0xd1] sm:$0xff]  ;;  %v8447_v38 = vld [vmem:[#allocation2 + $0x81] sm:$0xff]  ;;  %v6976_v19 = vpack.i.bf16 %v1185_v26, %v8392_v61 }
 0x12f   : > { %6882 = vrot.lane.b32.xlu0 %v6881_v42, %s10555_s26  ;;  %v6946_v11 = vpack.i.bf16 %v8429_v20, %v8427_v17  ;;  %v1186_v27 = vld [vmem:[#allocation2 + $0x90] sm:$0xff]  ;;  %v8457_v42 = vld [vmem:[#allocation2 + $0xe0] sm:$0xff] }
 0x130   : > { %v8443_v29 = vld [vmem:[#allocation2 + $0xb0] sm:$0xff]  ;;  %v6966_v33 = vpack.i.bf16 %v1186_v27, %v1185_v26  ;;  %v7001_v54 = vpack.i.bf16 %v8457_v42, %v8419_v14 }
 0x131   : > { %v6951_v35 = vpack.i.bf16 %v8417_v13, %v8443_v29  ;;  %v1202_v41 = vld [vmem:[#allocation2 + $0x91] sm:$0xff] }
 0x132   : > { %6867 = vrot.lane.b32.xlu1 %v6866_v50, %s10559_s3  ;;  %6721 = vmatmul.mubr.msk.bf16.gmra.mrb[12].mxu0 %vm527_vm5, %v1726_v52  ;;  %v6971_v18 = vpack.i.bf16 %v1202_v41, %v8447_v38  ;;  %v8461_v44 = vld [vmem:[#allocation2 + $0xf0] sm:$0xff]  ;;  %v8467_v52 = vld [vmem:[#allocation2 + $0xe1] sm:$0xff] }
 0x133   : > { %6887 = vrot.lane.b32.xlu0 %v6886_v49, %s10557_s18  ;;  %6724 = vmatprep.mubr.msk.bf16.mxu0 %vm527_vm5, %v1729_v55  ;;  %v6991_v50 = vpack.i.bf16 %v8461_v44, %v8457_v42  ;;  %v8471_v53 = vld [vmem:[#allocation2 + $0xf1] sm:$0xff] }
 0x134   : > { %v6996_v55 = vpack.i.bf16 %v8471_v53, %v8467_v52 }
 0x136   : > { %6872 = vrot.lane.b32.xlu1 %v6871_v58, %s10555_s26  ;;  %v7021_v58 = vpack.i.bf16 %v8378_v51, %v8371_v47  ;;  %v7046_v47 = vpack.i.bf16 %v8396_v62, %v8342_v32 }
 0x137   : > { %6897 = vrot.lane.b32.xlu0 %v6896_v56, %s10559_s3  ;;  %v8483_v56 = vld [vmem:[#allocation2 + $0x110] sm:$0xff] }
 0x13a   : > { %6892 = vrot.lane.b32.xlu1 %v6891_v2, %s10557_s18  ;;  %6725 = vmatmul.mubr.msk.bf16.gmra.mrb[16].mxu0 %vm527_vm5, %v1732_v3  ;;  %v8493_v2 = vld [vmem:[#allocation2 + $0x111] sm:$0xff] }
 0x13b   : > { %6907 = vrot.lane.b32.xlu0 %v6906_v0, %s10555_s26  ;;  %v8491_v0 = vld [vmem:[#allocation2 + $0x101] sm:$0xff] }
 0x13c   : > { %v7026_v3 = vpack.i.bf16 %v8493_v2, %v8491_v0 }
 0x13e   : > { %6902 = vrot.lane.b32.xlu1 %v6886_v49, %s10559_s3  ;;  %v6981_v49 = vpack.i.bf16 %v8340_v31, %v8338_v30  ;;  %v7006_v30 = vpack.i.bf16 %v8346_v34, %v8378_v51  ;;  %v8481_v31 = vld [vmem:[#allocation2 + $0x100] sm:$0xff] }
 0x13f   : > { %6917 = vrot.lane.b32.xlu0 %v6916_v7, %s10557_s18  ;;  %v7016_v63 = vpack.i.bf16 %v8483_v56, %v8481_v31  ;;  %v1193_v51 = vld [vmem:[#allocation2 + $0x120] sm:$0xff] }
 0x140   : > { %v7061_v62 = vpack.i.bf16 %v1193_v51, %v8483_v56 }
 0x142   : > { %6912 = vrot.lane.b32.xlu1 %v6911_v8, %s10555_s26  ;;  %v1194_v8 = vld [vmem:[#allocation2 + $0x130] sm:$0xff] }
 0x143   : > { %6937 = vrot.lane.b32.xlu0 %v6936_v9, %s10559_s3  ;;  %v7051_v9 = vpack.i.bf16 %v1194_v8, %v1193_v51 }
 0x146   : > { %6922 = vrot.lane.b32.xlu1 %v6921_v15, %s10557_s18  ;;  %v8507_v15 = vld [vmem:[#allocation2 + $0x121] sm:$0xff] }
 0x147   : > { %6942 = vrot.lane.b32.xlu0 %v6941_v16, %s10555_s26  ;;  %v1210_v16 = vld [vmem:[#allocation2 + $0x131] sm:$0xff] }
 0x14a   : > { %6927 = vrot.lane.b32.xlu1 %v6916_v7, %s10559_s3  ;;  %v7031_v7 = vpack.i.bf16 %v8481_v31, %v8461_v44 }
 0x14b   : > { %6947 = vrot.lane.b32.xlu0 %v6946_v11, %s10557_s18 }
 0x14e   : > { %6932 = vrot.lane.b32.xlu1 %v6931_v12, %s10555_s26 }
 0x14f   : > { %6962 = vrot.lane.b32.xlu0 %v6961_v24, %s10559_s3 }
 0x152   : > { %6952 = vrot.lane.b32.xlu1 %v6951_v35, %s10557_s18 }
 0x153   : > { %6967 = vrot.lane.b32.xlu0 %v6966_v33, %s10555_s26  ;;  %v1082_v33 = vld [vmem:[#allocation2] sm:$0xff] }
 0x156   : > { %6957 = vrot.lane.b32.xlu1 %v6946_v11, %s10559_s3  ;;  %v7056_v11 = vpack.i.bf16 %v1210_v16, %v8507_v15 }
 0x157   : > { %6972 = vrot.lane.b32.xlu0 %v6971_v18, %s10557_s18 }
 0x15a   : > { %6977 = vrot.lane.b32.xlu1 %v6976_v19, %s10557_s18 }
 0x15b   : > { %6987 = vrot.lane.b32.xlu0 %v6986_v60, %s10559_s3 }
 0x15e   : > { %6982 = vrot.lane.b32.xlu1 %v6981_v49, %s10555_s26 }
 0x15f   : > { %6992 = vrot.lane.b32.xlu0 %v6991_v50, %s10555_s26 }
 0x162   : > { %7002 = vrot.lane.b32.xlu1 %v7001_v54, %s10557_s18 }
 0x163   : > { %6997 = vrot.lane.b32.xlu0 %v6996_v55, %s10557_s18 }
 0x166   : > { %7012 = vrot.lane.b32.xlu1 %v6996_v55, %s10559_s3 }
 0x167   : > { %7007 = vrot.lane.b32.xlu0 %v7006_v30, %s10559_s3 }
 0x16a   : > { %7022 = vrot.lane.b32.xlu1 %v7021_v58, %s10555_s26 }
 0x16b   : > { %7017 = vrot.lane.b32.xlu0 %v7016_v63, %s10555_s26 }
 0x16e   : > { %7032 = vrot.lane.b32.xlu1 %v7031_v7, %s10557_s18 }
 0x16f   : > { %7027 = vrot.lane.b32.xlu0 %v7026_v3, %s10557_s18 }
 0x172   : > { %7037 = vrot.lane.b32.xlu1 %v7026_v3, %s10559_s3 }
 0x173   : > { %7047 = vrot.lane.b32.xlu0 %v7046_v47, %s10559_s3 }
 0x176   : > { %7042 = vrot.lane.b32.xlu1 %v7041_v39, %s10555_s26 }
 0x177   : > { %7052 = vrot.lane.b32.xlu0 %v7051_v9, %s10555_s26 }
 0x17a   : > { %7062 = vrot.lane.b32.xlu1 %v7061_v62, %s10557_s18 }
 0x17b   : > { %7057 = vrot.lane.b32.xlu0 %v7056_v11, %s10557_s18 }
 0x190   : > { %v6833_v12 = vpop.permute.xlu1 %6832 }
 0x191   : > { %v6828_v24 = vpop.permute.xlu0 %6827  ;;  %v6835_v34 = vunpack.i.h.bf16 %v6833_v12  ;;  %v6834_v39 = vunpack.i.l.bf16 %v6833_v12 }
 0x192   : > { %v6830_v26 = vunpack.i.h.bf16 %v6828_v24  ;;  %v6829_v27 = vunpack.i.l.bf16 %v6828_v24 }
 0x194   : > { %v6843_v35 = vpop.permute.xlu1 %6842  ;;  %v1611_v49 = vsel %vm527_vm5, %v1082_v33, %v6829_v27  ;;  %v1612_v50 = vsel %vm527_vm5, %v8326_v25, %v6830_v26 }
 0x195   : > { %v6838_v41 = vpop.permute.xlu0 %6837  ;;  %v6845_v19 = vunpack.i.h.bf16 %v6843_v35  ;;  %v6844_v60 = vunpack.i.l.bf16 %v6843_v35  ;;  %v1628_v51 = vsel %vm1627_vm8, %v1611_v49, %v6834_v39  ;;  %v1629_v8 = vsel %vm1627_vm8, %v1612_v50, %v6835_v34 }
 0x196   : > { %v6840_v18 = vunpack.i.h.bf16 %v6838_v41  ;;  %v6839_v32 = vunpack.i.l.bf16 %v6838_v41 }
 0x198   : > { %v1661_v54 = vsel %vm527_vm5, %v8268_v57, %v6839_v32  ;;  %v1662_v55 = vsel %vm527_vm5, %v8317_v22, %v6840_v18  ;;  %v6853_v58 = vpop.permute.xlu1 %6852 }
 0x199   : > { %v6848_v30 = vpop.permute.xlu0 %6847  ;;  %v6855_v7 = vunpack.i.h.bf16 %v6853_v58  ;;  %v6854_v47 = vunpack.i.l.bf16 %v6853_v58  ;;  %v1677_v9 = vsel %vm1627_vm8, %v1661_v54, %v6844_v60  ;;  %v1678_v25 = vsel %vm1627_vm8, %v1662_v55, %v6845_v19 }
 0x19a   : > { %v6850_v63 = vunpack.i.h.bf16 %v6848_v30  ;;  %v6849_v3 = vunpack.i.l.bf16 %v6848_v30 }
 0x19b   : > { %v1646_v57 = vsel %vm1644_vm9, %v1629_v8, %v6855_v7  ;;  %v1645_v16 = vsel %vm1644_vm9, %v1628_v51, %v6854_v47 }
 0x19c   : > { %v1693_v22 = vsel %vm1644_vm9, %v1677_v9, %v6849_v3  ;;  %v1694_v11 = vsel %vm1644_vm9, %v1678_v25, %v6850_v63  ;;  %v6858_v62 = vpop.permute.xlu1 %6857  ;;  %v1709_v26 = vpack.c.bf16 %v1646_v57, %v1645_v16 }
 0x19d   : > { %v6878_v12 = vpop.permute.xlu0 %6877  ;;  %v1710_v24 = vpack.c.bf16 %v1694_v11, %v1693_v22  ;;  %v6860_v63 = vunpack.i.h.bf16 %v6858_v62  ;;  %v6859_v3 = vunpack.i.l.bf16 %v6858_v62 }
 0x19e   : > { %v6880_v35 = vunpack.i.h.bf16 %v6878_v12  ;;  %v6879_v41 = vunpack.i.l.bf16 %v6878_v12 }
 0x19f   : > { %1940 = vmatprep.mubr.bf16.mxu1 %v1710_v24  ;;  %v1613_v9 = vsel %vm527_vm5, %v8286_v5, %v6859_v3 }
 0x1a0   : > { %1941 = vmatmul.mubr.bf16.vlgmr.msra.gmra.mrb[4].mxu1 %v1709_v26  ;;  %v6863_v27 = vpop.permute.xlu1 %6862  ;;  %v1663_v19 = vsel %vm527_vm5, %v8319_v23, %v6879_v41  ;;  %v1664_v60 = vsel %vm527_vm5, %v8365_v43, %v6880_v35  ;;  %v1614_v43 = vsel %vm527_vm5, %v8295_v10, %v6860_v63 }
 0x1a1   : > { %v6883_v33 = vpop.permute.xlu0 %6882  ;;  %v6865_v23 = vunpack.i.h.bf16 %v6863_v27  ;;  %v6864_v8 = vunpack.i.l.bf16 %v6863_v27 }
 0x1a2   : > { %v6885_v18 = vunpack.i.h.bf16 %v6883_v33  ;;  %v6884_v32 = vunpack.i.l.bf16 %v6883_v33 }
 0x1a3   : > { %v1630_v26 = vsel %vm1627_vm8, %v1613_v9, %v6864_v8  ;;  %v1631_v33 = vsel %vm1627_vm8, %v1614_v43, %v6865_v23 }
 0x1a4   : > { %v8533_v39 = vpop.permute.xlu1 %6867  ;;  %v1679_v54 = vsel %vm1627_vm8, %v1663_v19, %v6884_v32  ;;  %v1680_v55 = vsel %vm1627_vm8, %v1664_v60, %v6885_v18 }
 0x1a5   : > { %v6888_v34 = vpop.permute.xlu0 %6887 }
 0x1a6   : > { %v6890_v49 = vunpack.i.h.bf16 %v6888_v34  ;;  %v6889_v50 = vunpack.i.l.bf16 %v6888_v34 }
 0x1a8   : > { %v1695_v30 = vsel %vm1644_vm9, %v1679_v54, %v6889_v50  ;;  %v1696_v58 = vsel %vm1644_vm9, %v1680_v55, %v6890_v49  ;;  %v8543_v47 = vpop.permute.xlu1 %6872 }
 0x1a9   : > { %v6898_v7 = vpop.permute.xlu0 %6897  ;;  %v1713_v51 = vpack.c.bf16 %v1696_v58, %v1695_v30 }
 0x1aa   : > { %v6900_v16 = vunpack.i.h.bf16 %v6898_v7  ;;  %v6899_v22 = vunpack.i.l.bf16 %v6898_v7 }
 0x1ab   : > { %1948 = vmatprep.mubr.bf16.mxu1 %v1713_v51 }
 0x1ac   : > { %v6893_v57 = vpop.permute.xlu1 %6892  ;;  %v1665_v5 = vsel %vm527_vm5, %v8373_v48, %v6899_v22  ;;  %v1666_v32 = vsel %vm527_vm5, %v8403_v4, %v6900_v16 }
 0x1ad   : > { %v6908_v25 = vpop.permute.xlu0 %6907  ;;  %v6895_v11 = vunpack.i.h.bf16 %v6893_v57  ;;  %v6894_v12 = vunpack.i.l.bf16 %v6893_v57 }
 0x1ae   : > { %v6910_v62 = vunpack.i.h.bf16 %v6908_v25  ;;  %v6909_v24 = vunpack.i.l.bf16 %v6908_v25 }
 0x1af   : > { %v1647_v27 = vsel %vm1644_vm9, %v1630_v26, %v6894_v12  ;;  %v1648_v35 = vsel %vm1644_vm9, %v1631_v33, %v6895_v11 }
 0x1b0   : > { %v6903_v41 = vpop.permute.xlu1 %6902  ;;  %v1712_v18 = vpack.c.bf16 %v1648_v35, %v1647_v27  ;;  %v1681_v60 = vsel %vm1627_vm8, %v1665_v5, %v6909_v24  ;;  %v1682_v49 = vsel %vm1627_vm8, %v1666_v32, %v6910_v62  ;;  %v6870_v35 = vunpack.i.h.bf16 %v8533_v39 }
 0x1b1   : > { %v6918_v10 = vpop.permute.xlu0 %6917  ;;  %v6905_v63 = vunpack.i.h.bf16 %v6903_v41  ;;  %v6904_v3 = vunpack.i.l.bf16 %v6903_v41 }
 0x1b2   : > { %v6920_v34 = vunpack.i.h.bf16 %v6918_v10  ;;  %v6919_v19 = vunpack.i.l.bf16 %v6918_v10  ;;  %1949 = vmatmul.mubr.bf16.gmra.mrb[8].mxu1 %v1712_v18 }
 0x1b3   : > { %v1616_v23 = vsel %vm527_vm5, %v8358_v40, %v6905_v63  ;;  %v1615_v8 = vsel %vm527_vm5, %v8349_v36, %v6904_v3 }
 0x1b4   : > { %v1697_v50 = vsel %vm1644_vm9, %v1681_v60, %v6919_v19  ;;  %v1698_v54 = vsel %vm1644_vm9, %v1682_v49, %v6920_v34  ;;  %v6913_v55 = vpop.permute.xlu1 %6912 }
 0x1b5   : > { %v6938_v30 = vpop.permute.xlu0 %6937  ;;  %v1716_v58 = vpack.c.bf16 %v1698_v54, %v1697_v50  ;;  %v6915_v48 = vunpack.i.h.bf16 %v6913_v55  ;;  %v6914_v7 = vunpack.i.l.bf16 %v6913_v55 }
 0x1b6   : > { %v6940_v18 = vunpack.i.h.bf16 %v6938_v30  ;;  %v6939_v5 = vunpack.i.l.bf16 %v6938_v30 }
 0x1b7   : > { %1956 = vmatprep.mubr.bf16.mxu1 %v1716_v58  ;;  %v1632_v25 = vsel %vm1627_vm8, %v1615_v8, %v6914_v7  ;;  %v1633_v57 = vsel %vm1627_vm8, %v1616_v23, %v6915_v48 }
 0x1b8   : > { %v6923_v4 = vpop.permute.xlu1 %6922  ;;  %v1669_v23 = vsel %vm527_vm5, %v8367_v45, %v6939_v5  ;;  %v1670_v8 = vsel %vm527_vm5, %v8427_v17, %v6940_v18 }
 0x1b9   : > { %v6943_v51 = vpop.permute.xlu0 %6942  ;;  %v6925_v43 = vunpack.i.h.bf16 %v6923_v4  ;;  %v6924_v9 = vunpack.i.l.bf16 %v6923_v4 }
 0x1ba   : > { %v6945_v32 = vunpack.i.h.bf16 %v6943_v51  ;;  %v6944_v34 = vunpack.i.l.bf16 %v6943_v51 }
 0x1bb   : > { %v1649_v16 = vsel %vm1644_vm9, %v1632_v25, %v6924_v9  ;;  %v1650_v22 = vsel %vm1644_vm9, %v1633_v57, %v6925_v43 }
 0x1bc   : > { %v6928_v11 = vpop.permute.xlu1 %6927  ;;  %v1715_v62 = vpack.c.bf16 %v1650_v22, %v1649_v16  ;;  %v1685_v16 = vsel %vm1627_vm8, %v1669_v23, %v6944_v34  ;;  %v1686_v22 = vsel %vm1627_vm8, %v1670_v8, %v6945_v32 }
 0x1bd   : > { %v6948_v12 = vpop.permute.xlu0 %6947  ;;  %v6930_v19 = vunpack.i.h.bf16 %v6928_v11  ;;  %v6929_v60 = vunpack.i.l.bf16 %v6928_v11 }
 0x1be   : > { %1957 = vmatmul.mubr.bf16.gmra.mrb[12].mxu1 %v1715_v62  ;;  %v6950_v49 = vunpack.i.h.bf16 %v6948_v12  ;;  %v6949_v50 = vunpack.i.l.bf16 %v6948_v12 }
 0x1bf   : > { %v1618_v11 = vsel %vm527_vm5, %v8392_v61, %v6930_v19  ;;  %v1617_v45 = vsel %vm527_vm5, %v8390_v59, %v6929_v60 }
 0x1c0   : > { %v6933_v24 = vpop.permute.xlu1 %6932 }
 0x1c1   : > { %v6963_v26 = vpop.permute.xlu0 %6962  ;;  %v6935_v7 = vunpack.i.h.bf16 %v6933_v24  ;;  %v6934_v4 = vunpack.i.l.bf16 %v6933_v24  ;;  %v1701_v24 = vsel %vm1644_vm9, %v1685_v16, %v6949_v50  ;;  %v1620_v50 = vsel %vm527_vm5, %v8443_v29, %v6870_v35 }
 0x1c2   : > { %v6965_v36 = vunpack.i.h.bf16 %v6963_v26  ;;  %v6964_v27 = vunpack.i.l.bf16 %v6963_v26  ;;  %v1702_v26 = vsel %vm1644_vm9, %v1686_v22, %v6950_v49 }
 0x1c3   : > { %v1634_v62 = vsel %vm1627_vm8, %v1617_v45, %v6934_v4  ;;  %v1722_v60 = vpack.c.bf16 %v1702_v26, %v1701_v24 }
 0x1c4   : > { %v8569_v33 = vpop.permute.xlu1 %6952  ;;  %v1668_v58 = vsel %vm527_vm5, %v8447_v38, %v6965_v36  ;;  %v1667_v63 = vsel %vm527_vm5, %v8405_v6, %v6964_v27  ;;  %v6869_v6 = vunpack.i.l.bf16 %v8533_v39  ;;  %v1635_v39 = vsel %vm1627_vm8, %v1618_v11, %v6935_v7 }
 0x1c5   : > { %v6968_v40 = vpop.permute.xlu0 %6967  ;;  %v6875_v36 = vunpack.i.h.bf16 %v8543_v47  ;;  %v6874_v27 = vunpack.i.l.bf16 %v8543_v47 }
 0x1c6   : > { %v6970_v10 = vunpack.i.h.bf16 %v6968_v40  ;;  %v6969_v41 = vunpack.i.l.bf16 %v6968_v40  ;;  %v1090_v40 = vld [vmem:[#allocation2 + $0xa0] sm:$0xff] }
 0x1c7   : > { %v1619_v49 = vsel %vm527_vm5, %v1090_v40, %v6869_v6 }
 0x1c8   : > { %v8572_v55 = vpop.permute.xlu1 %6957  ;;  %v1683_v30 = vsel %vm1627_vm8, %v1667_v63, %v6969_v41  ;;  %v1684_v51 = vsel %vm1627_vm8, %v1668_v58, %v6970_v10  ;;  %v6955_v10 = vunpack.i.h.bf16 %v8569_v33  ;;  %v6954_v41 = vunpack.i.l.bf16 %v8569_v33 }
 0x1c9   : > { %v6973_v54 = vpop.permute.xlu0 %6972  ;;  %v1636_v58 = vsel %vm1627_vm8, %v1619_v49, %v6874_v27  ;;  %v1637_v63 = vsel %vm1627_vm8, %v1620_v50, %v6875_v36  ;;  %v6960_v8 = vunpack.i.h.bf16 %v8572_v55 }
 0x1ca   : > { %v6975_v3 = vunpack.i.h.bf16 %v6973_v54  ;;  %v6974_v48 = vunpack.i.l.bf16 %v6973_v54  ;;  %v1654_v7 = vsel %vm1644_vm9, %v1637_v63, %v6955_v10 }
 0x1cb   : > { %v1622_v45 = vsel %vm527_vm5, %v8419_v14, %v6960_v8 }
 0x1cc   : > { %v1699_v43 = vsel %vm1644_vm9, %v1683_v30, %v6974_v48  ;;  %v1700_v38 = vsel %vm1644_vm9, %v1684_v51, %v6975_v3  ;;  %v6978_v9 = vpop.permute.xlu1 %6977  ;;  %v1653_v48 = vsel %vm1644_vm9, %v1636_v58, %v6954_v41 }
 0x1cd   : > { %v6988_v25 = vpop.permute.xlu0 %6987  ;;  %v1719_v57 = vpack.c.bf16 %v1700_v38, %v1699_v43  ;;  %v6980_v17 = vunpack.i.h.bf16 %v6978_v9  ;;  %v6979_v12 = vunpack.i.l.bf16 %v6978_v9  ;;  %v6959_v43 = vunpack.i.l.bf16 %v8572_v55 }
 0x1ce   : > { %v6990_v34 = vunpack.i.h.bf16 %v6988_v25  ;;  %v6989_v19 = vunpack.i.l.bf16 %v6988_v25  ;;  %v1721_v16 = vpack.c.bf16 %v1654_v7, %v1653_v48 }
 0x1cf   : > { %1964 = vmatprep.mubr.bf16.mxu1 %v1719_v57  ;;  %v1651_v61 = vsel %vm1644_vm9, %v1634_v62, %v6979_v12  ;;  %v1652_v59 = vsel %vm1644_vm9, %v1635_v39, %v6980_v17  ;;  %v1621_v17 = vsel %vm527_vm5, %v8417_v13, %v6959_v43 }
 0x1d0   : > { %v6983_v18 = vpop.permute.xlu1 %6982  ;;  %v1718_v32 = vpack.c.bf16 %v1652_v59, %v1651_v61  ;;  %v1671_v4 = vsel %vm527_vm5, %v8429_v20, %v6989_v19  ;;  %v1672_v29 = vsel %vm527_vm5, %v8467_v52, %v6990_v34 }
 0x1d1   : > { %v6993_v5 = vpop.permute.xlu0 %6992  ;;  %v6985_v9 = vunpack.i.h.bf16 %v6983_v18  ;;  %v6984_v25 = vunpack.i.l.bf16 %v6983_v18 }
 0x1d2   : > { %v6995_v47 = vunpack.i.h.bf16 %v6993_v5  ;;  %v6994_v54 = vunpack.i.l.bf16 %v6993_v5  ;;  %1965 = vmatmul.mubr.bf16.gmra.mrb[16].mxu1 %v1718_v32 }
 0x1d3   : > { %1972 = vmatprep.mubr.bf16.mxu1 %v1722_v60  ;;  %v1638_v24 = vsel %vm1627_vm8, %v1621_v17, %v6984_v25  ;;  %v1639_v26 = vsel %vm1627_vm8, %v1622_v45, %v6985_v9 }
 0x1d4   : > { %v7003_v33 = vpop.permute.xlu1 %7002  ;;  %v1687_v51 = vsel %vm1627_vm8, %v1671_v4, %v6994_v54  ;;  %v1688_v23 = vsel %vm1627_vm8, %v1672_v29, %v6995_v47 }
 0x1d5   : > { %v6998_v3 = vpop.permute.xlu0 %6997  ;;  %v7005_v22 = vunpack.i.h.bf16 %v7003_v33  ;;  %v7004_v11 = vunpack.i.l.bf16 %v7003_v33 }
 0x1d6   : > { %v7000_v35 = vunpack.i.h.bf16 %v6998_v3  ;;  %v6999_v30 = vunpack.i.l.bf16 %v6998_v3 }
 0x1d7   : > { %v1655_v40 = vsel %vm1644_vm9, %v1638_v24, %v7004_v11  ;;  %v1656_v36 = vsel %vm1644_vm9, %v1639_v26, %v7005_v22 }
 0x1d8   : > { %v1703_v38 = vsel %vm1644_vm9, %v1687_v51, %v6999_v30  ;;  %v1704_v6 = vsel %vm1644_vm9, %v1688_v23, %v7000_v35  ;;  %v7013_v20 = vpop.permute.xlu1 %7012  ;;  %v1724_v34 = vpack.c.bf16 %v1656_v36, %v1655_v40 }
 0x1d9   : > { %v7008_v57 = vpop.permute.xlu0 %7007  ;;  %v1725_v52 = vpack.c.bf16 %v1704_v6, %v1703_v38  ;;  %v7015_v27 = vunpack.i.h.bf16 %v7013_v20  ;;  %v7014_v61 = vunpack.i.l.bf16 %v7013_v20 }
 0x1da   : > { %1973 = vmatmul.mubr.bf16.gmra.mrb[20].mxu1 %v1721_v16  ;;  %v7010_v55 = vunpack.i.h.bf16 %v7008_v57  ;;  %v7009_v12 = vunpack.i.l.bf16 %v7008_v57 }
 0x1db   : > { %1980 = vmatprep.mubr.bf16.mxu1 %v1725_v52  ;;  %v1623_v47 = vsel %vm527_vm5, %v8457_v42, %v7014_v61  ;;  %v1624_v54 = vsel %vm527_vm5, %v8461_v44, %v7015_v27 }
 0x1dc   : > { %v7023_v62 = vpop.permute.xlu1 %7022  ;;  %v1673_v13 = vsel %vm527_vm5, %v8471_v53, %v7009_v12  ;;  %v1674_v18 = vsel %vm527_vm5, %v8491_v0, %v7010_v55 }
 0x1dd   : > { %v7018_v39 = vpop.permute.xlu0 %7017  ;;  %v7025_v10 = vunpack.i.h.bf16 %v7023_v62  ;;  %v7024_v41 = vunpack.i.l.bf16 %v7023_v62 }
 0x1de   : > { %v7020_v59 = vunpack.i.h.bf16 %v7018_v39  ;;  %v7019_v14 = vunpack.i.l.bf16 %v7018_v39 }
 0x1df   : > { %v1640_v33 = vsel %vm1627_vm8, %v1623_v47, %v7024_v41  ;;  %v1641_v3 = vsel %vm1627_vm8, %v1624_v54, %v7025_v10  ;;  %v2245_v41 = vld [vmem:[#allocation3 + $0x160] sm:$0xff] }
 0x1e0   : > { %v7033_v32 = vpop.permute.xlu1 %7032  ;;  %v1689_v58 = vsel %vm1627_vm8, %v1673_v13, %v7019_v14  ;;  %v1690_v53 = vsel %vm1627_vm8, %v1674_v18, %v7020_v59  ;;  %v2246_v13 = vld [vmem:[#allocation3 + $0x170] sm:$0xff] }
 0x1e1   : > { %v7028_v5 = vpop.permute.xlu0 %7027  ;;  %v7035_v49 = vunpack.i.h.bf16 %v7033_v32  ;;  %v7034_v50 = vunpack.i.l.bf16 %v7033_v32 }
 0x1e2   : > { %v7030_v19 = vunpack.i.h.bf16 %v7028_v5  ;;  %v7029_v60 = vunpack.i.l.bf16 %v7028_v5  ;;  %1981 = vmatmul.mubr.bf16.gmra.mrb[24].mxu1 %v1724_v34  ;;  %v7076_v5 = vpack.i.bf16 %v2246_v13, %v2245_v41 }
 0x1e3   : > { %v1657_v42 = vsel %vm1644_vm9, %v1640_v33, %v7034_v50  ;;  %v1658_v44 = vsel %vm1644_vm9, %v1641_v3, %v7035_v49  ;;  %v2151_v49 = vld [vmem:[#allocation3 + $0x12] sm:$0xff]  ;;  %v2261_v50 = vld [vmem:[#allocation3 + $0x162] sm:$0xff] }
 0x1e4   : > { %v1705_v0 = vsel %vm1644_vm9, %v1689_v58, %v7029_v60  ;;  %v1706_v63 = vsel %vm1644_vm9, %v1690_v53, %v7030_v19  ;;  %v7038_v48 = vpop.permute.xlu1 %7037  ;;  %v1727_v29 = vpack.c.bf16 %v1658_v44, %v1657_v42  ;;  %7077 = vrot.lane.b32.xlu0 %v7076_v5, %s10555_s26  ;;  %v2150_v60 = vld [vmem:[#allocation3 + $0x2] sm:$0xff]  ;;  %v2262_v58 = vld [vmem:[#allocation3 + $0x172] sm:$0xff] }
 0x1e5   : > { %v7048_v7 = vpop.permute.xlu0 %7047  ;;  %v1728_v4 = vpack.c.bf16 %v1706_v63, %v1705_v0  ;;  %v7040_v35 = vunpack.i.h.bf16 %v7038_v48  ;;  %v7039_v30 = vunpack.i.l.bf16 %v7038_v48  ;;  %v7066_v54 = vpack.i.bf16 %v2151_v49, %v2150_v60  ;;  %v2166_v53 = vld [vmem:[#allocation3 + $0x4] sm:$0xff]  ;;  %v2167_v0 = vld [vmem:[#allocation3 + $0x14] sm:$0xff] }
 0x1e6   : > { %v7050_v51 = vunpack.i.h.bf16 %v7048_v7  ;;  %v7049_v23 = vunpack.i.l.bf16 %v7048_v7  ;;  %v7081_v33 = vpack.i.bf16 %v2262_v58, %v2261_v50  ;;  %v7071_v48 = vpack.i.bf16 %v2167_v0, %v2166_v53  ;;  %v7616_v49 = vld [vmem:[%s10548_s9 + $0x20] sm:$0xff]   ;;  %v7617_v53 = vld [vmem:[%s10548_s9 + $0x68] sm:$0xff]  }
 0x1e7   : > { %1988 = vmatprep.mubr.bf16.mxu1 %v1728_v4  ;;  %v1626_v20 = vsel %vm527_vm5, %v8483_v56, %v7040_v35  ;;  %v1625_v57 = vsel %vm527_vm5, %v8481_v31, %v7039_v30  ;;  %7067 = vrot.lane.b32.xlu1 %v7066_v54, %s10559_s3  ;;  %v8703_v35 = vld [vmem:[%s10547_s8] ss:$0 sm:$0xff]  ;;  %s7743_s3 = smov 48  }
 0x1e8   : > { %v7043_v8 = vpop.permute.xlu1 %7042  ;;  %v1675_v16 = vsel %vm527_vm5, %v8493_v2, %v7049_v23  ;;  %v1676_v52 = vsel %vm527_vm5, %v8507_v15, %v7050_v51  ;;  %7082 = vrot.lane.b32.xlu0 %v7081_v33, %s10557_s18 }
 0x1e9   : > { %v7053_v43 = vpop.permute.xlu0 %7052  ;;  %v7045_v38 = vunpack.i.h.bf16 %v7043_v8  ;;  %v7044_v6 = vunpack.i.l.bf16 %v7043_v8 }
 0x1ea   : > { %v7055_v9 = vunpack.i.h.bf16 %v7053_v43  ;;  %v7054_v25 = vunpack.i.l.bf16 %v7053_v43  ;;  %1989 = vmatmul.mubr.bf16.gmra.mrb[28].mxu1 %v1727_v29 }
 0x1eb   : > { %v1642_v56 = vsel %vm1627_vm8, %v1625_v57, %v7044_v6  ;;  %v1643_v31 = vsel %vm1627_vm8, %v1626_v20, %v7045_v38  ;;  %7072 = vrot.lane.b32.xlu1 %v7071_v48, %s10555_s26  ;;  %v7607_v6 = vld [vmem:[%s10548_s9 + $0x40] sm:$0xff]   ;;  %s10585_s26 = smov 32   ;;  %v7618_v48 = vld [vmem:[%s10548_s9 + $0x28] sm:$0xff]  }
 0x1ec   : > { %v7063_v11 = vpop.permute.xlu1 %7062  ;;  %v1691_v62 = vsel %vm1627_vm8, %v1675_v16, %v7054_v25  ;;  %v1692_v39 = vsel %vm1627_vm8, %v1676_v52, %v7055_v9  ;;  %v7608_v20 = vld [vmem:[%s10548_s9] sm:$0xff]   ;;  %6616 = vmatprep.subr.bf16.mxu0 %v7607_v6  ;;  %6758 = vmatprep.subr.bf16.mxu1 %v7607_v6 }
 0x1ed   : > { %v7058_v22 = vpop.permute.xlu0 %7057  ;;  %v7065_v55 = vunpack.i.h.bf16 %v7063_v11  ;;  %v7064_v12 = vunpack.i.l.bf16 %v7063_v11  ;;  %6617 = vmatpush3.bf16.msra.mxu0 %v7608_v20  ;;  %6766 = vmatpush3.bf16.msra.mxu1 %v7608_v20  ;;  %v7610_v11 = vld [vmem:[%s10548_s9 + $0x8] sm:$0xff]  }
 0x1ee   : > { %v7060_v45 = vunpack.i.h.bf16 %v7058_v22  ;;  %v7059_v17 = vunpack.i.l.bf16 %v7058_v22  ;;  %v7609_v22 = vld [vmem:[%s10548_s9 + $0x48] sm:$0xff]  }
 0x1ef   : > { %v1659_v15 = vsel %vm1644_vm9, %v1642_v56, %v7064_v12  ;;  %v1660_v26 = vsel %vm1644_vm9, %v1643_v31, %v7065_v55  ;;  %6618 = vmatprep.subr.bf16.mxu0 %v7609_v22  ;;  %6759 = vmatprep.subr.bf16.mxu1 %v7609_v22 }
 0x1f0   : > { %v1707_v24 = vsel %vm1644_vm9, %v1691_v62, %v7059_v17  ;;  %v1708_v2 = vsel %vm1644_vm9, %v1692_v39, %v7060_v45  ;;  %v1730_v36 = vpack.c.bf16 %v1660_v26, %v1659_v15  ;;  %v7611_v45 = vld [vmem:[%s10548_s9 + $0x50] sm:$0xff]   ;;  %v7613_v62 = vld [vmem:[%s10548_s9 + $0x58] sm:$0xff]  }
 0x1f1   : > { %v1731_v40 = vpack.c.bf16 %v1708_v2, %v1707_v24  ;;  %6619 = vmatpush3.bf16.msra.mxu0 %v7610_v11  ;;  %6767 = vmatpush3.bf16.msra.mxu1 %v7610_v11  ;;  %v7612_v17 = vld [vmem:[%s10548_s9 + $0x10] sm:$0xff]   ;;  %v7614_v24 = vld [vmem:[%s10548_s9 + $0x18] sm:$0xff]  }
 0x1f2   : > { %6620 = vmatprep.subr.bf16.mxu0 %v7611_v45  ;;  %6760 = vmatprep.subr.bf16.mxu1 %v7611_v45 }
 0x1f3   : > { %1996 = vmatprep.mubr.bf16.mxu1 %v1731_v40 }
 0x1f4   : > { %1997 = vmatmul.mubr.bf16.gmra.mrb[32].mxu1 %v1730_v36 }
 0x1f5   : > { %v8660_v27 = vpop.f32.mrb[4].mxu0  ;;  %6621 = vmatpush3.bf16.msra.mxu0 %v7612_v17  ;;  %6768 = vmatpush3.bf16.msra.mxu1 %v7612_v17 }
 0x1f6   : > { %v2039_v61 = vpop.f32.mrb[5].mxu0  ;;  %6622 = vmatprep.subr.bf16.mxu0 %v7613_v62  ;;  %6761 = vmatprep.subr.bf16.mxu1 %v7613_v62 }
 0x1f7   : > { %v8662_v59 = vpop.f32.mrb[6].mxu0 }
 0x1f8   : > { %v2042_v14 = vpop.f32.mrb[7].mxu0 }
 0x1f9   : > { %6623 = vmatpush3.bf16.msra.mxu0 %v7614_v24  ;;  %6769 = vmatpush3.bf16.msra.mxu1 %v7614_v24 }
 0x1fd   : > { %v8664_v10 = vpop.f32.mrb[8].mxu0 }
 0x1fe   : > { %v8666_v18 = vpop.f32.mrb[9].mxu0 }
 0x1ff   : > { %v8676_v32 = vpop.f32.mrb[10].mxu0 }
 0x200   : > { %v8678_v34 = vpop.f32.mrb[11].mxu0 }
 0x205   : > { %v8681_v19 = vpop.f32.mrb[12].mxu0 }
 0x206   : > { %v8683_v47 = vpop.f32.mrb[13].mxu0 }
 0x207   : > { %v8685_v63 = vpop.f32.mrb[14].mxu0 }
 0x208   : > { %v8687_v3 = vpop.f32.mrb[15].mxu0 }
 0x20d   : > { %v8692_v7 = vpop.f32.mrb[16].mxu0 }
 0x20e   : > { %v8694_v4 = vpop.f32.mrb[17].mxu0 }
 0x20f   : > { %v8696_v42 = vpop.f32.mrb[18].mxu0 }
 0x210   : > { %v8698_v44 = vpop.f32.mrb[19].mxu0 }
 0x273   : > { %v6558_v29 = vpop.f32.mrb[4].mxu1 }
 0x274   : > { %v6559_v30 = vpop.f32.mrb[5].mxu1 }
 0x275   : > { %v6560_v51 = vadd.f32 %v6559_v30, %v6558_v29  ;;  %v6561_v23 = vpop.f32.mrb[6].mxu1  ;;  %v7619_v29 = vld [vmem:[%s10548_s9 + $0x70] sm:$0xff]  }
 0x276   : > { %v6562_v8 = vpop.f32.mrb[7].mxu1  ;;  %v7620_v30 = vld [vmem:[%s10548_s9 + $0x30] sm:$0xff]  }
 0x277   : > { %v1943_v43 = vadd.f32 %v6560_v51, %v8703_v35  ;;  %v6563_v38 = vadd.f32 %v6562_v8, %v6561_v23  ;;  %v7621_v23 = vld [vmem:[%s10548_s9 + $0x78] sm:$0xff]  }
 0x279   : > { %v2040_v9 = vadd.f32 %v2039_v61, %v1943_v43  ;;  %v1946_v25 = vadd.f32 %v6563_v38, %v8703_v35 }
 0x27b   : > { %v2102_v57 = vmax.f32 %v2040_v9, 0.0  ;;  %v2043_v16 = vadd.f32 %v2042_v14, %v1946_v25  ;;  %v7615_v14 = vld [vmem:[%s10548_s9 + $0x60] sm:$0xff]   ;;  %v7622_v25 = vld [vmem:[%s10548_s9 + $0x38] sm:$0xff]  }
 0x27c   : > { %6624 = vmatprep.subr.bf16.mxu0 %v7615_v14  ;;  %6762 = vmatprep.subr.bf16.mxu1 %v7615_v14 }
 0x27d   : > { %2118 = vst.msk [vmem:[#allocation3 + $0x22] sm:$0xff] %vm527_vm5, %v2102_v57  ;;  %v2103_v52 = vmax.f32 %v2043_v16, 0.0  ;;  %6625 = vmatpush3.bf16.msra.mxu0 %v7616_v49  ;;  %6770 = vmatpush3.bf16.msra.mxu1 %v7616_v49 }
 0x27e   : > { %6626 = vmatprep.subr.bf16.mxu0 %v7617_v53  ;;  %6763 = vmatprep.subr.bf16.mxu1 %v7617_v53 }
 0x27f   : > { %2119 = vst.msk [vmem:[#allocation3 + $0x32] sm:$0xff] %vm527_vm5, %v2103_v52 }
 0x281   : > { %6627 = vmatpush3.bf16.msra.mxu0 %v7618_v48  ;;  %6771 = vmatpush3.bf16.msra.mxu1 %v7618_v48 }
 0x282   : > { %6628 = vmatprep.subr.bf16.mxu0 %v7619_v29  ;;  %6764 = vmatprep.subr.bf16.mxu1 %v7619_v29 }
 0x284   : > { %v2214_v55 = vld [vmem:[#allocation3 + $0x24] sm:$0xff] }
 0x285   : > { %v8727_v12 = vld [vmem:[#allocation3 + $0x20] sm:$0xff]  ;;  %v6564_v39 = vpop.f32.mrb[8].mxu1  ;;  %6629 = vmatpush3.bf16.msra.mxu0 %v7620_v30  ;;  %6772 = vmatpush3.bf16.msra.mxu1 %v7620_v30 }
 0x286   : > { %v2215_v56 = vld [vmem:[#allocation3 + $0x34] sm:$0xff]  ;;  %v6565_v2 = vpop.f32.mrb[9].mxu1  ;;  %v8747_v60 = vld [vmem:[#allocation3 + $0x22] sm:$0xff]  ;;  %6630 = vmatprep.subr.bf16.mxu0 %v7621_v23  ;;  %6765 = vmatprep.subr.bf16.mxu1 %v7621_v23 }
 0x287   : > { %v8732_v31 = vld [vmem:[#allocation3 + $0x30] sm:$0xff]  ;;  %v7086_v15 = vpack.i.bf16 %v2215_v56, %v2214_v55  ;;  %v6566_v40 = vadd.f32 %v6565_v2, %v6564_v39  ;;  %v6567_v36 = vpop.f32.mrb[10].mxu1 }
 0x288   : > { %v7091_v26 = vpack.i.bf16 %v8732_v31, %v8727_v12  ;;  %v8739_v61 = vld [vmem:[#allocation3 + $0x32] sm:$0xff]  ;;  %v6568_v41 = vpop.f32.mrb[11].mxu1 }
 0x289   : > { %7087 = vrot.lane.b32.xlu0 %v7086_v15, %s10585_s26  ;;  %v1951_v13 = vadd.f32 %v6566_v40, %v8703_v35  ;;  %v6569_v5 = vadd.f32 %v6568_v41, %v6567_v36  ;;  %v7096_v50 = vpack.i.bf16 %v8739_v61, %v8747_v60  ;;  %6631 = vmatpush3.bf16.msra.mxu0 %v7622_v25 }
 0x28a   : > { %7092 = vrot.lane.b32.xlu1 %v7091_v26, %s10586_s25  ;;  %6773 = vmatpush3.bf16.msra.mxu1 %v7622_v25 }
 0x28b   : > { %v2048_v54 = vadd.f32 %v8660_v27, %v1951_v13  ;;  %v1954_v58 = vadd.f32 %v6569_v5, %v8703_v35 }
 0x28d   : > { %v2104_v0 = vmax.f32 %v2048_v54, 0.0  ;;  %v2051_v33 = vadd.f32 %v8662_v59, %v1954_v58 }
 0x28e   : > { %7097 = vrot.lane.b32.xlu1 %v7096_v50, %s10585_s26 }
 0x28f   : > { %2120 = vst.msk [vmem:[#allocation3 + $0x42] sm:$0xff] %vm527_vm5, %v2104_v0  ;;  %v2105_v27 = vmax.f32 %v2051_v33, 0.0 }
 0x291   : > { %2121 = vst.msk [vmem:[#allocation3 + $0x52] sm:$0xff] %vm527_vm5, %v2105_v27  ;;  %v6570_v59 = vpop.f32.mrb[12].mxu1 }
 0x292   : > { %7102 = vrot.lane.b32.xlu1 %v7086_v15, %s10587_s28  ;;  %v6571_v51 = vpop.f32.mrb[13].mxu1 }
 0x293   : > { %v6572_v8 = vadd.f32 %v6571_v51, %v6570_v59  ;;  %v6573_v43 = vpop.f32.mrb[14].mxu1 }
 0x294   : > { %v6574_v38 = vpop.f32.mrb[15].mxu1 }
 0x295   : > { %v1959_v6 = vadd.f32 %v6572_v8, %v8703_v35  ;;  %v6575_v9 = vadd.f32 %v6574_v38, %v6573_v43 }
 0x296   : > { %v8782_v16 = vld [vmem:[#allocation3 + $0x40] sm:$0xff] }
 0x297   : > { %v2056_v20 = vadd.f32 %v8666_v18, %v1959_v6  ;;  %v1962_v57 = vadd.f32 %v6575_v9, %v8703_v35  ;;  %v8791_v55 = vld [vmem:[#allocation3 + $0x44] sm:$0xff] }
 0x298   : > { %v8784_v52 = vld [vmem:[#allocation3 + $0x50] sm:$0xff] }
 0x299   : > { %v8786_v22 = vld [vmem:[#allocation3 + $0x54] sm:$0xff]  ;;  %v2106_v11 = vmax.f32 %v2056_v20, 0.0  ;;  %v2059_v45 = vadd.f32 %v8678_v34, %v1962_v57  ;;  %v7106_v17 = vpack.i.bf16 %v8784_v52, %v8782_v16  ;;  %v8800_v34 = vld [vmem:[#allocation3 + $0x42] sm:$0xff] }
 0x29a   : > { %v8793_v62 = vld [vmem:[#allocation3 + $0x52] sm:$0xff]  ;;  %v8811_v24 = vpack.i.bf16 %v8786_v22, %v8791_v55 }
 0x29b   : > { %2122 = vst.msk [vmem:[#allocation3 + $0x62] sm:$0xff] %vm527_vm5, %v2106_v11  ;;  %v2107_v39 = vmax.f32 %v2059_v45, 0.0  ;;  %7107 = vrot.lane.b32.xlu0 %v7106_v17, %s10587_s28  ;;  %7122 = vrot.lane.b32.xlu1 %v7106_v17, %s10586_s25  ;;  %v8805_v56 = vpack.i.bf16 %v8793_v62, %v8800_v34 }
 0x29d   : > { %2123 = vst.msk [vmem:[#allocation3 + $0x72] sm:$0xff] %vm527_vm5, %v2107_v39 }
 0x29f   : > { %7112 = vrot.lane.b32.xlu0 %v8805_v56, %s10586_s25 }
 0x2a2   : > { %v8815_v2 = vld [vmem:[#allocation3 + $0x60] sm:$0xff] }
 0x2a3   : > { %7117 = vrot.lane.b32.xlu0 %v8811_v24, %s10585_s26  ;;  %v8819_v26 = vld [vmem:[#allocation3 + $0x64] sm:$0xff] }
 0x2a4   : > { %v8817_v15 = vld [vmem:[#allocation3 + $0x70] sm:$0xff]  ;;  %v8833_v58 = vld [vmem:[#allocation3 + $0x62] sm:$0xff] }
 0x2a5   : > { %v8821_v40 = vld [vmem:[#allocation3 + $0x74] sm:$0xff]  ;;  %v6576_v36 = vpop.f32.mrb[16].mxu1  ;;  %v8825_v14 = vpack.i.bf16 %v8817_v15, %v8815_v2 }
 0x2a6   : > { %v6577_v13 = vpop.f32.mrb[17].mxu1  ;;  %v8829_v5 = vld [vmem:[#allocation3 + $0x72] sm:$0xff] }
 0x2a7   : > { %v6578_v49 = vadd.f32 %v6577_v13, %v6576_v36  ;;  %v6579_v50 = vpop.f32.mrb[18].mxu1  ;;  %7127 = vrot.lane.b32.xlu0 %v8825_v14, %s10587_s28  ;;  %v8838_v33 = vpack.i.bf16 %v8829_v5, %v8833_v58 }
 0x2a8   : > { %v6580_v54 = vpop.f32.mrb[19].mxu1 }
 0x2a9   : > { %v1967_v53 = vadd.f32 %v6578_v49, %v8703_v35  ;;  %v6581_v0 = vadd.f32 %v6580_v54, %v6579_v50 }
 0x2ab   : > { %v2064_v48 = vadd.f32 %v8664_v10, %v1967_v53  ;;  %v1970_v27 = vadd.f32 %v6581_v0, %v8703_v35  ;;  %7132 = vrot.lane.b32.xlu0 %v8838_v33, %s10586_s25 }
 0x2ad   : > { %v2108_v29 = vmax.f32 %v2064_v48, 0.0  ;;  %v2067_v59 = vadd.f32 %v8676_v32, %v1970_v27  ;;  %v6582_v30 = vpop.f32.mrb[20].mxu1 }
 0x2ae   : > { %v6583_v51 = vpop.f32.mrb[21].mxu1 }
 0x2af   : > { %2124 = vst.msk [vmem:[#allocation3 + $0x82] sm:$0xff] %vm527_vm5, %v2108_v29  ;;  %v2109_v23 = vmax.f32 %v2067_v59, 0.0  ;;  %v6584_v8 = vadd.f32 %v6583_v51, %v6582_v30  ;;  %v6585_v43 = vpop.f32.mrb[22].mxu1 }
 0x2b0   : > { %v6586_v38 = vpop.f32.mrb[23].mxu1 }
 0x2b1   : > { %2125 = vst.msk [vmem:[#allocation3 + $0x92] sm:$0xff] %vm527_vm5, %v2109_v23  ;;  %v1975_v10 = vadd.f32 %v6584_v8, %v8703_v35  ;;  %v6587_v6 = vadd.f32 %v6586_v38, %v6585_v43 }
 0x2b3   : > { %v2072_v9 = vadd.f32 %v8683_v47, %v1975_v10  ;;  %v1978_v25 = vadd.f32 %v6587_v6, %v8703_v35 }
 0x2b5   : > { %v2110_v20 = vmax.f32 %v2072_v9, 0.0  ;;  %v2075_v32 = vadd.f32 %v8687_v3, %v1978_v25  ;;  %v6588_v57 = vpop.f32.mrb[24].mxu1 }
 0x2b6   : > { %v6589_v11 = vpop.f32.mrb[25].mxu1  ;;  %v8856_v50 = vld [vmem:[#allocation3 + $0x84] sm:$0xff] }
 0x2b7   : > { %2126 = vst.msk [vmem:[#allocation3 + $0xe2] sm:$0xff] %vm527_vm5, %v2110_v20  ;;  %v2111_v45 = vmax.f32 %v2075_v32, 0.0  ;;  %v6590_v17 = vadd.f32 %v6589_v11, %v6588_v57  ;;  %v6591_v39 = vpop.f32.mrb[26].mxu1 }
 0x2b8   : > { %v6592_v36 = vpop.f32.mrb[27].mxu1  ;;  %v8852_v13 = vld [vmem:[#allocation3 + $0x94] sm:$0xff] }
 0x2b9   : > { %2127 = vst.msk [vmem:[#allocation3 + $0xf2] sm:$0xff] %vm527_vm5, %v2111_v45  ;;  %v1983_v49 = vadd.f32 %v6590_v17, %v8703_v35  ;;  %v6593_v47 = vadd.f32 %v6592_v36, %v6591_v39 }
 0x2bb   : > { %v2080_v54 = vadd.f32 %v8681_v19, %v1983_v49  ;;  %v1986_v53 = vadd.f32 %v6593_v47, %v8703_v35 }
 0x2bd   : > { %v2112_v0 = vmax.f32 %v2080_v54, 0.0  ;;  %v2083_v48 = vadd.f32 %v8685_v63, %v1986_v53  ;;  %v6594_v27 = vpop.f32.mrb[28].mxu1 }
 0x2be   : > { %v6595_v29 = vpop.f32.mrb[29].mxu1 }
 0x2bf   : > { %2128 = vst.msk [vmem:[#allocation3 + $0x102] sm:$0xff] %vm527_vm5, %v2112_v0  ;;  %v2113_v59 = vmax.f32 %v2083_v48, 0.0  ;;  %v6596_v30 = vadd.f32 %v6595_v29, %v6594_v27  ;;  %v6597_v51 = vpop.f32.mrb[30].mxu1 }
 0x2c0   : > { %v6598_v23 = vpop.f32.mrb[31].mxu1  ;;  %v8976_v21 = vld [vmem:[#allocation3 + $0xf0] sm:$0xff] }
 0x2c1   : > { %2129 = vst.msk [vmem:[#allocation3 + $0x112] sm:$0xff] %vm527_vm5, %v2113_v59  ;;  %v1991_v8 = vadd.f32 %v6596_v30, %v8703_v35  ;;  %v6599_v43 = vadd.f32 %v6598_v23, %v6597_v51  ;;  %v2134_v51 = vld [vmem:[#allocation3] sm:$0xff] }
 0x2c3   : > { %v2088_v19 = vadd.f32 %v8694_v4, %v1991_v8  ;;  %v1994_v38 = vadd.f32 %v6599_v43, %v8703_v35 }
 0x2c5   : > { %v2114_v10 = vmax.f32 %v2088_v19, 0.0  ;;  %v2091_v63 = vadd.f32 %v8698_v44, %v1994_v38  ;;  %v2135_v44 = vld [vmem:[#allocation3 + $0x10] sm:$0xff] }
 0x2c6   : > { %v2162_v20 = vld [vmem:[#allocation3 + $0x102] sm:$0xff] }
 0x2c7   : > { %v6600_v6 = vpop.f32.mrb[32].mxu1  ;;  %2130 = vst.msk [vmem:[#allocation3 + $0x122] sm:$0xff] %vm527_vm5, %v2114_v10  ;;  %v2115_v9 = vmax.f32 %v2091_v63, 0.0  ;;  %v8870_v45 = vld [vmem:[#allocation3 + $0x104] sm:$0xff] }
 0x2c8   : > { %v6601_v25 = vpop.f32.mrb[33].mxu1  ;;  %v2163_v11 = vld [vmem:[#allocation3 + $0x112] sm:$0xff] }
 0x2c9   : > { %v6602_v32 = vadd.f32 %v6601_v25, %v6600_v6  ;;  %v6603_v57 = vpop.f32.mrb[34].mxu1  ;;  %v8872_v17 = vld [vmem:[#allocation3 + $0x114] sm:$0xff]  ;;  %2131 = vst.msk [vmem:[#allocation3 + $0x132] sm:$0xff] %vm527_vm5, %v2115_v9  ;;  %v8875_v39 = vpack.i.bf16 %v2163_v11, %v2162_v20  ;;  %v8929_v9 = vld [vmem:[%s10548_s9 + $0x80] sm:$0xff]  }
 0x2ca   : > { %v6604_v4 = vpop.f32.mrb[35].mxu1  ;;  %v8886_v53 = vpack.i.bf16 %v8872_v17, %v8870_v45  ;;  %6728 = vmatprep.subr.bf16.mxu1 %v8929_v9 }
 0x2cb   : > { %v1999_v36 = vadd.f32 %v6602_v32, %v8703_v35  ;;  %v6605_v49 = vadd.f32 %v6604_v4, %v6603_v57  ;;  %7137 = vrot.lane.b32.xlu1 %v8875_v39, %s10585_s26  ;;  %v7181_v4 = vpack.i.bf16 %v8821_v40, %v8819_v26 }
 0x2cd   : > { %v2096_v47 = vadd.f32 %v8692_v7, %v1999_v36  ;;  %v2002_v54 = vadd.f32 %v6605_v49, %v8703_v35  ;;  %v2236_v36 = vld [vmem:[#allocation3 + $0x90] sm:$0xff]  ;;  %v2235_v49 = vld [vmem:[#allocation3 + $0x80] sm:$0xff] }
 0x2ce   : > { %v8891_v27 = vld [vmem:[#allocation3 + $0x124] sm:$0xff] }
 0x2cf   : > { %v2116_v0 = vmax.f32 %v2096_v47, 0.0  ;;  %v2099_v48 = vadd.f32 %v8696_v42, %v2002_v54  ;;  %7142 = vrot.lane.b32.xlu1 %v8886_v53, %s10587_s28  ;;  %v8896_v7 = vld [vmem:[#allocation3 + $0x120] sm:$0xff]  ;;  %v8956_v47 = vld [vmem:[#allocation3 + $0x92] sm:$0xff] }
 0x2d0   : > { %v8894_v59 = vld [vmem:[#allocation3 + $0x134] sm:$0xff]  ;;  %v8914_v8 = vld [vmem:[#allocation3 + $0x122] sm:$0xff] }
 0x2d1   : > { %2132 = vst.msk [vmem:[#allocation3 + $0x142] sm:$0xff] %vm527_vm5, %v2116_v0  ;;  %v2117_v29 = vmax.f32 %v2099_v48, 0.0  ;;  %v8898_v35 = vld [vmem:[#allocation3 + $0x130] sm:$0xff]  ;;  %v7146_v30 = vpack.i.bf16 %v8894_v59, %v8891_v27  ;;  %v8959_v54 = vld [vmem:[#allocation3 + $0x82] sm:$0xff] }
 0x2d2   : > { %v8904_v42 = vpack.i.bf16 %v8898_v35, %v8896_v7  ;;  %v8909_v23 = vld [vmem:[#allocation3 + $0x132] sm:$0xff]  ;;  %v7206_v0 = vpack.i.bf16 %v8956_v47, %v8959_v54 }
 0x2d3   : > { %2133 = vst.msk [vmem:[#allocation3 + $0x152] sm:$0xff] %vm527_vm5, %v2117_v29  ;;  %7147 = vrot.lane.b32.xlu0 %v7146_v30, %s10585_s26  ;;  %v8918_v43 = vpack.i.bf16 %v8909_v23, %v8914_v8  ;;  %v2238_v48 = vld [vmem:[#allocation3 + $0xb0] sm:$0xff]  ;;  %v7216_v29 = vpack.i.bf16 %v8852_v13, %v8856_v50 }
 0x2d4   : > { %7152 = vrot.lane.b32.xlu1 %v8904_v42, %s10586_s25 }
 0x2d8   : > { %7157 = vrot.lane.b32.xlu1 %v8918_v43, %s10585_s26  ;;  %v2243_v19 = vld [vmem:[#allocation3 + $0x140] sm:$0xff] }
 0x2d9   : > { %v8922_v10 = vld [vmem:[#allocation3 + $0x144] sm:$0xff] }
 0x2da   : > { %v2244_v38 = vld [vmem:[#allocation3 + $0x150] sm:$0xff]  ;;  %v8938_v32 = vld [vmem:[#allocation3 + $0x142] sm:$0xff] }
 0x2db   : > { %v8924_v63 = vld [vmem:[#allocation3 + $0x154] sm:$0xff]  ;;  %v7166_v6 = vpack.i.bf16 %v2244_v38, %v2243_v19  ;;  %v2253_v38 = vld [vmem:[#allocation3 + $0xa2] sm:$0xff] }
 0x2dc   : > { %7162 = vrot.lane.b32.xlu1 %v7146_v30, %s10587_s28  ;;  %v8934_v20 = vld [vmem:[#allocation3 + $0x152] sm:$0xff]  ;;  %v7176_v11 = vpack.i.bf16 %v8924_v63, %v8922_v10  ;;  %v2158_v30 = vld [vmem:[#allocation3 + $0xc2] sm:$0xff] }
 0x2dd   : > { %7167 = vrot.lane.b32.xlu0 %v7166_v6, %s10587_s28  ;;  %v7171_v57 = vpack.i.bf16 %v8934_v20, %v8938_v32  ;;  %v2159_v19 = vld [vmem:[#allocation3 + $0xd2] sm:$0xff] }
 0x2e0   : > { %7187 = vrot.lane.b32.xlu1 %v8805_v56, %s10585_s26  ;;  %v7191_v56 = vpack.i.bf16 %v2236_v36, %v2235_v49  ;;  %v2175_v36 = vld [vmem:[#allocation3 + $0xd4] sm:$0xff] }
 0x2e1   : > { %7172 = vrot.lane.b32.xlu0 %v7171_v57, %s10586_s25  ;;  %v7251_v57 = vpack.i.bf16 %v2159_v19, %v2158_v30  ;;  %v8986_v19 = vld [vmem:[#allocation3 + $0x100] sm:$0xff] }
 0x2e4   : > { %7197 = vrot.lane.b32.xlu1 %v7166_v6, %s10586_s25  ;;  %v2254_v6 = vld [vmem:[#allocation3 + $0xb2] sm:$0xff] }
 0x2e5   : > { %7177 = vrot.lane.b32.xlu0 %v7176_v11, %s10585_s26  ;;  %v2174_v11 = vld [vmem:[#allocation3 + $0xc4] sm:$0xff] }
 0x2e6   : > { %v7261_v49 = vpack.i.bf16 %v2175_v36, %v2174_v11  ;;  %v8996_v11 = vld [vmem:[#allocation3 + $0xe2] sm:$0xff] }
 0x2e8   : > { %7202 = vrot.lane.b32.xlu1 %v8811_v24, %s10587_s28  ;;  %v2237_v24 = vld [vmem:[#allocation3 + $0xa0] sm:$0xff] }
 0x2e9   : > { %7182 = vrot.lane.b32.xlu0 %v7181_v4, %s10585_s26 }
 0x2ec   : > { %7212 = vrot.lane.b32.xlu1 %v8825_v14, %s10586_s25  ;;  %v7226_v14 = vpack.i.bf16 %v2238_v48, %v2237_v24  ;;  %v8974_v24 = vpop.permute.xlu0 %7077  ;;  %v2222_v48 = vld [vmem:[#allocation3 + $0xe4] sm:$0xff] }
 0x2ed   : > { %7192 = vrot.lane.b32.xlu0 %v7191_v56, %s10587_s28 }
 0x2f0   : > { %7222 = vrot.lane.b32.xlu1 %v8838_v33, %s10585_s26  ;;  %v7236_v33 = vpack.i.bf16 %v2254_v6, %v2253_v38 }
 0x2f1   : > { %7207 = vrot.lane.b32.xlu0 %v7206_v0, %s10586_s25  ;;  %v2223_v0 = vld [vmem:[#allocation3 + $0xf4] sm:$0xff] }
 0x2f4   : > { %7232 = vrot.lane.b32.xlu1 %v7181_v4, %s10587_s28  ;;  %v7068_v4 = vpop.permute.xlu1 %7067 }
 0x2f5   : > { %7217 = vrot.lane.b32.xlu0 %v7216_v29, %s10585_s26  ;;  %v7246_v29 = vpack.i.bf16 %v2223_v0, %v2222_v48  ;;  %v7070_v0 = vunpack.i.h.bf16 %v7068_v4  ;;  %v7069_v48 = vunpack.i.l.bf16 %v7068_v4 }
 0x2f7   : > { %v2664_v41 = vsel %vm527_vm5, %v2135_v44, %v7070_v0 }
 0x2f8   : > { %7242 = vrot.lane.b32.xlu1 %v7191_v56, %s10586_s25  ;;  %v8979_v56 = vld [vmem:[#allocation3 + $0x110] sm:$0xff]  ;;  %v7073_v38 = vpop.permute.xlu1 %7072 }
 0x2f9   : > { %7227 = vrot.lane.b32.xlu0 %v7226_v14, %s10587_s28  ;;  %v8982_v14 = vld [vmem:[#allocation3 + $0xe0] sm:$0xff]  ;;  %v7256_v6 = vpack.i.bf16 %v8979_v56, %v8986_v19  ;;  %v7074_v3 = vunpack.i.l.bf16 %v7073_v38 }
 0x2fa   : > { %10588 = vst [vmem:[#allocation11_spill] sm:$0xff] %v8982_v14  ;;  %v7271_v30 = vpack.i.bf16 %v8976_v21, %v8982_v14 }
 0x2fc   : > { %7252 = vrot.lane.b32.xlu1 %v7251_v57, %s10585_s26  ;;  %v8990_v57 = vld [vmem:[#allocation3 + $0xf2] sm:$0xff] }
 0x2fd   : > { %7237 = vrot.lane.b32.xlu0 %v7236_v33, %s10586_s25  ;;  %v8992_v33 = vpop.permute.xlu0 %7082  ;;  %v7281_v36 = vpack.i.bf16 %v8990_v57, %v8996_v11 }
 0x300   : > { %7262 = vrot.lane.b32.xlu1 %v7261_v49, %s10587_s28  ;;  %v7093_v49 = vpop.permute.xlu1 %7092 }
 0x301   : > { %7247 = vrot.lane.b32.xlu0 %v7246_v29, %s10585_s26  ;;  %v7088_v25 = vpop.permute.xlu0 %7087  ;;  %v7095_v46 = vunpack.i.h.bf16 %v7093_v49  ;;  %v7094_v4 = vunpack.i.l.bf16 %v7093_v49 }
 0x302   : > { %v7090_v1 = vunpack.i.h.bf16 %v7088_v25  ;;  %v7089_v28 = vunpack.i.l.bf16 %v7088_v25 }
 0x304   : > { %7272 = vrot.lane.b32.xlu1 %v7271_v30, %s10586_s25  ;;  %v7075_v30 = vunpack.i.h.bf16 %v7073_v38 }
 0x305   : > { %7257 = vrot.lane.b32.xlu0 %v7256_v6, %s10587_s28 }
 0x306   : > { %v2680_v38 = vsel %vm1627_vm8, %v2664_v41, %v7075_v30 }
 0x308   : > { %7282 = vrot.lane.b32.xlu1 %v7281_v36, %s10585_s26  ;;  %v2663_v36 = vsel %vm527_vm5, %v2134_v51, %v7069_v48  ;;  %v2711_v51 = vsel %vm527_vm5, %v8747_v60, %v7089_v28 }
 0x309   : > { %7267 = vrot.lane.b32.xlu0 %v8875_v39, %s10586_s25  ;;  %v7098_v39 = vpop.permute.xlu1 %7097 }
 0x30a   : > { %v7100_v48 = vunpack.i.h.bf16 %v7098_v39 }
 0x30c   : > { %7292 = vrot.lane.b32.xlu1 %v7246_v29, %s10587_s28  ;;  %v2679_v29 = vsel %vm1627_vm8, %v2663_v36, %v7074_v3 }
 0x30d   : > { %7277 = vrot.lane.b32.xlu0 %v8886_v53, %s10585_s26  ;;  %v7108_v18 = vpop.permute.xlu0 %7107  ;;  %v2712_v53 = vsel %vm527_vm5, %v8739_v61, %v7090_v1  ;;  %v7103_v0 = vpop.permute.xlu1 %7102 }
 0x30e   : > { %v7110_v37 = vunpack.i.h.bf16 %v7108_v18  ;;  %v7109_v14 = vunpack.i.l.bf16 %v7108_v18  ;;  %v2696_v18 = vsel %vm1644_vm9, %v2680_v38, %v7095_v46  ;;  %v7099_v46 = vunpack.i.l.bf16 %v7098_v39 }
 0x30f   : > { %v7105_v36 = vunpack.i.h.bf16 %v7103_v0 }
 0x310   : > { %7302 = vrot.lane.b32.xlu1 %v7256_v6, %s10586_s25  ;;  %v2695_v6 = vsel %vm1644_vm9, %v2679_v29, %v7094_v4  ;;  %v2727_v3 = vsel %vm1627_vm8, %v2711_v51, %v7109_v14  ;;  %v2728_v41 = vsel %vm1627_vm8, %v2712_v53, %v7110_v37  ;;  %v7104_v14 = vunpack.i.l.bf16 %v7103_v0 }
 0x311   : > { %7287 = vrot.lane.b32.xlu0 %v8904_v42, %s10587_s28  ;;  %v7113_v44 = vpop.permute.xlu0 %7112  ;;  %v2759_v60 = vpack.c.bf16 %v2696_v18, %v2695_v6  ;;  %v7123_v30 = vpop.permute.xlu1 %7122  ;;  %v2666_v51 = vsel %vm527_vm5, %v8732_v31, %v7100_v48 }
 0x312   : > { %v7115_v25 = vunpack.i.h.bf16 %v7113_v44  ;;  %v7114_v49 = vunpack.i.l.bf16 %v7113_v44  ;;  %v7125_v38 = vunpack.i.h.bf16 %v7123_v30  ;;  %v7124_v44 = vunpack.i.l.bf16 %v7123_v30 }
 0x313   : > { %v2682_v18 = vsel %vm1627_vm8, %v2666_v51, %v7105_v36 }
 0x314   : > { %v2743_v42 = vsel %vm1644_vm9, %v2727_v3, %v7114_v49  ;;  %v2744_v1 = vsel %vm1644_vm9, %v2728_v41, %v7115_v25  ;;  %v2665_v25 = vsel %vm527_vm5, %v8727_v12, %v7099_v46  ;;  %v2698_v12 = vsel %vm1644_vm9, %v2682_v18, %v7125_v38 }
 0x315   : > { %7297 = vrot.lane.b32.xlu0 %v8918_v43, %s10586_s25  ;;  %v7118_v61 = vpop.permute.xlu0 %7117  ;;  %v2760_v28 = vpack.c.bf16 %v2744_v1, %v2743_v42  ;;  %v2681_v39 = vsel %vm1627_vm8, %v2665_v25, %v7104_v14 }
 0x316   : > { %v7120_v37 = vunpack.i.h.bf16 %v7118_v61  ;;  %v7119_v29 = vunpack.i.l.bf16 %v7118_v61  ;;  %v2697_v1 = vsel %vm1644_vm9, %v2681_v39, %v7124_v44 }
 0x317   : > { %2990 = vmatprep.mubr.bf16.mxu0 %v2760_v28  ;;  %v2762_v48 = vpack.c.bf16 %v2698_v12, %v2697_v1 }
 0x318   : > { %2991 = vmatmul.mubr.bf16.vlgmr.msra.gmra.mrb[20].mxu0 %v2759_v60  ;;  %v2714_v6 = vsel %vm527_vm5, %v8793_v62, %v7120_v37  ;;  %v2713_v3 = vsel %vm527_vm5, %v8800_v34, %v7119_v29 }
 0x319   : > { %v7128_v4 = vpop.permute.xlu0 %7127 }
 0x31a   : > { %v7130_v43 = vunpack.i.h.bf16 %v7128_v4  ;;  %v7129_v53 = vunpack.i.l.bf16 %v7128_v4 }
 0x31c   : > { %v2729_v42 = vsel %vm1627_vm8, %v2713_v3, %v7129_v53  ;;  %v2730_v31 = vsel %vm1627_vm8, %v2714_v6, %v7130_v43 }
 0x31d   : > { %v7133_v49 = vpop.permute.xlu0 %7132 }
 0x31e   : > { %v7135_v41 = vunpack.i.h.bf16 %v7133_v49  ;;  %v7134_v0 = vunpack.i.l.bf16 %v7133_v49 }
 0x320   : > { %v2745_v61 = vsel %vm1644_vm9, %v2729_v42, %v7134_v0  ;;  %v2746_v28 = vsel %vm1644_vm9, %v2730_v31, %v7135_v41 }
 0x321   : > { %v2763_v60 = vpack.c.bf16 %v2746_v28, %v2745_v61 }
 0x323   : > { %2998 = vmatprep.mubr.bf16.mxu0 %v2763_v60 }
 0x324   : > { %2999 = vmatmul.mubr.bf16.gmra.mrb[24].mxu0 %v2762_v48 }
 0x33d   : > { %v7138_v62 = vpop.permute.xlu1 %7137 }
 0x33e   : > { %v7140_v14 = vunpack.i.h.bf16 %v7138_v62  ;;  %v7139_v4 = vunpack.i.l.bf16 %v7138_v62 }
 0x340   : > { %v2676_v18 = vsel %vm527_vm5, %v8979_v56, %v7140_v14  ;;  %v2675_v6 = vsel %vm527_vm5, %v8986_v19, %v7139_v4 }
 0x341   : > { %v7143_v34 = vpop.permute.xlu1 %7142 }
 0x342   : > { %v7145_v29 = vunpack.i.h.bf16 %v7143_v34  ;;  %v7144_v44 = vunpack.i.l.bf16 %v7143_v34 }
 0x344   : > { %v2691_v41 = vsel %vm1627_vm8, %v2675_v6, %v7144_v44  ;;  %v2692_v0 = vsel %vm1627_vm8, %v2676_v18, %v7145_v29 }
 0x345   : > { %v7148_v36 = vpop.permute.xlu0 %7147 }
 0x346   : > { %v7153_v46 = vpop.permute.xlu1 %7152  ;;  %v7150_v43 = vunpack.i.h.bf16 %v7148_v36  ;;  %v7149_v38 = vunpack.i.l.bf16 %v7148_v36 }
 0x347   : > { %v7155_v51 = vunpack.i.h.bf16 %v7153_v46  ;;  %v7154_v25 = vunpack.i.l.bf16 %v7153_v46 }
 0x348   : > { %v2724_v42 = vsel %vm527_vm5, %v8909_v23, %v7150_v43  ;;  %v2723_v31 = vsel %vm527_vm5, %v8914_v8, %v7149_v38  ;;  %v7624_v38 = vld [vmem:[%s10548_s9 + $0x88] sm:$0xff]  }
 0x349   : > { %v2707_v12 = vsel %vm1644_vm9, %v2691_v41, %v7154_v25  ;;  %v2708_v56 = vsel %vm1644_vm9, %v2692_v0, %v7155_v51  ;;  %v7079_v51 = vunpack.i.l.bf16 %v8974_v24 }
 0x34a   : > { %v7158_v30 = vpop.permute.xlu1 %7157  ;;  %v2777_v23 = vpack.c.bf16 %v2708_v56, %v2707_v12 }
 0x34b   : > { %v7160_v46 = vunpack.i.h.bf16 %v7158_v30  ;;  %v7159_v36 = vunpack.i.l.bf16 %v7158_v30  ;;  %v7084_v30 = vunpack.i.l.bf16 %v8992_v33 }
 0x34d   : > { %v2678_v41 = vsel %vm527_vm5, %v8898_v35, %v7160_v46 }
 0x34e   : > { %v7163_v37 = vpop.permute.xlu1 %7162 }
 0x34f   : > { %v7168_v53 = vpop.permute.xlu0 %7167  ;;  %v7165_v4 = vunpack.i.h.bf16 %v7163_v37  ;;  %v7164_v29 = vunpack.i.l.bf16 %v7163_v37 }
 0x350   : > { %v7170_v49 = vunpack.i.h.bf16 %v7168_v53  ;;  %v7169_v39 = vunpack.i.l.bf16 %v7168_v53  ;;  %v7080_v53 = vunpack.i.h.bf16 %v8974_v24  ;;  %v2677_v24 = vsel %vm527_vm5, %v8896_v7, %v7159_v36 }
 0x352   : > { %v9045_v3 = vpop.permute.xlu1 %7187  ;;  %v2739_v19 = vsel %vm1627_vm8, %v2723_v31, %v7169_v39  ;;  %v2740_v60 = vsel %vm1627_vm8, %v2724_v42, %v7170_v49  ;;  %v7085_v39 = vunpack.i.h.bf16 %v8992_v33  ;;  %v2694_v31 = vsel %vm1627_vm8, %v2678_v41, %v7165_v4 }
 0x353   : > { %v7173_v1 = vpop.permute.xlu0 %7172  ;;  %v7189_v56 = vunpack.i.l.bf16 %v9045_v3 }
 0x354   : > { %v7175_v61 = vunpack.i.h.bf16 %v7173_v1  ;;  %v7174_v28 = vunpack.i.l.bf16 %v7173_v1 }
 0x356   : > { %v7198_v48 = vpop.permute.xlu1 %7197  ;;  %v2755_v62 = vsel %vm1644_vm9, %v2739_v19, %v7174_v28  ;;  %v2756_v34 = vsel %vm1644_vm9, %v2740_v60, %v7175_v61 }
 0x357   : > { %v7178_v8 = vpop.permute.xlu0 %7177  ;;  %v2778_v14 = vpack.c.bf16 %v2756_v34, %v2755_v62  ;;  %v7200_v25 = vunpack.i.h.bf16 %v7198_v48  ;;  %v7199_v49 = vunpack.i.l.bf16 %v7198_v48 }
 0x358   : > { %v7180_v44 = vunpack.i.h.bf16 %v7178_v8  ;;  %v7179_v43 = vunpack.i.l.bf16 %v7178_v8 }
 0x359   : > { %3038 = vmatprep.mubr.bf16.mxu1 %v2778_v14  ;;  %v2710_v7 = vsel %vm1644_vm9, %v2694_v31, %v7200_v25 }
 0x35a   : > { %v2726_v37 = vsel %vm527_vm5, %v8934_v20, %v7180_v44  ;;  %v2725_v18 = vsel %vm527_vm5, %v8938_v32, %v7179_v43  ;;  %v7203_v6 = vpop.permute.xlu1 %7202  ;;  %3039 = vmatmul.mubr.bf16.vlgmr.msra.gmra.mrb[36].mxu1 %v2777_v23  ;;  %v2693_v20 = vsel %vm1627_vm8, %v2677_v24, %v7164_v29  ;;  %v10589_v23 = vmov 0.0  }
 0x35b   : > { %6729 = vmatpush3.bf16.msra.mxu1 %v8929_v9  ;;  %v7183_v0 = vpop.permute.xlu0 %7182  ;;  %v2741_v42 = vsel %vm1627_vm8, %v2725_v18, %v7079_v51  ;;  %v2742_v33 = vsel %vm1627_vm8, %v2726_v37, %v7080_v53  ;;  %v2709_v12 = vsel %vm1644_vm9, %v2693_v20, %v7199_v49  ;;  %v7190_v9 = vunpack.i.h.bf16 %v9045_v3  ;;  %661 = vst.msk [vmem:[#allocation4 + $0x60] sm:$0xf] %vm658_vm11, %v10589_v23 }
 0x35c   : > { %v2757_v32 = vsel %vm1644_vm9, %v2741_v42, %v7084_v30  ;;  %v2758_v1 = vsel %vm1644_vm9, %v2742_v33, %v7085_v39  ;;  %6730 = vmatprep.subr.bf16.mxu1 %v7624_v38  ;;  %v7205_v28 = vunpack.i.h.bf16 %v7203_v6  ;;  %v7204_v19 = vunpack.i.l.bf16 %v7203_v6  ;;  %662 = vst.msk [vmem:[#allocation4 + $0x70] sm:$0xf] %vm658_vm11, %v10589_v23  ;;  %659 = vst.msk [vmem:[#allocation4 + $0x40] sm:$0xf] %vm658_vm11, %v10589_v23 }
 0x35d   : > { %v2781_v35 = vpack.c.bf16 %v2758_v1, %v2757_v32  ;;  %v7185_v48 = vunpack.i.h.bf16 %v7183_v0  ;;  %v7184_v62 = vunpack.i.l.bf16 %v7183_v0  ;;  %v2780_v34 = vpack.c.bf16 %v2710_v7, %v2709_v12  ;;  %v2269_v1 = vld [vmem:[#allocation3 + $0xa4] sm:$0xff]  ;;  %660 = vst.msk [vmem:[#allocation4 + $0x50] sm:$0xf] %vm658_vm11, %v10589_v23  ;;  %663 = vst.msk [vmem:[#allocation4 + $0x80] sm:$0xf] %vm658_vm11, %v10589_v23 }
 0x35e   : > { %v7213_v61 = vpop.permute.xlu1 %7212  ;;  %v2668_v4 = vsel %vm527_vm5, %v8784_v52, %v7190_v9  ;;  %v2667_v3 = vsel %vm527_vm5, %v8782_v16, %v7189_v56  ;;  %v10590_v53 = vpack.c.bf16 %v8786_v22, %v8791_v55  ;;  %v10591_v42 = vpack.c.bf16 %v8821_v40, %v8819_v26  ;;  %664 = vst.msk [vmem:[#allocation4 + $0x90] sm:$0xf] %vm658_vm11, %v10589_v23 }
 0x35f   : > { %v7193_v60 = vpop.permute.xlu0 %7192  ;;  %3046 = vmatprep.mubr.bf16.mxu1 %v2781_v35  ;;  %6731 = vmatpush3.bf16.msra.mxu1 %v7624_v38  ;;  %v7215_v46 = vunpack.i.h.bf16 %v7213_v61  ;;  %v7214_v36 = vunpack.i.l.bf16 %v7213_v61  ;;  %v2683_v44 = vsel %vm1627_vm8, %v2667_v3, %v7204_v19  ;;  %v2684_v43 = vsel %vm1627_vm8, %v2668_v4, %v7205_v28  ;;  %v2270_v35 = vld [vmem:[#allocation3 + $0xb4] sm:$0xff]  ;;  %665 = vst.msk [vmem:[#allocation4 + $0xa0] sm:$0xf] %vm658_vm11, %v10589_v23 }
 0x360   : > { %6748 = vmatprep.subr.mxu1 %v10589_v23  ;;  %v7195_v8 = vunpack.i.h.bf16 %v7193_v60  ;;  %v7194_v14 = vunpack.i.l.bf16 %v7193_v60  ;;  %v2716_v51 = vsel %vm527_vm5, %v8829_v5, %v7185_v48  ;;  %v2715_v52 = vsel %vm527_vm5, %v8833_v58, %v7184_v62  ;;  %666 = vst.msk [vmem:[#allocation4 + $0xb0] sm:$0xf] %vm658_vm11, %v10589_v23  ;;  %667 = vst.msk [vmem:[#allocation4 + $0x140] sm:$0xf] %vm658_vm11, %v10589_v23 }
 0x361   : > { %v2699_v30 = vsel %vm1644_vm9, %v2683_v44, %v7214_v36  ;;  %v2700_v37 = vsel %vm1644_vm9, %v2684_v43, %v7215_v46  ;;  %v10592_v32 = vpack.c.bf16 %v8852_v13, %v8856_v50  ;;  %v2770_v60 = vpack.c.bf16 %v2270_v35, %v2269_v1  ;;  %668 = vst.msk [vmem:[#allocation4 + $0x150] sm:$0xf] %vm658_vm11, %v10589_v23 }
 0x362   : > { %v7223_v29 = vpop.permute.xlu1 %7222  ;;  %3047 = vmatmul.mubr.bf16.gmra.mrb[40].mxu1 %v2780_v34  ;;  %v2731_v49 = vsel %vm1627_vm8, %v2715_v52, %v7194_v14  ;;  %v2732_v39 = vsel %vm1627_vm8, %v2716_v51, %v7195_v8  ;;  %v2765_v41 = vpack.c.bf16 %v2700_v37, %v2699_v30  ;;  %v10593_v43 = vpack.c.bf16 %v8872_v17, %v8870_v45  ;;  %v2143_v51 = vld [vmem:[#allocation3 + $0xd0] sm:$0xff] }
 0x363   : > { %v7208_v38 = vpop.permute.xlu0 %7207  ;;  %6732 = vmatprep.mubr.msk.bf16.mxu1 %vm527_vm5, %v10590_v53  ;;  %v7225_v58 = vunpack.i.h.bf16 %v7223_v29  ;;  %v7224_v24 = vunpack.i.l.bf16 %v7223_v29  ;;  %v2142_v53 = vld [vmem:[#allocation3 + $0xc0] sm:$0xff]  ;;  %669 = vst.msk [vmem:[#allocation4 + $0x160] sm:$0xf] %vm658_vm11, %v10589_v23  ;;  %670 = vst.msk [vmem:[#allocation4 + $0x170] sm:$0xf] %vm658_vm11, %v10589_v23 }
 0x364   : > { %v7210_v25 = vunpack.i.h.bf16 %v7208_v38  ;;  %v7209_v16 = vunpack.i.l.bf16 %v7208_v38  ;;  %671 = vst.msk [vmem:[#allocation4 + $0x180] sm:$0xf] %vm658_vm11, %v10589_v23  ;;  %672 = vst.msk [vmem:[#allocation4 + $0x190] sm:$0xf] %vm658_vm11, %v10589_v23 }
 0x365   : > { %v2670_v26 = vsel %vm527_vm5, %v8817_v15, %v7225_v58  ;;  %v2669_v40 = vsel %vm527_vm5, %v8815_v2, %v7224_v24  ;;  %v10594_v24 = vpack.c.bf16 %v8894_v59, %v8891_v27  ;;  %673 = vst.msk [vmem:[#allocation4 + $0x1a0] sm:$0xf] %vm658_vm11, %v10589_v23  ;;  %674 = vst.msk [vmem:[#allocation4 + $0x1b0] sm:$0xf] %vm658_vm11, %v10589_v23 }
 0x366   : > { %v7233_v18 = vpop.permute.xlu1 %7232  ;;  %v2747_v22 = vsel %vm1644_vm9, %v2731_v49, %v7209_v16  ;;  %v2748_v55 = vsel %vm1644_vm9, %v2732_v39, %v7210_v25  ;;  %675 = vst.msk [vmem:[#allocation4 + $0x4c] sm:$0xf] %vm658_vm11, %v10589_v23  ;;  %676 = vst.msk [vmem:[#allocation4 + $0x5c] sm:$0xf] %vm658_vm11, %v10589_v23 }
 0x367   : > { %v7218_v6 = vpop.permute.xlu0 %7217  ;;  %v2766_v5 = vpack.c.bf16 %v2748_v55, %v2747_v22  ;;  %v7235_v33 = vunpack.i.h.bf16 %v7233_v18  ;;  %v7234_v20 = vunpack.i.l.bf16 %v7233_v18  ;;  %677 = vst.msk [vmem:[#allocation4 + $0x6c] sm:$0xf] %vm658_vm11, %v10589_v23  ;;  %678 = vst.msk [vmem:[#allocation4 + $0x7c] sm:$0xf] %vm658_vm11, %v10589_v23 }
 0x368   : > { %v7220_v12 = vunpack.i.h.bf16 %v7218_v6  ;;  %v7219_v7 = vunpack.i.l.bf16 %v7218_v6  ;;  %679 = vst.msk [vmem:[#allocation4 + $0x8c] sm:$0xf] %vm658_vm11, %v10589_v23  ;;  %680 = vst.msk [vmem:[#allocation4 + $0x9c] sm:$0xf] %vm658_vm11, %v10589_v23 }
 0x369   : > { %3006 = vmatprep.mubr.bf16.mxu0 %v2766_v5  ;;  %v2685_v13 = vsel %vm1627_vm8, %v2669_v40, %v7234_v20  ;;  %v2686_v50 = vsel %vm1627_vm8, %v2670_v26, %v7235_v33  ;;  %v2277_v33 = vld [vmem:[#allocation3 + $0x164] sm:$0xff]  ;;  %v2278_v20 = vld [vmem:[#allocation3 + $0x174] sm:$0xff]  ;;  %681 = vst.msk [vmem:[#allocation4 + $0xac] sm:$0xf] %vm658_vm11, %v10589_v23  ;;  %682 = vst.msk [vmem:[#allocation4 + $0xbc] sm:$0xf] %vm658_vm11, %v10589_v23 }
 0x36a   : > { %v7243_v0 = vpop.permute.xlu1 %7242  ;;  %3007 = vmatmul.mubr.bf16.gmra.mrb[28].mxu0 %v2765_v41  ;;  %6733 = vmatmul.mubr.msk.bf16.vlgmr.msra.gmra.mrb[44].mxu1 %vm527_vm5, %v10591_v42  ;;  %v2718_v62 = vsel %vm527_vm5, %v8956_v47, %v7220_v12  ;;  %v2717_v34 = vsel %vm527_vm5, %v8959_v54, %v7219_v7  ;;  %v10595_v42 = vpack.c.bf16 %v8924_v63, %v8922_v10 }
 0x36b   : > { %v7228_v31 = vpop.permute.xlu0 %7227  ;;  %6736 = vmatprep.mubr.msk.bf16.mxu1 %vm527_vm5, %v10592_v32  ;;  %v7245_v9 = vunpack.i.h.bf16 %v7243_v0  ;;  %v7244_v56 = vunpack.i.l.bf16 %v7243_v0  ;;  %683 = vst.msk [vmem:[#allocation4 + $0x14c] sm:$0xf] %vm658_vm11, %v10589_v23  ;;  %684 = vst.msk [vmem:[#allocation4 + $0x15c] sm:$0xf] %vm658_vm11, %v10589_v23 }
 0x36c   : > { %v7230_v61 = vunpack.i.h.bf16 %v7228_v31  ;;  %v7229_v28 = vunpack.i.l.bf16 %v7228_v31  ;;  %685 = vst.msk [vmem:[#allocation4 + $0x16c] sm:$0xf] %vm658_vm11, %v10589_v23  ;;  %686 = vst.msk [vmem:[#allocation4 + $0x17c] sm:$0xf] %vm658_vm11, %v10589_v23 }
 0x36d   : > { %v2701_v2 = vsel %vm1644_vm9, %v2685_v13, %v7244_v56  ;;  %v2702_v14 = vsel %vm1644_vm9, %v2686_v50, %v7245_v9  ;;  %v2782_v56 = vpack.c.bf16 %v2278_v20, %v2277_v33  ;;  %v3287_v33 = vld [vmem:[#allocation4 + $0xe0] sm:$0xff]  ;;  %687 = vst.msk [vmem:[#allocation4 + $0x18c] sm:$0xf] %vm658_vm11, %v10589_v23  ;;  %688 = vst.msk [vmem:[#allocation4 + $0x19c] sm:$0xf] %vm658_vm11, %v10589_v23 }
 0x36e   : > { %v7253_v19 = vpop.permute.xlu1 %7252  ;;  %v2733_v15 = vsel %vm1627_vm8, %v2717_v34, %v7229_v28  ;;  %v2734_v8 = vsel %vm1627_vm8, %v2718_v62, %v7230_v61  ;;  %v2768_v52 = vpack.c.bf16 %v2702_v14, %v2701_v2  ;;  %689 = vst.msk [vmem:[#allocation4 + $0x1ac] sm:$0xf] %vm658_vm11, %v10589_v23  ;;  %690 = vst.msk [vmem:[#allocation4 + $0x1bc] sm:$0xf] %vm658_vm11, %v10589_v23  ;;  %vm6097_vm11 = vcmask 1043459  }
 0x36f   : > { %v7238_v48 = vpop.permute.xlu0 %7237  ;;  %v7255_v29 = vunpack.i.h.bf16 %v7253_v19  ;;  %v7254_v44 = vunpack.i.l.bf16 %v7253_v19 }
 0x370   : > { %v7240_v46 = vunpack.i.h.bf16 %v7238_v48  ;;  %v7239_v36 = vunpack.i.l.bf16 %v7238_v48 }
 0x371   : > { %v2672_v39 = vsel %vm527_vm5, %v2143_v51, %v7255_v29  ;;  %v2671_v30 = vsel %vm527_vm5, %v2142_v53, %v7254_v44 }
 0x372   : > { %v7263_v4 = vpop.permute.xlu1 %7262  ;;  %6737 = vmatmul.mubr.msk.bf16.gmra.mrb[48].mxu1 %vm527_vm5, %v2770_v60  ;;  %v2749_v3 = vsel %vm1644_vm9, %v2733_v15, %v7239_v36  ;;  %v2750_v47 = vsel %vm1644_vm9, %v2734_v8, %v7240_v46  ;;  %v10596_v8 = vld [vmem:[#allocation11_spill] sm:$0xff] }
 0x373   : > { %v7248_v54 = vpop.permute.xlu0 %7247  ;;  %6740 = vmatprep.mubr.msk.bf16.mxu1 %vm527_vm5, %v10593_v43  ;;  %v2769_v38 = vpack.c.bf16 %v2750_v47, %v2749_v3  ;;  %v7265_v25 = vunpack.i.h.bf16 %v7263_v4  ;;  %v7264_v16 = vunpack.i.l.bf16 %v7263_v4  ;;  %v2208_v3 = vld [vmem:[#allocation3 + $0x102] sm:$0xff]  ;;  %v2209_v47 = vld [vmem:[#allocation3 + $0x112] sm:$0xff] }
 0x374   : > { %v7250_v18 = vunpack.i.h.bf16 %v7248_v54  ;;  %v7249_v22 = vunpack.i.l.bf16 %v7248_v54 }
 0x375   : > { %3014 = vmatprep.mubr.bf16.mxu0 %v2769_v38  ;;  %v2687_v5 = vsel %vm1627_vm8, %v2671_v30, %v7264_v16  ;;  %v2688_v41 = vsel %vm1627_vm8, %v2672_v39, %v7265_v25  ;;  %v3200_v30 = vld [vmem:[#allocation4 + $0x4] sm:$0xff] }
 0x376   : > { %v7273_v49 = vpop.permute.xlu1 %7272  ;;  %3015 = vmatmul.mubr.bf16.gmra.mrb[32].mxu0 %v2768_v52  ;;  %v2720_v31 = vsel %vm527_vm5, %v8990_v57, %v7250_v18  ;;  %v2719_v32 = vsel %vm527_vm5, %v8996_v11, %v7249_v22  ;;  %v3216_v18 = vld [vmem:[#allocation4 + $0x8] sm:$0xff] }
 0x377   : > { %v7258_v37 = vpop.permute.xlu0 %7257  ;;  %v7275_v55 = vunpack.i.h.bf16 %v7273_v49  ;;  %v7274_v45 = vunpack.i.l.bf16 %v7273_v49 }
 0x378   : > { %v7260_v17 = vunpack.i.h.bf16 %v7258_v37  ;;  %v7259_v6 = vunpack.i.l.bf16 %v7258_v37  ;;  %v3201_v37 = vld [vmem:[#allocation4 + $0x14] sm:$0xff] }
 0x379   : > { %v2703_v12 = vsel %vm1644_vm9, %v2687_v5, %v7274_v45  ;;  %v2704_v10 = vsel %vm1644_vm9, %v2688_v41, %v7275_v55  ;;  %v7306_v22 = vpack.i.bf16 %v3201_v37, %v3200_v30  ;;  %v3217_v55 = vld [vmem:[#allocation4 + $0x18] sm:$0xff]  ;;  %v3202_v41 = vld [vmem:[#allocation4 + $0x24] sm:$0xff] }
 0x37a   : > { %v7283_v58 = vpop.permute.xlu1 %7282  ;;  %6741 = vmatmul.mubr.msk.bf16.gmra.mrb[52].mxu1 %vm527_vm5, %v10594_v24  ;;  %v2735_v27 = vsel %vm1627_vm8, %v2719_v32, %v7259_v6  ;;  %v2736_v59 = vsel %vm1627_vm8, %v2720_v31, %v7260_v17  ;;  %v2771_v28 = vpack.c.bf16 %v2704_v10, %v2703_v12  ;;  %v7311_v45 = vpack.i.bf16 %v3217_v55, %v3216_v18  ;;  %v3218_v17 = vld [vmem:[#allocation4 + $0x28] sm:$0xff]  ;;  %v3219_v6 = vld [vmem:[#allocation4 + $0x38] sm:$0xff]  ;;  %v3288_v31 = vld [vmem:[#allocation4 + $0xf0] sm:$0xff] }
 0x37b   : > { %v7268_v0 = vpop.permute.xlu0 %7267  ;;  %6744 = vmatprep.mubr.msk.bf16.mxu1 %vm527_vm5, %v10595_v42  ;;  %v7285_v11 = vunpack.i.h.bf16 %v7283_v58  ;;  %v7284_v26 = vunpack.i.l.bf16 %v7283_v58  ;;  %7307 = vrot.lane.b32.xlu0 %v7306_v22, %s7740_s27  ;;  %v7321_v5 = vpack.i.bf16 %v3219_v6, %v3218_v17  ;;  %v3203_v58 = vld [vmem:[#allocation4 + $0x34] sm:$0xff]  ;;  %v3285_v32 = vld [vmem:[#allocation4 + $0xc0] sm:$0xff] }
 0x37c   : > { %v7270_v1 = vunpack.i.h.bf16 %v7268_v0  ;;  %v7269_v35 = vunpack.i.l.bf16 %v7268_v0  ;;  %7312 = vrot.lane.b32.xlu1 %v7311_v45, %s10585_s26  ;;  %v7316_v24 = vpack.i.bf16 %v3203_v58, %v3202_v41  ;;  %v3301_v0 = vld [vmem:[#allocation4 + $0xc4] sm:$0xff]  ;;  %v3302_v42 = vld [vmem:[#allocation4 + $0xd4] sm:$0xff] }
 0x37d   : > { %v2674_v15 = vsel %vm527_vm5, %v8976_v21, %v7285_v11  ;;  %v2673_v2 = vsel %vm527_vm5, %v10596_v8, %v7284_v26  ;;  %v7331_v20 = vpack.i.bf16 %v3302_v42, %v3301_v0  ;;  %v3209_v12 = vld [vmem:[#allocation4 + $0x114] sm:$0xff]  ;;  %v3303_v10 = vld [vmem:[#allocation4 + $0xe4] sm:$0xff] }
 0x37e   : > { %v7293_v63 = vpop.permute.xlu1 %7292  ;;  %v2751_v7 = vsel %vm1644_vm9, %v2735_v27, %v7269_v35  ;;  %v2752_v9 = vsel %vm1644_vm9, %v2736_v59, %v7270_v1  ;;  %v3286_v1 = vld [vmem:[#allocation4 + $0xd0] sm:$0xff]  ;;  %v7336_v27 = vpack.i.bf16 %v3288_v31, %v3287_v33  ;;  %v3208_v59 = vld [vmem:[#allocation4 + $0x104] sm:$0xff] }
 0x37f   : > { %v7278_v57 = vpop.permute.xlu0 %7277  ;;  %v2772_v61 = vpack.c.bf16 %v2752_v9, %v2751_v7  ;;  %v7295_v19 = vunpack.i.h.bf16 %v7293_v63  ;;  %v7294_v60 = vunpack.i.l.bf16 %v7293_v63  ;;  %7322 = vrot.lane.b32.xlu0 %v7321_v5, %s10585_s26  ;;  %v7326_v35 = vpack.i.bf16 %v3286_v1, %v3285_v32  ;;  %v3304_v7 = vld [vmem:[#allocation4 + $0xf4] sm:$0xff] }
 0x380   : > { %v7280_v50 = vunpack.i.h.bf16 %v7278_v57  ;;  %v7279_v48 = vunpack.i.l.bf16 %v7278_v57  ;;  %7317 = vrot.lane.b32.xlu1 %v7316_v24, %s7740_s27  ;;  %v7346_v63 = vpack.i.bf16 %v3209_v12, %v3208_v59  ;;  %v7341_v9 = vpack.i.bf16 %v3304_v7, %v3303_v10 }
 0x381   : > { %3022 = vmatprep.mubr.bf16.mxu0 %v2772_v61  ;;  %v2689_v14 = vsel %vm1627_vm8, %v2673_v2, %v7294_v60  ;;  %v2690_v4 = vsel %vm1627_vm8, %v2674_v15, %v7295_v19 }
 0x382   : > { %v7303_v40 = vpop.permute.xlu1 %7302  ;;  %3023 = vmatmul.mubr.bf16.gmra.mrb[36].mxu0 %v2771_v28  ;;  %6745 = vmatmul.mubr.msk.bf16.gmra.mrb[56].mxu1 %vm527_vm5, %v2782_v56  ;;  %v2722_v44 = vsel %vm527_vm5, %v2209_v47, %v7280_v50  ;;  %v2721_v54 = vsel %vm527_vm5, %v2208_v3, %v7279_v48 }
 0x383   : > { %v7288_v13 = vpop.permute.xlu0 %7287  ;;  %6750 = vmatprep.mubr.msk.f32.mxu1 %vm7735_vm0, %v10589_v23  ;;  %v7305_v62 = vunpack.i.h.bf16 %v7303_v40  ;;  %v7304_v34 = vunpack.i.l.bf16 %v7303_v40  ;;  %7332 = vrot.lane.b32.xlu0 %v7331_v20, %s10570_s5 }
 0x384   : > { %v7290_v46 = vunpack.i.h.bf16 %v7288_v13  ;;  %v7289_v36 = vunpack.i.l.bf16 %v7288_v13  ;;  %7327 = vrot.lane.b32.xlu1 %v7326_v35, %s10586_s25 }
 0x385   : > { %v2705_v51 = vsel %vm1644_vm9, %v2689_v14, %v7304_v34  ;;  %v2706_v52 = vsel %vm1644_vm9, %v2690_v4, %v7305_v62  ;;  %v7742_v62 = vmov 0   ;;  %v7625_v34 = vld [vmem:[%s10550_s11] sm:$0xff]  }
 0x386   : > { %v2737_v53 = vsel %vm1627_vm8, %v2721_v54, %v7289_v36  ;;  %v2738_v21 = vsel %vm1627_vm8, %v2722_v44, %v7290_v46  ;;  %v2774_v39 = vpack.c.bf16 %v2706_v52, %v2705_v51  ;;  %4011 = vmatprep.subr.bf16.mxu0 %v7742_v62  ;;  %v7626_v36 = vld [vmem:[%s10550_s11 + $0x8] sm:$0xff]  }
 0x387   : > { %v7298_v29 = vpop.permute.xlu0 %7297  ;;  %7337 = vrot.lane.b32.xlu0 %v7336_v27, %s10586_s25  ;;  %4012 = vmatpush1.bf16.msra.mxu0 %v7625_v34  ;;  %v7627_v27 = vld [vmem:[%s10550_s11 + $0x10] sm:$0xff]  }
 0x388   : > { %v7300_v43 = vunpack.i.h.bf16 %v7298_v29  ;;  %v7299_v38 = vunpack.i.l.bf16 %v7298_v29  ;;  %7342 = vrot.lane.b32.xlu1 %v7341_v9, %s10570_s5  ;;  %4013 = vmatprep.subr.bf16.mxu0 %v7742_v62  ;;  %s10597_s5 = smov 112  }
 0x38a   : > { %v2753_v25 = vsel %vm1644_vm9, %v2737_v53, %v7299_v38  ;;  %v2754_v16 = vsel %vm1644_vm9, %v2738_v21, %v7300_v43  ;;  %v9267_v38 = vld [vmem:[%s10549_s10] ss:$0 sm:$0xff] }
 0x38b   : > { %v2775_v49 = vpack.c.bf16 %v2754_v16, %v2753_v25  ;;  %7347 = vrot.lane.b32.xlu0 %v7346_v63, %s7740_s27  ;;  %4014 = vmatpush1.bf16.msra.mxu0 %v7626_v36 }
 0x38c   : > { %4015 = vmatprep.subr.bf16.mxu0 %v7742_v62 }
 0x38d   : > { %3030 = vmatprep.mubr.bf16.mxu0 %v2775_v49 }
 0x38e   : > { %3031 = vmatmul.mubr.bf16.gmra.mrb[40].mxu0 %v2774_v39 }
 0x38f   : > { %4016 = vmatpush1.bf16.msra.mxu0 %v7627_v27 }
 0x390   : > { %4017 = vmatprep.subr.bf16.mxu0 %v7742_v62 }
 0x3eb   : > { %v6632_v56 = vpop.f32.mrb[20].mxu0 }
 0x3ec   : > { %v6633_v57 = vpop.f32.mrb[21].mxu0 }
 0x3ed   : > { %v6634_v61 = vadd.f32 %v6633_v57, %v6632_v56  ;;  %v6635_v28 = vpop.f32.mrb[22].mxu0 }
 0x3ee   : > { %v6636_v11 = vpop.f32.mrb[23].mxu0 }
 0x3ef   : > { %v6637_v26 = vadd.f32 %v6636_v11, %v6635_v28  ;;  %v2993_v52 = vadd.f32 %v6634_v61, %v9267_v38 }
 0x3f1   : > { %v2996_v55 = vadd.f32 %v6637_v26, %v9267_v38 }
 0x3f7   : > { %v6638_v40 = vpop.f32.mrb[24].mxu0 }
 0x3f8   : > { %v6639_v19 = vpop.f32.mrb[25].mxu0 }
 0x3f9   : > { %v6640_v60 = vadd.f32 %v6639_v19, %v6638_v40  ;;  %v6641_v13 = vpop.f32.mrb[26].mxu0 }
 0x3fa   : > { %v6642_v50 = vpop.f32.mrb[27].mxu0 }
 0x3fb   : > { %v6643_v48 = vadd.f32 %v6642_v50, %v6641_v13  ;;  %v3001_v53 = vadd.f32 %v6640_v60, %v9267_v38 }
 0x3fd   : > { %v3004_v39 = vadd.f32 %v6643_v48, %v9267_v38 }
 0x42d   : > { %v6668_v46 = vpop.f32.mrb[36].mxu1 }
 0x42e   : > { %v6669_v15 = vpop.f32.mrb[37].mxu1 }
 0x42f   : > { %v9255_v8 = vadd.f32 %v6669_v15, %v6668_v46  ;;  %v6671_v2 = vpop.f32.mrb[38].mxu1  ;;  %v7628_v46 = vld [vmem:[%s10550_s11 + $0x18] sm:$0xff]  }
 0x430   : > { %v6672_v14 = vpop.f32.mrb[39].mxu1  ;;  %4018 = vmatpush1.bf16.msra.mxu0 %v7628_v46 }
 0x431   : > { %v9257_v4 = vadd.f32 %v6672_v14, %v6671_v2  ;;  %4019 = vmatprep.subr.bf16.mxu0 %v7742_v62 }
 0x435   : > { %v6674_v3 = vpop.f32.mrb[40].mxu1 }
 0x436   : > { %v6675_v47 = vpop.f32.mrb[41].mxu1 }
 0x437   : > { %v9260_v29 = vadd.f32 %v6675_v47, %v6674_v3  ;;  %v6677_v44 = vpop.f32.mrb[42].mxu1  ;;  %v7629_v47 = vld [vmem:[%s10550_s11 + $0x20] sm:$0xff]  }
 0x438   : > { %v6678_v54 = vpop.f32.mrb[43].mxu1  ;;  %4020 = vmatpush1.bf16.msra.mxu0 %v7629_v47 }
 0x439   : > { %v9262_v43 = vadd.f32 %v6678_v54, %v6677_v44  ;;  %4021 = vmatprep.subr.bf16.mxu0 %v7742_v62 }
 0x43d   : > { %v6644_v21 = vpop.f32.mrb[28].mxu0  ;;  %v6734_v51 = vpop.f32.mrb[44].mxu1 }
 0x43e   : > { %v3098_v25 = vadd.f32 %v6734_v51, %v3001_v53  ;;  %v6645_v16 = vpop.f32.mrb[29].mxu0  ;;  %v3089_v49 = vpop.f32.mrb[45].mxu1 }
 0x43f   : > { %v6646_v30 = vadd.f32 %v6645_v16, %v6644_v21  ;;  %v3090_v37 = vadd.f32 %v3089_v49, %v2993_v52  ;;  %v6647_v18 = vpop.f32.mrb[30].mxu0  ;;  %v6735_v22 = vpop.f32.mrb[46].mxu1  ;;  %v3049_v16 = vadd.f32 %v9260_v29, %v9267_v38 }
 0x440   : > { %v3154_v45 = vmax.f32 %v3098_v25, 0.0  ;;  %v3101_v17 = vadd.f32 %v6735_v22, %v3004_v39  ;;  %v6648_v6 = vpop.f32.mrb[31].mxu0  ;;  %v3092_v5 = vpop.f32.mrb[47].mxu1  ;;  %v3041_v22 = vadd.f32 %v9255_v8, %v9267_v38  ;;  %v3044_v8 = vadd.f32 %v9257_v4, %v9267_v38 }
 0x441   : > { %v3152_v41 = vmax.f32 %v3090_v37, 0.0  ;;  %v6649_v58 = vadd.f32 %v6648_v6, %v6647_v18  ;;  %v3093_v24 = vadd.f32 %v3092_v5, %v2996_v55  ;;  %v3009_v20 = vadd.f32 %v6646_v30, %v9267_v38 }
 0x442   : > { %3170 = vst.msk [vmem:[#allocation4 + $0x64] sm:$0xff] %vm623_vm2, %v3154_v45  ;;  %v3155_v0 = vmax.f32 %v3101_v17, 0.0 }
 0x443   : > { %3168 = vst.msk [vmem:[#allocation4 + $0x44] sm:$0xff] %vm623_vm2, %v3152_v41  ;;  %v3153_v42 = vmax.f32 %v3093_v24, 0.0  ;;  %v3012_v35 = vadd.f32 %v6649_v58, %v9267_v38  ;;  %v3052_v41 = vadd.f32 %v9262_v43, %v9267_v38 }
 0x444   : > { %3171 = vst.msk [vmem:[#allocation4 + $0x74] sm:$0xff] %vm623_vm2, %v3155_v0 }
 0x445   : > { %3169 = vst.msk [vmem:[#allocation4 + $0x54] sm:$0xff] %vm623_vm2, %v3153_v42  ;;  %v6738_v33 = vpop.f32.mrb[48].mxu1 }
 0x446   : > { %v3105_v31 = vpop.f32.mrb[49].mxu1 }
 0x447   : > { %v3106_v32 = vadd.f32 %v3105_v31, %v3009_v20  ;;  %v6739_v1 = vpop.f32.mrb[50].mxu1  ;;  %v7630_v31 = vld [vmem:[%s10550_s11 + $0x28] sm:$0xff]  }
 0x448   : > { %v3108_v59 = vpop.f32.mrb[51].mxu1  ;;  %4022 = vmatpush1.bf16.msra.mxu0 %v7630_v31 }
 0x449   : > { %v3156_v12 = vmax.f32 %v3106_v32, 0.0  ;;  %v3109_v10 = vadd.f32 %v3108_v59, %v3012_v35  ;;  %v6650_v63 = vpop.f32.mrb[32].mxu0  ;;  %v3250_v9 = vld [vmem:[#allocation4 + $0x64] sm:$0xff]  ;;  %4023 = vmatprep.subr.bf16.mxu0 %v7742_v62 }
 0x44a   : > { %v6651_v7 = vpop.f32.mrb[33].mxu0  ;;  %v9284_v11 = vld [vmem:[#allocation4 + $0x60] sm:$0xff]  ;;  %v3266_v3 = vld [vmem:[#allocation4 + $0x68] sm:$0xff] }
 0x44b   : > { %3172 = vst.msk [vmem:[#allocation4 + $0x84] sm:$0xff] %vm623_vm2, %v3156_v12  ;;  %v3157_v56 = vmax.f32 %v3109_v10, 0.0  ;;  %v6652_v57 = vadd.f32 %v6651_v7, %v6650_v63  ;;  %v6653_v61 = vpop.f32.mrb[34].mxu0  ;;  %v3251_v28 = vld [vmem:[#allocation4 + $0x74] sm:$0xff]  ;;  %v9315_v25 = vld [vmem:[#allocation4 + $0x40] sm:$0xff] }
 0x44c   : > { %v9286_v26 = vld [vmem:[#allocation4 + $0x70] sm:$0xff]  ;;  %v6654_v40 = vpop.f32.mrb[35].mxu0  ;;  %v7356_v19 = vpack.i.bf16 %v3251_v28, %v3250_v9  ;;  %v3267_v34 = vld [vmem:[#allocation4 + $0x78] sm:$0xff]  ;;  %v3248_v20 = vld [vmem:[#allocation4 + $0x44] sm:$0xff] }
 0x44d   : > { %v7351_v60 = vpack.i.bf16 %v9286_v26, %v9284_v11  ;;  %3173 = vst.msk [vmem:[#allocation4 + $0x94] sm:$0xff] %vm623_vm2, %v3157_v56  ;;  %v3017_v13 = vadd.f32 %v6652_v57, %v9267_v38  ;;  %v6655_v50 = vadd.f32 %v6654_v40, %v6653_v61  ;;  %v9292_v48 = vpop.f32.mrb[52].mxu1  ;;  %v7361_v54 = vpack.i.bf16 %v3267_v34, %v3266_v3  ;;  %v9310_v51 = vld [vmem:[#allocation4 + $0x50] sm:$0xff]  ;;  %v3265_v29 = vld [vmem:[#allocation4 + $0x58] sm:$0xff] }
 0x44e   : > { %v9297_v36 = vpop.f32.mrb[53].mxu1  ;;  %7357 = vrot.lane.b32.xlu0 %v7356_v19, %s10587_s28  ;;  %v7376_v49 = vpack.i.bf16 %v9310_v51, %v9315_v25  ;;  %v3249_v45 = vld [vmem:[#allocation4 + $0x54] sm:$0xff] }
 0x44f   : > { %7352 = vrot.lane.b32.xlu1 %v7351_v60, %s7743_s3  ;;  %v3114_v15 = vadd.f32 %v6738_v33, %v3017_v13  ;;  %v3020_v2 = vadd.f32 %v6655_v50, %v9267_v38  ;;  %v9302_v14 = vpop.f32.mrb[54].mxu1  ;;  %v3264_v33 = vld [vmem:[#allocation4 + $0x48] sm:$0xff]  ;;  %v7381_v59 = vpack.i.bf16 %v3249_v45, %v3248_v20  ;;  %v7631_v61 = vld [vmem:[%s10550_s11 + $0x30] sm:$0xff]  }
 0x450   : > { %v9307_v44 = vpop.f32.mrb[55].mxu1  ;;  %v7386_v43 = vpack.i.bf16 %v3265_v29, %v3264_v33  ;;  %4024 = vmatpush1.bf16.msra.mxu0 %v7631_v61  ;;  %v3224_v20 = vld [vmem:[#allocation4 + $0x108] sm:$0xff] }
 0x451   : > { %v3158_v53 = vmax.f32 %v3114_v15, 0.0  ;;  %v3117_v21 = vadd.f32 %v6739_v1, %v3020_v2  ;;  %4025 = vmatprep.subr.bf16.mxu0 %v7742_v62  ;;  %v7632_v2 = vld [vmem:[%s10550_s11 + $0x38] sm:$0xff]  }
 0x452   : > { %7372 = vrot.lane.b32.xlu0 %v7361_v54, %s10585_s26  ;;  %v9321_v39 = vld [vmem:[#allocation4 + $0x88] sm:$0xff] }
 0x453   : > { %7362 = vrot.lane.b32.xlu1 %v7361_v54, %s7744_s0  ;;  %3174 = vst.msk [vmem:[#allocation4 + $0xa4] sm:$0xff] %vm623_vm2, %v3158_v53  ;;  %v3159_v52 = vmax.f32 %v3117_v21, 0.0  ;;  %v3226_v53 = vld [vmem:[#allocation4 + $0x128] sm:$0xff] }
 0x454   : > { %v9323_v30 = vld [vmem:[#allocation4 + $0x98] sm:$0xff]  ;;  %4026 = vmatpush1.bf16.msra.mxu0 %v7632_v2  ;;  %v3282_v33 = vld [vmem:[#allocation4 + $0x90] sm:$0xff] }
 0x455   : > { %3175 = vst.msk [vmem:[#allocation4 + $0xb4] sm:$0xff] %vm623_vm2, %v3159_v52  ;;  %v6656_v37 = vpop.f32.mrb[36].mxu0  ;;  %v6746_v18 = vpop.f32.mrb[56].mxu1  ;;  %v3893_v55 = vpack.c.bf16 %v9323_v30, %v9321_v39  ;;  %4027 = vmatprep.subr.bf16.mxu0 %v7742_v62 }
 0x456   : > { %v3146_v17 = vadd.f32 %v6746_v18, %v3049_v16  ;;  %v6657_v6 = vpop.f32.mrb[37].mxu0  ;;  %v3137_v5 = vpop.f32.mrb[57].mxu1  ;;  %7377 = vrot.lane.b32.xlu0 %v7376_v49, %s7743_s3  ;;  %v3227_v16 = vld [vmem:[#allocation4 + $0x138] sm:$0xff] }
 0x457   : > { %7367 = vrot.lane.b32.xlu1 %v7356_v19, %s7740_s27  ;;  %v6658_v58 = vadd.f32 %v6657_v6, %v6656_v37  ;;  %v3138_v24 = vadd.f32 %v3137_v5, %v3041_v22  ;;  %v6659_v0 = vpop.f32.mrb[38].mxu0  ;;  %v6747_v42 = vpop.f32.mrb[58].mxu1  ;;  %6520 = vmatprep.mubr.msk.bf16.mxu0 %vm623_vm2, %v3893_v55  ;;  %v7633_v6 = vld [vmem:[%s10550_s11 + $0x40] sm:$0xff]   ;;  %v7441_v62 = vpack.i.bf16 %v3227_v16, %v3226_v53 }
 0x458   : > { %v3166_v32 = vmax.f32 %v3146_v17, 0.0  ;;  %v3149_v1 = vadd.f32 %v6747_v42, %v3052_v41  ;;  %v6660_v35 = vpop.f32.mrb[39].mxu0  ;;  %v3140_v27 = vpop.f32.mrb[59].mxu1  ;;  %4028 = vmatpush1.bf16.msra.mxu0 %v7633_v6  ;;  %v3310_v6 = vld [vmem:[#allocation4 + $0x1d4] sm:$0xff] }
 0x459   : > { %v3025_v12 = vadd.f32 %v6658_v58, %v9267_v38  ;;  %v3164_v10 = vmax.f32 %v3138_v24, 0.0  ;;  %v6661_v63 = vadd.f32 %v6660_v35, %v6659_v0  ;;  %v3141_v7 = vadd.f32 %v3140_v27, %v3044_v8  ;;  %v3298_v8 = vld [vmem:[#allocation4 + $0x94] sm:$0xff]  ;;  %v3210_v27 = vld [vmem:[#allocation4 + $0x124] sm:$0xff] }
 0x45a   : > { %3182 = vst.msk [vmem:[#allocation4 + $0x1a4] sm:$0xff] %vm623_vm2, %v3166_v32  ;;  %v3167_v4 = vmax.f32 %v3149_v1, 0.0  ;;  %7387 = vrot.lane.b32.xlu0 %v7386_v43, %s7744_s0  ;;  %v9357_v50 = vld [vmem:[#allocation4 + $0xa8] sm:$0xff]  ;;  %v3281_v32 = vld [vmem:[#allocation4 + $0x80] sm:$0xff] }
 0x45b   : > { %7382 = vrot.lane.b32.xlu1 %v7381_v59, %s10587_s28  ;;  %v3122_v9 = vadd.f32 %v9297_v36, %v3025_v12  ;;  %3180 = vst.msk [vmem:[#allocation4 + $0x184] sm:$0xff] %vm623_vm2, %v3164_v10  ;;  %v3028_v56 = vadd.f32 %v6661_v63, %v9267_v38  ;;  %v3165_v57 = vmax.f32 %v3141_v7, 0.0  ;;  %v3283_v36 = vld [vmem:[#allocation4 + $0xa0] sm:$0xff]  ;;  %v7426_v35 = vpack.i.bf16 %v3282_v33, %v3281_v32 }
 0x45c   : > { %3183 = vst.msk [vmem:[#allocation4 + $0x1b4] sm:$0xff] %vm623_vm2, %v3167_v4  ;;  %v9353_v28 = vld [vmem:[#allocation4 + $0xb8] sm:$0xff]  ;;  %v3284_v60 = vld [vmem:[#allocation4 + $0xb0] sm:$0xff]  ;;  %v3299_v15 = vld [vmem:[#allocation4 + $0xa4] sm:$0xff]  ;;  %v7461_v12 = vpack.i.bf16 %v9323_v30, %v9321_v39 }
 0x45d   : > { %v3160_v40 = vmax.f32 %v3122_v9, 0.0  ;;  %v3125_v19 = vadd.f32 %v9307_v44, %v3028_v56  ;;  %3181 = vst.msk [vmem:[#allocation4 + $0x194] sm:$0xff] %vm623_vm2, %v3165_v57  ;;  %v3300_v13 = vld [vmem:[#allocation4 + $0xb4] sm:$0xff]  ;;  %v3895_v34 = vpack.c.bf16 %v9353_v28, %v9357_v50  ;;  %v7401_v3 = vpack.i.bf16 %v3284_v60, %v3283_v36  ;;  %v3295_v33 = vld [vmem:[#allocation4 + $0x1e0] sm:$0xff] }
 0x45e   : > { %7392 = vrot.lane.b32.xlu0 %v7381_v59, %s7740_s27  ;;  %v7406_v47 = vpack.i.bf16 %v3300_v13, %v3299_v15  ;;  %v7421_v24 = vpack.i.bf16 %v9353_v28, %v9357_v50  ;;  %v3311_v32 = vld [vmem:[#allocation4 + $0x1e4] sm:$0xff] }
 0x45f   : > { %7397 = vrot.lane.b32.xlu1 %v7386_v43, %s10585_s26  ;;  %3176 = vst.msk [vmem:[#allocation4 + $0x144] sm:$0xff] %vm623_vm2, %v3160_v40  ;;  %v3161_v46 = vmax.f32 %v3125_v19, 0.0  ;;  %v3211_v43 = vld [vmem:[#allocation4 + $0x134] sm:$0xff] }
 0x460   : > { %v7436_v59 = vpack.i.bf16 %v3211_v43, %v3210_v27  ;;  %v7313_v27 = vpop.permute.xlu1 %7312 }
 0x461   : > { %3177 = vst.msk [vmem:[#allocation4 + $0x154] sm:$0xff] %vm623_vm2, %v3161_v46  ;;  %v6662_v44 = vpop.f32.mrb[40].mxu0  ;;  %v9371_v49 = vld [vmem:[#allocation4 + $0x1a8] sm:$0xff] }
 0x462   : > { %v6663_v54 = vpop.f32.mrb[41].mxu0  ;;  %7402 = vrot.lane.b32.xlu0 %v7401_v3, %s10586_s25  ;;  %v9381_v17 = vld [vmem:[#allocation4 + $0x188] sm:$0xff] }
 0x463   : > { %7407 = vrot.lane.b32.xlu1 %v7406_v47, %s10597_s5  ;;  %v6664_v21 = vadd.f32 %v6663_v54, %v6662_v44  ;;  %v6665_v52 = vpop.f32.mrb[42].mxu0  ;;  %v9373_v37 = vld [vmem:[#allocation4 + $0x1b8] sm:$0xff]  ;;  %v3291_v44 = vld [vmem:[#allocation4 + $0x1a0] sm:$0xff] }
 0x464   : > { %v6666_v18 = vpop.f32.mrb[43].mxu0  ;;  %v9376_v22 = vld [vmem:[#allocation4 + $0x198] sm:$0xff]  ;;  %v3903_v55 = vpack.c.bf16 %v9373_v37, %v9371_v49  ;;  %v3307_v54 = vld [vmem:[#allocation4 + $0x1a4] sm:$0xff]  ;;  %v3290_v16 = vld [vmem:[#allocation4 + $0x190] sm:$0xff] }
 0x465   : > { %v3033_v29 = vadd.f32 %v6664_v21, %v9267_v38  ;;  %v6667_v45 = vadd.f32 %v6666_v18, %v6665_v52  ;;  %v3901_v5 = vpack.c.bf16 %v9376_v22, %v9381_v17  ;;  %v3306_v52 = vld [vmem:[#allocation4 + $0x194] sm:$0xff]  ;;  %v3309_v18 = vld [vmem:[#allocation4 + $0x1c4] sm:$0xff] }
 0x466   : > { %7417 = vrot.lane.b32.xlu0 %v7406_v47, %s10587_s28  ;;  %v9413_v56 = vld [vmem:[#allocation4 + $0x140] sm:$0xff]  ;;  %v3272_v19 = vld [vmem:[#allocation4 + $0x148] sm:$0xff]  ;;  %v3308_v47 = vld [vmem:[#allocation4 + $0x1b4] sm:$0xff] }
 0x467   : > { %7412 = vrot.lane.b32.xlu1 %v7401_v3, %s7743_s3  ;;  %v3130_v41 = vadd.f32 %v9292_v48, %v3033_v29  ;;  %v3036_v58 = vadd.f32 %v6667_v45, %v9267_v38  ;;  %v3297_v48 = vld [vmem:[#allocation4 + $0x84] sm:$0xff]  ;;  %v3225_v38 = vld [vmem:[#allocation4 + $0x118] sm:$0xff]  ;;  %v3292_v3 = vld [vmem:[#allocation4 + $0x1b0] sm:$0xff]  ;;  %v7506_v21 = vpack.i.bf16 %v3308_v47, %v3307_v54 }
 0x468   : > { %v7446_v1 = vpack.i.bf16 %v3298_v8, %v3297_v48  ;;  %v9407_v4 = vld [vmem:[#allocation4 + $0x150] sm:$0xff]  ;;  %v3273_v61 = vld [vmem:[#allocation4 + $0x158] sm:$0xff]  ;;  %v3212_v15 = vld [vmem:[#allocation4 + $0x144] sm:$0xff]  ;;  %v7501_v53 = vpack.i.bf16 %v3292_v3, %v3291_v44  ;;  %v7551_v8 = vpack.i.bf16 %v9376_v22, %v9381_v17  ;;  %v7308_v48 = vpop.permute.xlu0 %7307 }
 0x469   : > { %v3162_v0 = vmax.f32 %v3130_v41, 0.0  ;;  %v3133_v42 = vadd.f32 %v9302_v14, %v3036_v58  ;;  %v7431_v14 = vpack.i.bf16 %v3225_v38, %v3224_v20  ;;  %v7481_v39 = vpack.i.bf16 %v9407_v4, %v9413_v56  ;;  %v3213_v36 = vld [vmem:[#allocation4 + $0x154] sm:$0xff]  ;;  %v3305_v29 = vld [vmem:[#allocation4 + $0x184] sm:$0xff] }
 0x46a   : > { %7442 = vrot.lane.b32.xlu0 %v7441_v62, %s10585_s26  ;;  %v7491_v13 = vpack.i.bf16 %v3273_v61, %v3272_v19  ;;  %v7496_v2 = vpack.i.bf16 %v3213_v36, %v3212_v15  ;;  %v3289_v45 = vld [vmem:[#allocation4 + $0x180] sm:$0xff]  ;;  %v7526_v62 = vpack.i.bf16 %v3306_v52, %v3305_v29  ;;  %v7531_v58 = vpack.i.bf16 %v3310_v6, %v3309_v18  ;;  %v3296_v20 = vld [vmem:[#allocation4 + $0x1f0] sm:$0xff] }
 0x46b   : > { %7422 = vrot.lane.b32.xlu1 %v7421_v24, %s7744_s0  ;;  %3178 = vst.msk [vmem:[#allocation4 + $0x164] sm:$0xff] %vm623_vm2, %v3162_v0  ;;  %v3163_v31 = vmax.f32 %v3133_v42, 0.0  ;;  %v7511_v41 = vpack.i.bf16 %v3290_v16, %v3289_v45  ;;  %v3293_v24 = vld [vmem:[#allocation4 + $0x1c0] sm:$0xff]  ;;  %v3294_v0 = vld [vmem:[#allocation4 + $0x1d0] sm:$0xff]  ;;  %v7310_v47 = vunpack.i.h.bf16 %v7308_v48  ;;  %v7315_v16 = vunpack.i.h.bf16 %v7313_v27 }
 0x46c   : > { %v7521_v42 = vpack.i.bf16 %v3294_v0, %v3293_v24  ;;  %v3312_v38 = vld [vmem:[#allocation4 + $0x1f4] sm:$0xff]  ;;  %v3184_v52 = vld [vmem:[#allocation4] sm:$0xff] }
 0x46d   : > { %3179 = vst.msk [vmem:[#allocation4 + $0x174] sm:$0xff] %vm623_vm2, %v3163_v31  ;;  %v7576_v31 = vpack.i.bf16 %v3296_v20, %v3295_v33  ;;  %v3185_v54 = vld [vmem:[#allocation4 + $0x10] sm:$0xff] }
 0x46e   : > { %7447 = vrot.lane.b32.xlu0 %v7446_v1, %s10597_s5 }
 0x46f   : > { %7427 = vrot.lane.b32.xlu1 %v7426_v35, %s10586_s25 }
 0x472   : > { %7452 = vrot.lane.b32.xlu0 %v7426_v35, %s7743_s3  ;;  %v3258_v63 = vld [vmem:[#allocation4 + $0x164] sm:$0xff]  ;;  %v7581_v35 = vpack.i.bf16 %v3312_v38, %v3311_v32 }
 0x473   : > { %7432 = vrot.lane.b32.xlu1 %v7431_v14, %s10585_s26  ;;  %v9415_v57 = vld [vmem:[#allocation4 + $0x160] sm:$0xff]  ;;  %v3274_v60 = vld [vmem:[#allocation4 + $0x168] sm:$0xff]  ;;  %v7323_v14 = vpop.permute.xlu0 %7322 }
 0x474   : > { %v3259_v10 = vld [vmem:[#allocation4 + $0x174] sm:$0xff]  ;;  %v7324_v18 = vunpack.i.l.bf16 %v7323_v14  ;;  %v7325_v20 = vunpack.i.h.bf16 %v7323_v14 }
 0x475   : > { %v7471_v7 = vpack.i.bf16 %v3259_v10, %v3258_v63  ;;  %v9409_v9 = vld [vmem:[#allocation4 + $0x170] sm:$0xff]  ;;  %v3275_v40 = vld [vmem:[#allocation4 + $0x178] sm:$0xff] }
 0x476   : > { %7462 = vrot.lane.b32.xlu0 %v7461_v12, %s7744_s0  ;;  %v7466_v30 = vpack.i.bf16 %v9409_v9, %v9415_v57  ;;  %v7476_v46 = vpack.i.bf16 %v3275_v40, %v3274_v60 }
 0x477   : > { %7437 = vrot.lane.b32.xlu1 %v7436_v59, %s7740_s27  ;;  %v9448_v43 = vpop.permute.xlu0 %7332  ;;  %v7318_v59 = vpop.permute.xlu1 %7317 }
 0x478   : > { %v7319_v44 = vunpack.i.l.bf16 %v7318_v59  ;;  %v7320_v29 = vunpack.i.h.bf16 %v7318_v59 }
 0x47a   : > { %7472 = vrot.lane.b32.xlu0 %v7471_v7, %s10587_s28 }
 0x47b   : > { %7457 = vrot.lane.b32.xlu1 %v7446_v1, %s10587_s28  ;;  %v7571_v1 = vpack.i.bf16 %v9373_v37, %v9371_v49  ;;  %v9450_v12 = vpop.permute.xlu0 %7337  ;;  %v9452_v10 = vpop.permute.xlu1 %7327 }
 0x47e   : > { %7482 = vrot.lane.b32.xlu0 %v7481_v39, %s7743_s3 }
 0x47f   : > { %7467 = vrot.lane.b32.xlu1 %v7466_v30, %s7743_s3  ;;  %v9454_v63 = vpop.permute.xlu0 %7347 }
 0x482   : > { %7492 = vrot.lane.b32.xlu0 %v7491_v13, %s7744_s0 }
 0x483   : > { %7477 = vrot.lane.b32.xlu1 %v7476_v46, %s7744_s0 }
 0x486   : > { %7497 = vrot.lane.b32.xlu0 %v7496_v2, %s7740_s27 }
 0x487   : > { %7487 = vrot.lane.b32.xlu1 %v7496_v2, %s10587_s28 }
 0x48a   : > { %7502 = vrot.lane.b32.xlu0 %v7501_v53, %s10586_s25 }
 0x48b   : > { %7507 = vrot.lane.b32.xlu1 %v7506_v21, %s10597_s5 }
 0x48e   : > { %7527 = vrot.lane.b32.xlu0 %v7526_v62, %s10597_s5 }
 0x48f   : > { %7512 = vrot.lane.b32.xlu1 %v7511_v41, %s10586_s25 }
 0x492   : > { %7532 = vrot.lane.b32.xlu0 %v7531_v58, %s10597_s5  ;;  %v3187_v58 = vld [vmem:[#allocation4 + $0x30] sm:$0xff] }
 0x493   : > { %7517 = vrot.lane.b32.xlu1 %v7491_v13, %s10585_s26  ;;  %v3780_v32 = vsel %vm623_vm2, %v3187_v58, %v7320_v29 }
 0x496   : > { %7542 = vrot.lane.b32.xlu0 %v7511_v41, %s7743_s3  ;;  %v7314_v41 = vunpack.i.l.bf16 %v7313_v27 }
 0x497   : > { %7522 = vrot.lane.b32.xlu1 %v7521_v42, %s10586_s25 }
 0x49a   : > { %7552 = vrot.lane.b32.xlu0 %v7551_v8, %s7744_s0 }
 0x49b   : > { %7537 = vrot.lane.b32.xlu1 %v7471_v7, %s7740_s27  ;;  %v9456_v7 = vpop.permute.xlu1 %7342 }
 0x49e   : > { %7557 = vrot.lane.b32.xlu0 %v7476_v46, %s10585_s26 }
 0x49f   : > { %7547 = vrot.lane.b32.xlu1 %v7526_v62, %s10587_s28  ;;  %v3778_v62 = vsel %vm623_vm2, %v3185_v54, %v7310_v47 }
 0x4a0   : > { %v3794_v47 = vsel %vm527_vm5, %v3778_v62, %v7315_v16 }
 0x4a2   : > { %7567 = vrot.lane.b32.xlu0 %v7506_v21, %s10587_s28  ;;  %v3186_v21 = vld [vmem:[#allocation4 + $0x20] sm:$0xff]  ;;  %s6535_s28 = sshll.u32 %s10609_s21, 6 }
 0x4a3   : > { %7562 = vrot.lane.b32.xlu1 %v7501_v53, %s7743_s3  ;;  %v7309_v53 = vunpack.i.l.bf16 %v7308_v48  ;;  %v3779_v24 = vsel %vm623_vm2, %v3186_v21, %v7319_v44  ;;  %v3796_v21 = vsel %vm527_vm5, %v3780_v32, %v7325_v20  ;;  %s6536_s3 = sshll.u32 %s7844_s17, 8  ;;  %s7745_s17 = smov [#allocation5]  }
 0x4a4   : > { %s10495_s20 = scalar_lea.hbm %s10553_s14, %s6536_s3 }
 0x4a5   : > { %v3777_v42 = vsel %vm623_vm2, %v3184_v52, %v7309_v53 }
 0x4a6   : > { %7577 = vrot.lane.b32.xlu0 %v7576_v31, %s10586_s25  ;;  %v3793_v44 = vsel %vm527_vm5, %v3777_v42, %v7314_v41 }
 0x4a7   : > { %7572 = vrot.lane.b32.xlu1 %v7571_v1, %s7744_s0  ;;  %v3795_v1 = vsel %vm527_vm5, %v3779_v24, %v7324_v18  ;;  %s10386_s0 = scalar_lea.vmem %s10552_s13, %s6535_s28 }
 0x4ab   : > { %7582 = vrot.lane.b32.xlu1 %v7581_v35, %s10597_s5  ;;  %s10600_s5 = sshll.u32 %s10609_s21, 3  ;;  %s498_s21 = sand.u32 1, %s7724_s30  }
 0x4ac   : > { %s10458_s26 = scalar_lea.vmem %s10601_s1, %s10600_s5  ;;  %s6440_s25 = sshll.u32 %s498_s21, 4 }
 0x4ad   : > { %s500_s28 = scalar_lea.vmem [#allocation5], %s6440_s25  ;;  %s10498_s18 = scalar_lea.sflag [#allocation6], %s498_s21 }
 0x4ae   : > { %s6327_s27 = sshll.u32 %s500_s28, 4  ;;  %s7674_s25 = sshll.u32 %s7745_s17, 4  ;;  %s10490_s27 = int_to_ptr.vmem [resolvable:$true] %s6327_s27  ;;  %s7675_s25 = int_to_ptr.vmem [resolvable:$false] %s7674_s25 }
 0x4af   : > { %s7676_s1 = scalar_lea.vmem %s7675_s25, 512  ;;  %p7677_p0 = scmp.lt.s32.totalorder %s10490_s27, %s7675_s25 }
 0x4c0   : > { %v9458_v39 = vpop.permute.xlu0 %7357 }
 0x4c1   : > { %v7353_v30 = vpop.permute.xlu1 %7352  ;;  %v7359_v38 = vunpack.i.l.bf16 %v9458_v39  ;;  %v7360_v18 = vunpack.i.h.bf16 %v9458_v39 }
 0x4c2   : > { %v7354_v0 = vunpack.i.l.bf16 %v7353_v30  ;;  %v7355_v35 = vunpack.i.h.bf16 %v7353_v30 }
 0x4c4   : > { %v9462_v40 = vpop.permute.xlu0 %7372  ;;  %v3813_v16 = vsel %vm3809_vm12, %v3796_v21, %v7355_v35 }
 0x4c5   : > { %v9460_v61 = vpop.permute.xlu1 %7362 }
 0x4c6   : > { %v7365_v42 = vunpack.i.h.bf16 %v9460_v61 }
 0x4c8   : > { %v7378_v19 = vpop.permute.xlu0 %7377 }
 0x4c9   : > { %v9464_v60 = vpop.permute.xlu1 %7367  ;;  %v7380_v8 = vunpack.i.h.bf16 %v7378_v19  ;;  %v7379_v33 = vunpack.i.l.bf16 %v7378_v19  ;;  %v3812_v19 = vsel %vm3809_vm12, %v3795_v1, %v7354_v0 }
 0x4ca   : > { %v3828_v29 = vsel %vm1627_vm8, %v3812_v19, %v7359_v38  ;;  %v3829_v38 = vsel %vm1627_vm8, %v3813_v16, %v7360_v18  ;;  %v7369_v1 = vunpack.i.l.bf16 %v9464_v60  ;;  %v7370_v19 = vunpack.i.h.bf16 %v9464_v60 }
 0x4cb   : > { %v3811_v14 = vsel %vm3809_vm12, %v3794_v47, %v7380_v8  ;;  %v7364_v8 = vunpack.i.l.bf16 %v9460_v61  ;;  %v7329_v18 = vunpack.i.l.bf16 %v9452_v10 }
 0x4cc   : > { %v7388_v13 = vpop.permute.xlu0 %7387 }
 0x4cd   : > { %v7383_v46 = vpop.permute.xlu1 %7382  ;;  %v7390_v54 = vunpack.i.h.bf16 %v7388_v13  ;;  %v7389_v53 = vunpack.i.l.bf16 %v7388_v13 }
 0x4ce   : > { %v7385_v31 = vunpack.i.h.bf16 %v7383_v46  ;;  %v7384_v48 = vunpack.i.l.bf16 %v7383_v46  ;;  %v3810_v46 = vsel %vm3809_vm12, %v3793_v44, %v7379_v33 }
 0x4d0   : > { %v9466_v36 = vpop.permute.xlu0 %7392  ;;  %v3827_v30 = vsel %vm1627_vm8, %v3811_v14, %v7385_v31  ;;  %v3826_v52 = vsel %vm1627_vm8, %v3810_v46, %v7384_v48 }
 0x4d1   : > { %v9468_v15 = vpop.permute.xlu1 %7397  ;;  %v3843_v33 = vsel %vm3842_vm13, %v3826_v52, %v7389_v53  ;;  %v3844_v20 = vsel %vm3842_vm13, %v3827_v30, %v7390_v54  ;;  %v7395_v14 = vunpack.i.h.bf16 %v9466_v36  ;;  %v3845_v54 = vsel %vm3842_vm13, %v3828_v29, %v7364_v8 }
 0x4d2   : > { %v3846_v53 = vsel %vm3842_vm13, %v3829_v38, %v7365_v42  ;;  %v7330_v52 = vunpack.i.h.bf16 %v9452_v10  ;;  %v3783_v29 = vsel %vm623_vm2, %v9284_v11, %v7369_v1  ;;  %v3317_v10 = vld [vmem:[#allocation4 + $0xc8] sm:$0xff] }
 0x4d3   : > { %v3782_v11 = vsel %vm623_vm2, %v9310_v51, %v7395_v14 }
 0x4d4   : > { %v9470_v2 = vpop.permute.xlu0 %7402 }
 0x4d5   : > { %v9472_v3 = vpop.permute.xlu1 %7407  ;;  %v7405_v39 = vunpack.i.h.bf16 %v9470_v2  ;;  %v7404_v31 = vunpack.i.l.bf16 %v9470_v2  ;;  %v7394_v2 = vunpack.i.l.bf16 %v9466_v36  ;;  %v7375_v36 = vunpack.i.h.bf16 %v9462_v40 }
 0x4d6   : > { %v7410_v21 = vunpack.i.h.bf16 %v9472_v3  ;;  %v7409_v30 = vunpack.i.l.bf16 %v9472_v3 }
 0x4d7   : > { %v3862_v16 = vsel %vm1644_vm9, %v3846_v53, %v7405_v39  ;;  %v3861_v60 = vsel %vm1644_vm9, %v3845_v54, %v7404_v31 }
 0x4d8   : > { %v9474_v45 = vpop.permute.xlu0 %7417  ;;  %v3879_v28 = vsel %vm3875_vm14, %v3862_v16, %v7410_v21 }
 0x4d9   : > { %v9476_v6 = vpop.permute.xlu1 %7412  ;;  %v7420_v39 = vunpack.i.h.bf16 %v9474_v45 }
 0x4da   : > { %v7415_v50 = vunpack.i.h.bf16 %v9476_v6 }
 0x4dc   : > { %v9484_v27 = vpop.permute.xlu0 %7442 }
 0x4dd   : > { %v9486_v59 = vpop.permute.xlu1 %7422 }
 0x4de   : > { %v7424_v53 = vunpack.i.l.bf16 %v9486_v59 }
 0x4e0   : > { %v7448_v62 = vpop.permute.xlu0 %7447 }
 0x4e1   : > { %v7428_v41 = vpop.permute.xlu1 %7427  ;;  %v7450_v58 = vunpack.i.h.bf16 %v7448_v62  ;;  %v7449_v24 = vunpack.i.l.bf16 %v7448_v62  ;;  %v7400_v62 = vunpack.i.h.bf16 %v9468_v15 }
 0x4e2   : > { %v7430_v0 = vunpack.i.h.bf16 %v7428_v41  ;;  %v7429_v13 = vunpack.i.l.bf16 %v7428_v41  ;;  %v7399_v41 = vunpack.i.l.bf16 %v9468_v15  ;;  %v3781_v15 = vsel %vm623_vm2, %v9315_v25, %v7394_v2 }
 0x4e4   : > { %v3859_v48 = vsel %vm1644_vm9, %v3843_v33, %v7429_v13  ;;  %v3860_v32 = vsel %vm1644_vm9, %v3844_v20, %v7430_v0  ;;  %v7453_v47 = vpop.permute.xlu0 %7452  ;;  %v7374_v0 = vunpack.i.l.bf16 %v9462_v40  ;;  %v3784_v13 = vsel %vm623_vm2, %v9286_v26, %v7370_v19 }
 0x4e5   : > { %v3876_v35 = vsel %vm3875_vm14, %v3859_v48, %v7449_v24  ;;  %v3877_v61 = vsel %vm3875_vm14, %v3860_v32, %v7450_v58  ;;  %v9511_v44 = vpop.permute.xlu1 %7432  ;;  %v3318_v24 = vld [vmem:[#allocation4 + $0xd8] sm:$0xff]  ;;  %v7455_v42 = vunpack.i.h.bf16 %v7453_v47  ;;  %v7454_v8 = vunpack.i.l.bf16 %v7453_v47 }
 0x4e6   : > { %v3892_v46 = vpack.c.bf16 %v3877_v61, %v3876_v35  ;;  %v3878_v33 = vsel %vm3875_vm14, %v3861_v60, %v7409_v30  ;;  %v3799_v40 = vsel %vm527_vm5, %v3783_v29, %v7374_v0  ;;  %v3897_v20 = vpack.c.bf16 %v3318_v24, %v3317_v10  ;;  %v3320_v10 = vld [vmem:[#allocation4 + $0xf8] sm:$0xff] }
 0x4e7   : > { %v3798_v26 = vsel %vm527_vm5, %v3782_v11, %v7400_v62  ;;  %v3797_v51 = vsel %vm527_vm5, %v3781_v15, %v7399_v41  ;;  %v3800_v25 = vsel %vm527_vm5, %v3784_v13, %v7375_v36  ;;  %v7419_v32 = vunpack.i.l.bf16 %v9474_v45 }
 0x4e8   : > { %4044 = vmatmul.mubr.bf16.vlgmr.msra.gmra.mrb[44].mxu0 %v3892_v46  ;;  %v7463_v58 = vpop.permute.xlu0 %7462  ;;  %v3894_v35 = vpack.c.bf16 %v3879_v28, %v3878_v33  ;;  %v3815_v61 = vsel %vm3809_vm12, %v3798_v26, %v7455_v42  ;;  %v3817_v2 = vsel %vm3809_vm12, %v3800_v25, %v7415_v50  ;;  %v7425_v45 = vunpack.i.h.bf16 %v9486_v59 }
 0x4e9   : > { %v9529_v3 = vpop.permute.xlu1 %7437  ;;  %6521 = vmatprep.mubr.msk.bf16.mxu0 %vm623_vm2, %v3895_v34  ;;  %v7414_v34 = vunpack.i.l.bf16 %v9476_v6  ;;  %v3814_v6 = vsel %vm3809_vm12, %v3797_v51, %v7454_v8  ;;  %v7465_v47 = vunpack.i.h.bf16 %v7463_v58  ;;  %v7464_v19 = vunpack.i.l.bf16 %v7463_v58  ;;  %v3319_v58 = vld [vmem:[#allocation4 + $0xe8] sm:$0xff] }
 0x4ea   : > { %v7335_v36 = vunpack.i.h.bf16 %v9448_v43  ;;  %v7334_v29 = vunpack.i.l.bf16 %v9448_v43  ;;  %v3833_v24 = vsel %vm1627_vm8, %v3817_v2, %v7420_v39  ;;  %v7339_v42 = vunpack.i.l.bf16 %v9450_v12 }
 0x4eb   : > { %v3816_v14 = vsel %vm3809_vm12, %v3799_v40, %v7414_v34  ;;  %v3850_v13 = vsel %vm3842_vm13, %v3833_v24, %v7425_v45  ;;  %v3899_v8 = vpack.c.bf16 %v3320_v10, %v3319_v58  ;;  %v7350_v28 = vunpack.i.h.bf16 %v9454_v63 }
 0x4ec   : > { %v9551_v31 = vpop.permute.xlu0 %7472  ;;  %v3832_v59 = vsel %vm1627_vm8, %v3816_v14, %v7419_v32  ;;  %v7349_v50 = vunpack.i.l.bf16 %v9454_v63  ;;  %v7345_v26 = vunpack.i.h.bf16 %v9456_v7  ;;  %v7344_v51 = vunpack.i.l.bf16 %v9456_v7  ;;  %v3192_v32 = vld [vmem:[#allocation4 + $0x100] sm:$0xff] }
 0x4ed   : > { %v7458_v48 = vpop.permute.xlu1 %7457  ;;  %v3849_v0 = vsel %vm3842_vm13, %v3832_v59, %v7424_v53  ;;  %v7440_v39 = vunpack.i.h.bf16 %v9529_v3  ;;  %v7439_v25 = vunpack.i.l.bf16 %v9529_v3  ;;  %v7435_v63 = vunpack.i.h.bf16 %v9511_v44 }
 0x4ee   : > { %v7460_v38 = vunpack.i.h.bf16 %v7458_v48  ;;  %v7459_v1 = vunpack.i.l.bf16 %v7458_v48  ;;  %v3865_v34 = vsel %vm1644_vm9, %v3849_v0, %v7339_v42  ;;  %v3785_v2 = vsel %vm623_vm2, %v3192_v32, %v7349_v50 }
 0x4ef   : > { %v3882_v7 = vsel %vm3875_vm14, %v3865_v34, %v7344_v51  ;;  %v7475_v0 = vunpack.i.h.bf16 %v9551_v31 }
 0x4f0   : > { %v3830_v46 = vsel %vm1627_vm8, %v3814_v6, %v7459_v1  ;;  %v3831_v54 = vsel %vm1627_vm8, %v3815_v61, %v7460_v38  ;;  %4052 = vmatmul.mubr.bf16.gmra.mrb[48].mxu0 %v3894_v35  ;;  %v7483_v16 = vpop.permute.xlu0 %7482  ;;  %v7434_v38 = vunpack.i.l.bf16 %v9511_v44  ;;  %v3194_v1 = vld [vmem:[#allocation4 + $0x120] sm:$0xff]  ;;  %v3195_v35 = vld [vmem:[#allocation4 + $0x130] sm:$0xff] }
 0x4f1   : > { %v3847_v21 = vsel %vm3842_vm13, %v3830_v46, %v7464_v19  ;;  %v3848_v30 = vsel %vm3842_vm13, %v3831_v54, %v7465_v47  ;;  %v9564_v60 = vpop.permute.xlu1 %7467  ;;  %6522 = vmatprep.mubr.msk.bf16.mxu0 %vm623_vm2, %v3897_v20  ;;  %v3193_v20 = vld [vmem:[#allocation4 + $0x110] sm:$0xff]  ;;  %v7485_v6 = vunpack.i.h.bf16 %v7483_v16  ;;  %v7484_v61 = vunpack.i.l.bf16 %v7483_v16 }
 0x4f2   : > { %v3863_v62 = vsel %vm1644_vm9, %v3847_v21, %v7329_v18  ;;  %v3864_v41 = vsel %vm1644_vm9, %v3848_v30, %v7330_v52  ;;  %v7340_v52 = vunpack.i.h.bf16 %v9450_v12  ;;  %v3786_v3 = vsel %vm623_vm2, %v3193_v20, %v7350_v28 }
 0x4f3   : > { %v3880_v43 = vsel %vm3875_vm14, %v3863_v62, %v7334_v29  ;;  %v3881_v18 = vsel %vm3875_vm14, %v3864_v41, %v7335_v36  ;;  %v7445_v46 = vunpack.i.h.bf16 %v9484_v27  ;;  %v3788_v44 = vsel %vm623_vm2, %v3195_v35, %v7440_v39 }
 0x4f4   : > { %v9575_v11 = vpop.permute.xlu0 %7492  ;;  %v3896_v33 = vpack.c.bf16 %v3881_v18, %v3880_v43  ;;  %v3866_v40 = vsel %vm1644_vm9, %v3850_v13, %v7340_v52  ;;  %v3787_v54 = vsel %vm623_vm2, %v3194_v1, %v7439_v25  ;;  %v7444_v21 = vunpack.i.l.bf16 %v9484_v27 }
 0x4f5   : > { %v9577_v15 = vpop.permute.xlu1 %7477  ;;  %v3883_v47 = vsel %vm3875_vm14, %v3866_v40, %v7345_v26  ;;  %v3802_v30 = vsel %vm527_vm5, %v3786_v3, %v7435_v63  ;;  %v3801_v16 = vsel %vm527_vm5, %v3785_v2, %v7434_v38  ;;  %v7470_v41 = vunpack.i.h.bf16 %v9564_v60 }
 0x4f6   : > { %v3898_v36 = vpack.c.bf16 %v3883_v47, %v3882_v7  ;;  %v3818_v29 = vsel %vm3809_vm12, %v3801_v16, %v7484_v61  ;;  %v3819_v62 = vsel %vm3809_vm12, %v3802_v30, %v7485_v6  ;;  %v7469_v58 = vunpack.i.l.bf16 %v9564_v60 }
 0x4f7   : > { %v3803_v10 = vsel %vm527_vm5, %v3787_v54, %v7444_v21  ;;  %v3804_v59 = vsel %vm527_vm5, %v3788_v44, %v7445_v46  ;;  %v7474_v13 = vunpack.i.l.bf16 %v9551_v31  ;;  %v7495_v43 = vunpack.i.h.bf16 %v9575_v11 }
 0x4f8   : > { %4060 = vmatmul.mubr.bf16.gmra.mrb[52].mxu0 %v3896_v33  ;;  %v9591_v12 = vpop.permute.xlu0 %7497  ;;  %v7494_v18 = vunpack.i.l.bf16 %v9575_v11  ;;  %v3820_v50 = vsel %vm3809_vm12, %v3803_v10, %v7469_v58  ;;  %v3821_v31 = vsel %vm3809_vm12, %v3804_v59, %v7470_v41  ;;  %v7480_v40 = vunpack.i.h.bf16 %v9577_v15 }
 0x4f9   : > { %v7488_v48 = vpop.permute.xlu1 %7487  ;;  %6523 = vmatprep.mubr.msk.bf16.mxu0 %vm623_vm2, %v3899_v8  ;;  %v7479_v20 = vunpack.i.l.bf16 %v9577_v15  ;;  %v3836_v32 = vsel %vm1627_vm8, %v3820_v50, %v7474_v13  ;;  %v3837_v63 = vsel %vm1627_vm8, %v3821_v31, %v7475_v0  ;;  %v7500_v2 = vunpack.i.h.bf16 %v9591_v12 }
 0x4fa   : > { %v7490_v19 = vunpack.i.h.bf16 %v7488_v48  ;;  %v7489_v14 = vunpack.i.l.bf16 %v7488_v48  ;;  %v3854_v1 = vsel %vm3842_vm13, %v3837_v63, %v7480_v40  ;;  %v7499_v46 = vunpack.i.l.bf16 %v9591_v12 }
 0x4fb   : > { %v3853_v15 = vsel %vm3842_vm13, %v3836_v32, %v7479_v20  ;;  %v3790_v12 = vsel %vm623_vm2, %v9407_v4, %v7500_v2 }
 0x4fc   : > { %v7503_v45 = vpop.permute.xlu0 %7502  ;;  %v3834_v24 = vsel %vm1627_vm8, %v3818_v29, %v7489_v14  ;;  %v3835_v27 = vsel %vm1627_vm8, %v3819_v62, %v7490_v19  ;;  %v3325_v19 = vld [vmem:[#allocation4 + $0x1c8] sm:$0xff]  ;;  %v3326_v14 = vld [vmem:[#allocation4 + $0x1d8] sm:$0xff]  ;;  %v3789_v41 = vsel %vm623_vm2, %v9413_v56, %v7499_v46 }
 0x4fd   : > { %v7508_v53 = vpop.permute.xlu1 %7507  ;;  %v3851_v34 = vsel %vm3842_vm13, %v3834_v24, %v7494_v18  ;;  %v3852_v11 = vsel %vm3842_vm13, %v3835_v27, %v7495_v43  ;;  %v7505_v39 = vunpack.i.h.bf16 %v7503_v45  ;;  %v7504_v22 = vunpack.i.l.bf16 %v7503_v45  ;;  %v9648_v45 = vld [vmem:[#allocation4 + $0x1e8] sm:$0xff] }
 0x4fe   : > { %v7510_v35 = vunpack.i.h.bf16 %v7508_v53  ;;  %v7509_v6 = vunpack.i.l.bf16 %v7508_v53  ;;  %v9650_v53 = vld [vmem:[#allocation4 + $0x1f8] sm:$0xff]  ;;  %v3905_v37 = vpack.c.bf16 %v3326_v14, %v3325_v19 }
 0x4ff   : > { %v3869_v61 = vsel %vm1644_vm9, %v3853_v15, %v7504_v22  ;;  %v3870_v7 = vsel %vm1644_vm9, %v3854_v1, %v7505_v39  ;;  %v3907_v62 = vpack.c.bf16 %v9650_v53, %v9648_v45 }
 0x500   : > { %4068 = vmatmul.mubr.bf16.gmra.mrb[56].mxu0 %v3898_v36  ;;  %v7528_v52 = vpop.permute.xlu0 %7527  ;;  %v3886_v44 = vsel %vm3875_vm14, %v3869_v61, %v7509_v6  ;;  %v3887_v54 = vsel %vm3875_vm14, %v3870_v7, %v7510_v35 }
 0x501   : > { %v7513_v42 = vpop.permute.xlu1 %7512  ;;  %v7530_v60 = vunpack.i.h.bf16 %v7528_v52  ;;  %v7529_v8 = vunpack.i.l.bf16 %v7528_v52  ;;  %6524 = vmatprep.mubr.msk.bf16.mxu0 %vm623_vm2, %v3901_v5  ;;  %v3902_v29 = vpack.c.bf16 %v3887_v54, %v3886_v44 }
 0x502   : > { %v7515_v33 = vunpack.i.h.bf16 %v7513_v42  ;;  %v7514_v28 = vunpack.i.l.bf16 %v7513_v42 }
 0x504   : > { %v3867_v26 = vsel %vm1644_vm9, %v3851_v34, %v7514_v28  ;;  %v3868_v51 = vsel %vm1644_vm9, %v3852_v11, %v7515_v33  ;;  %v9630_v17 = vpop.permute.xlu0 %7532 }
 0x505   : > { %v7518_v5 = vpop.permute.xlu1 %7517  ;;  %v3884_v25 = vsel %vm3875_vm14, %v3867_v26, %v7529_v8  ;;  %v3885_v48 = vsel %vm3875_vm14, %v3868_v51, %v7530_v60  ;;  %v7535_v58 = vunpack.i.h.bf16 %v9630_v17  ;;  %v7534_v10 = vunpack.i.l.bf16 %v9630_v17 }
 0x506   : > { %v3900_v38 = vpack.c.bf16 %v3885_v48, %v3884_v25  ;;  %v7520_v21 = vunpack.i.h.bf16 %v7518_v5  ;;  %v7519_v30 = vunpack.i.l.bf16 %v7518_v5 }
 0x508   : > { %4076 = vmatmul.mubr.bf16.gmra.mrb[60].mxu0 %v3900_v38  ;;  %v7543_v47 = vpop.permute.xlu0 %7542  ;;  %v3806_v59 = vsel %vm527_vm5, %v3790_v12, %v7520_v21  ;;  %v3805_v24 = vsel %vm527_vm5, %v3789_v41, %v7519_v30 }
 0x509   : > { %v7523_v3 = vpop.permute.xlu1 %7522  ;;  %6525 = vmatprep.mubr.msk.bf16.mxu0 %vm623_vm2, %v3903_v55  ;;  %v7545_v55 = vunpack.i.h.bf16 %v7543_v47  ;;  %v7544_v36 = vunpack.i.l.bf16 %v7543_v47 }
 0x50a   : > { %v7525_v28 = vunpack.i.h.bf16 %v7523_v3  ;;  %v7524_v50 = vunpack.i.l.bf16 %v7523_v3 }
 0x50b   : > { %v3822_v56 = vsel %vm3809_vm12, %v3805_v24, %v7544_v36  ;;  %v3823_v60 = vsel %vm3809_vm12, %v3806_v59, %v7545_v55  ;;  %v9693_v55 = vld [vmem:[%s10551_s12] ss:$0 sm:$0xff]  ;;  %v10598_v24 = vld [vmem:[#allocation9_spill] sm:$0xff] }
 0x50c   : > { %v7553_v16 = vpop.permute.xlu0 %7552 }
 0x50d   : > { %v7538_v49 = vpop.permute.xlu1 %7537  ;;  %v7555_v8 = vunpack.i.h.bf16 %v7553_v16  ;;  %v7554_v33 = vunpack.i.l.bf16 %v7553_v16 }
 0x50e   : > { %v7540_v27 = vunpack.i.h.bf16 %v7538_v49  ;;  %v7539_v0 = vunpack.i.l.bf16 %v7538_v49 }
 0x510   : > { %4084 = vmatmul.mubr.bf16.gmra.mrb[64].mxu0 %v3902_v29  ;;  %v7558_v13 = vpop.permute.xlu0 %7557  ;;  %v3792_v11 = vsel %vm623_vm2, %v9409_v9, %v7540_v27  ;;  %v3791_v40 = vsel %vm623_vm2, %v9415_v57, %v7539_v0 }
 0x511   : > { %v7548_v43 = vpop.permute.xlu1 %7547  ;;  %v7560_v18 = vunpack.i.h.bf16 %v7558_v13  ;;  %v7559_v52 = vunpack.i.l.bf16 %v7558_v13  ;;  %6526 = vmatprep.mubr.msk.bf16.mxu0 %vm623_vm2, %v3905_v37 }
 0x512   : > { %v7550_v42 = vunpack.i.h.bf16 %v7548_v43  ;;  %v7549_v4 = vunpack.i.l.bf16 %v7548_v43 }
 0x513   : > { %v3807_v22 = vsel %vm527_vm5, %v3791_v40, %v7559_v52  ;;  %v3808_v17 = vsel %vm527_vm5, %v3792_v11, %v7560_v18  ;;  %vm5550_vm5 = vcmask 1043456  }
 0x514   : > { %v3838_v31 = vsel %vm1627_vm8, %v3822_v56, %v7549_v4  ;;  %v3839_v34 = vsel %vm1627_vm8, %v3823_v60, %v7550_v42  ;;  %v7568_v51 = vpop.permute.xlu0 %7567 }
 0x515   : > { %v3855_v20 = vsel %vm3842_vm13, %v3838_v31, %v7554_v33  ;;  %v3856_v26 = vsel %vm3842_vm13, %v3839_v34, %v7555_v8  ;;  %v7563_v39 = vpop.permute.xlu1 %7562  ;;  %v7570_v48 = vunpack.i.h.bf16 %v7568_v51  ;;  %v7569_v32 = vunpack.i.l.bf16 %v7568_v51 }
 0x516   : > { %v7565_v5 = vunpack.i.h.bf16 %v7563_v39  ;;  %v7564_v25 = vunpack.i.l.bf16 %v7563_v39  ;;  %v3871_v63 = vsel %vm1644_vm9, %v3855_v20, %v7524_v50  ;;  %v3872_v9 = vsel %vm1644_vm9, %v3856_v26, %v7525_v28 }
 0x517   : > { %v3888_v15 = vsel %vm3875_vm14, %v3871_v63, %v7534_v10  ;;  %v3889_v1 = vsel %vm3875_vm14, %v3872_v9, %v7535_v58  ;;  %v10599_v63 = vld [vmem:[#allocation10_spill] sm:$0xff] }
 0x518   : > { %v3824_v57 = vsel %vm3809_vm12, %v3807_v22, %v7564_v25  ;;  %v3825_v38 = vsel %vm3809_vm12, %v3808_v17, %v7565_v5  ;;  %v7578_v6 = vpop.permute.xlu0 %7577  ;;  %v3904_v61 = vpack.c.bf16 %v3889_v1, %v3888_v15  ;;  %vm6099_vm12 = vcmask 1044484  }
 0x519   : > { %v7573_v35 = vpop.permute.xlu1 %7572  ;;  %v3840_v3 = vsel %vm1627_vm8, %v3824_v57, %v7569_v32  ;;  %v3841_v19 = vsel %vm1627_vm8, %v3825_v38, %v7570_v48  ;;  %v7580_v14 = vunpack.i.h.bf16 %v7578_v6  ;;  %v7579_v2 = vunpack.i.l.bf16 %v7578_v6 }
 0x51a   : > { %v7575_v7 = vunpack.i.h.bf16 %v7573_v35  ;;  %v7574_v47 = vunpack.i.l.bf16 %v7573_v35  ;;  %4092 = vmatmul.mubr.bf16.gmra.mrb[68].mxu0 %v3904_v61  ;;  %vm5601_vm8 = vcmask 1046528  }
 0x51b   : > { %6527 = vmatprep.mubr.msk.bf16.mxu0 %vm623_vm2, %v3907_v62 }
 0x51c   : > { %v3857_v46 = vsel %vm3842_vm13, %v3840_v3, %v7574_v47  ;;  %v3858_v44 = vsel %vm3842_vm13, %v3841_v19, %v7575_v7  ;;  %vm6101_vm13 = vcmask 1045509  }
 0x51d   : > { %v7583_v54 = vpop.permute.xlu1 %7582  ;;  %v3873_v21 = vsel %vm1644_vm9, %v3857_v46, %v7579_v2  ;;  %v3874_v30 = vsel %vm1644_vm9, %v3858_v44, %v7580_v14  ;;  %vm5634_vm9 = vcmask 31744  }
 0x51e   : > { %v7585_v45 = vunpack.i.h.bf16 %v7583_v54  ;;  %v7584_v53 = vunpack.i.l.bf16 %v7583_v54 }
 0x520   : > { %v3890_v16 = vsel %vm3875_vm14, %v3873_v21, %v7584_v53  ;;  %v3891_v49 = vsel %vm3875_vm14, %v3874_v30, %v7585_v45  ;;  %vm6103_vm14 = vcmask 1046534  }
 0x521   : > { %v3906_v37 = vpack.c.bf16 %v3891_v49, %v3890_v16 }
 0x523   : > { %4100 = vmatmul.mubr.bf16.gmra.mrb[72].mxu0 %v3906_v37 }
 0x5bb   : > { %v4045_v36 = vpop.f32.mrb[44].mxu0 }
 0x5bc   : > { %v4046_v29 = vadd.f32 %v9693_v55, %v4045_v36  ;;  %v4047_v62 = vpop.f32.mrb[45].mxu0 }
 0x5bd   : > { %v4048_v12 = vpop.f32.mrb[46].mxu0 }
 0x5be   : > { %v9696_v41 = vmax.f32 %v4046_v29, 0.0  ;;  %v4049_v58 = vadd.f32 %v9693_v55, %v4048_v12  ;;  %v4050_v10 = vpop.f32.mrb[47].mxu0 }
 0x5c0   : > { %v4126_v59 = vcombine.high %v9696_v41, %v9696_v41  ;;  %v4133_v27 = vrot.slane %v9696_v41, %v10598_v24  ;;  %v9703_v0 = vmax.f32 %v4049_v58, 0.0 }
 0x5c2   : > { %v4140_v13 = vrot.slane %v4126_v59, %v10598_v24  ;;  %v4141_v43 = vcombine.high %v4133_v27, %v4133_v27  ;;  %v4149_v18 = vrot.slane %v4133_v27, %v10598_v24  ;;  %v4242_v52 = vcombine.high %v9703_v0, %v9703_v0 }
 0x5c3   : > { %v4249_v42 = vrot.slane %v9703_v0, %v10598_v24  ;;  %v4053_v4 = vpop.f32.mrb[48].mxu0 }
 0x5c4   : > { %v4142_v56 = vcombine.high %v4140_v13, %v4140_v13  ;;  %v4156_v60 = vrot.slane %v4140_v13, %v10598_v24  ;;  %v4163_v8 = vrot.slane %v4141_v43, %v10598_v24  ;;  %v4171_v33 = vcombine.high %v4149_v18, %v4149_v18  ;;  %v4055_v28 = vpop.f32.mrb[49].mxu0 }
 0x5c5   : > { %v4256_v50 = vrot.slane %v4242_v52, %v10598_v24  ;;  %v4257_v31 = vcombine.high %v4249_v42, %v4249_v42  ;;  %v4265_v34 = vrot.slane %v4249_v42, %v10598_v24  ;;  %v4054_v11 = vadd.f32 %v9693_v55, %v4053_v4  ;;  %v4056_v40 = vpop.f32.mrb[50].mxu0 }
 0x5c6   : > { %v4170_v20 = vrot.slane %v4142_v56, %v10598_v24  ;;  %v4172_v26 = vcombine.high %v4156_v60, %v4156_v60  ;;  %v4173_v51 = vcombine.high %v4163_v8, %v4163_v8  ;;  %v4057_v39 = vadd.f32 %v9693_v55, %v4056_v40  ;;  %v4058_v22 = vpop.f32.mrb[51].mxu0 }
 0x5c7   : > { %v4258_v17 = vcombine.high %v4256_v50, %v4256_v50  ;;  %v4272_v5 = vrot.slane %v4256_v50, %v10598_v24  ;;  %v4279_v25 = vrot.slane %v4257_v31, %v10598_v24  ;;  %v4287_v48 = vcombine.high %v4265_v34, %v4265_v34 }
 0x5c8   : > { %v4174_v32 = vcombine.high %v4170_v20, %v4170_v20  ;;  %v4943_v9 = vrot.slane %v4265_v34, %v10599_v63  ;;  %v9721_v57 = vmax.f32 %v4054_v11, 0.0  ;;  %v9723_v38 = vmax.f32 %v4057_v39, 0.0 }
 0x5c9   : > { %v4286_v15 = vrot.slane %v4258_v17, %v10598_v24  ;;  %v4288_v1 = vcombine.high %v4272_v5, %v4272_v5  ;;  %v4289_v35 = vcombine.high %v4279_v25, %v4279_v25  ;;  %v4947_v6 = vrot.slane %v4279_v25, %v10599_v63 }
 0x5ca   : > { %v4951_v61 = vrot.slane %v4287_v48, %v10599_v63  ;;  %v4959_v7 = vrot.slane %v4272_v5, %v10599_v63  ;;  %v5501_v47 = vsel %vm5500_vm15, %v4149_v18, %v4943_v9  ;;  %v4342_v3 = vcombine.high %v9721_v57, %v9721_v57 }
 0x5cb   : > { %v4290_v19 = vcombine.high %v4286_v15, %v4286_v15  ;;  %v4955_v14 = vrot.slane %v4289_v35, %v10599_v63  ;;  %v4963_v2 = vrot.slane %v4286_v15, %v10599_v63  ;;  %v4967_v46 = vrot.slane %v4288_v1, %v10599_v63  ;;  %v4061_v21 = vpop.f32.mrb[52].mxu0 }
 0x5cc   : > { %v5502_v44 = vsel %vm5500_vm15, %v4163_v8, %v4947_v6  ;;  %v5503_v54 = vsel %vm5500_vm15, %v4171_v33, %v4951_v61  ;;  %v5505_v45 = vsel %vm5500_vm15, %v4156_v60, %v4959_v7  ;;  %v4349_v53 = vrot.slane %v9721_v57, %v10598_v24  ;;  %v4063_v36 = vpop.f32.mrb[53].mxu0 }
 0x5cd   : > { %v4971_v30 = vrot.slane %v4290_v19, %v10599_v63  ;;  %v5504_v16 = vsel %vm5500_vm15, %v4173_v51, %v4955_v14  ;;  %v5506_v49 = vsel %vm5500_vm15, %v4170_v20, %v4963_v2  ;;  %v5507_v37 = vsel %vm5500_vm15, %v4172_v26, %v4967_v46  ;;  %v4064_v10 = vpop.f32.mrb[54].mxu0 }
 0x5ce   : > { %v4356_v29 = vrot.slane %v4342_v3, %v10598_v24  ;;  %v4357_v62 = vcombine.high %v4349_v53, %v4349_v53  ;;  %v4365_v12 = vrot.slane %v4349_v53, %v10598_v24  ;;  %v4442_v58 = vcombine.high %v9723_v38, %v9723_v38  ;;  %v4066_v43 = vpop.f32.mrb[55].mxu0 }
 0x5cf   : > { %v4449_v59 = vrot.slane %v9723_v38, %v10598_v24  ;;  %v4062_v27 = vadd.f32 %v9693_v55, %v4061_v21  ;;  %v4065_v13 = vadd.f32 %v9693_v55, %v4064_v10  ;;  %v9753_v18 = vsel %vm5500_vm15, %v4174_v32, %v4971_v30 }
 0x5d0   : > { %v4358_v52 = vcombine.high %v4356_v29, %v4356_v29  ;;  %v4372_v42 = vrot.slane %v4356_v29, %v10598_v24  ;;  %v4379_v4 = vrot.slane %v4357_v62, %v10598_v24  ;;  %v4387_v56 = vcombine.high %v4365_v12, %v4365_v12 }
 0x5d1   : > { %v5023_v60 = vrot.slane %v4365_v12, %v10599_v63  ;;  %v4456_v8 = vrot.slane %v4442_v58, %v10598_v24  ;;  %v4457_v33 = vcombine.high %v4449_v59, %v4449_v59  ;;  %v4465_v28 = vrot.slane %v4449_v59, %v10598_v24 }
 0x5d2   : > { %v4386_v50 = vrot.slane %v4358_v52, %v10598_v24  ;;  %v4388_v31 = vcombine.high %v4372_v42, %v4372_v42  ;;  %v4389_v34 = vcombine.high %v4379_v4, %v4379_v4  ;;  %v5027_v11 = vrot.slane %v4379_v4, %v10599_v63 }
 0x5d3   : > { %v5031_v40 = vrot.slane %v4387_v56, %v10599_v63  ;;  %v5039_v20 = vrot.slane %v4372_v42, %v10599_v63  ;;  %v5517_v26 = vsel %vm717_vm1, %v5501_v47, %v5023_v60  ;;  %v4458_v51 = vcombine.high %v4456_v8, %v4456_v8  ;;  %v4069_v25 = vpop.f32.mrb[56].mxu0 }
 0x5d4   : > { %v4390_v39 = vcombine.high %v4386_v50, %v4386_v50  ;;  %v5035_v22 = vrot.slane %v4389_v34, %v10599_v63  ;;  %v5043_v17 = vrot.slane %v4386_v50, %v10599_v63  ;;  %v5047_v5 = vrot.slane %v4388_v31, %v10599_v63  ;;  %v4071_v1 = vpop.f32.mrb[57].mxu0 }
 0x5d5   : > { %v5518_v48 = vsel %vm717_vm1, %v5502_v44, %v5027_v11  ;;  %v5519_v32 = vsel %vm717_vm1, %v5503_v54, %v5031_v40  ;;  %v5521_v9 = vsel %vm717_vm1, %v5505_v45, %v5039_v20  ;;  %v4472_v15 = vrot.slane %v4456_v8, %v10598_v24  ;;  %v4072_v47 = vpop.f32.mrb[58].mxu0 }
 0x5d6   : > { %v9773_v35 = vrot.slane %v4390_v39, %v10599_v63  ;;  %v5520_v6 = vsel %vm717_vm1, %v5504_v16, %v5035_v22  ;;  %v5522_v61 = vsel %vm717_vm1, %v5506_v49, %v5043_v17  ;;  %v5523_v7 = vsel %vm717_vm1, %v5507_v37, %v5047_v5  ;;  %v4074_v46 = vpop.f32.mrb[59].mxu0 }
 0x5d7   : > { %v4479_v3 = vrot.slane %v4457_v33, %v10598_v24  ;;  %v4486_v19 = vrot.slane %v4458_v51, %v10598_v24  ;;  %v4487_v14 = vcombine.high %v4465_v28, %v4465_v28  ;;  %v4488_v2 = vcombine.high %v4472_v15, %v4472_v15 }
 0x5d8   : > { %v5103_v44 = vrot.slane %v4465_v28, %v10599_v63  ;;  %v5119_v54 = vrot.slane %v4472_v15, %v10599_v63  ;;  %v9782_v45 = vmax.f32 %v4062_v27, 0.0  ;;  %v9784_v53 = vmax.f32 %v4065_v13, 0.0 }
 0x5d9   : > { %v4489_v21 = vcombine.high %v4479_v3, %v4479_v3  ;;  %v4490_v30 = vcombine.high %v4486_v19, %v4486_v19  ;;  %v5107_v16 = vrot.slane %v4479_v3, %v10599_v63  ;;  %v5111_v49 = vrot.slane %v4487_v14, %v10599_v63 }
 0x5da   : > { %v5123_v37 = vrot.slane %v4486_v19, %v10599_v63  ;;  %v5127_v36 = vrot.slane %v4488_v2, %v10599_v63  ;;  %v5534_v29 = vsel %vm5533_vm4, %v5517_v26, %v5103_v44  ;;  %v5538_v62 = vsel %vm5533_vm4, %v5521_v9, %v5119_v54 }
 0x5db   : > { %v5115_v12 = vrot.slane %v4489_v21, %v10599_v63  ;;  %v9794_v58 = vrot.slane %v4490_v30, %v10599_v63  ;;  %v5535_v10 = vsel %vm5533_vm4, %v5518_v48, %v5107_v16  ;;  %v5536_v59 = vsel %vm5533_vm4, %v5519_v32, %v5111_v49  ;;  %v9804_v42 = vpop.f32.mrb[60].mxu0 }
 0x5dc   : > { %v5539_v27 = vsel %vm5533_vm4, %v5522_v61, %v5123_v37  ;;  %v5540_v13 = vsel %vm5533_vm4, %v5523_v7, %v5127_v36  ;;  %v4542_v43 = vcombine.high %v9782_v45, %v9782_v45  ;;  %v4549_v52 = vrot.slane %v9782_v45, %v10598_v24  ;;  %v4079_v33 = vpop.f32.mrb[61].mxu0 }
 0x5dd   : > { %v5537_v4 = vsel %vm5533_vm4, %v5520_v6, %v5115_v12  ;;  %v4642_v56 = vcombine.high %v9784_v53, %v9784_v53  ;;  %v4649_v60 = vrot.slane %v9784_v53, %v10598_v24  ;;  %v4070_v8 = vadd.f32 %v9693_v55, %v4069_v25  ;;  %v9815_v11 = vpop.f32.mrb[62].mxu0 }
 0x5de   : > { %v4556_v28 = vrot.slane %v4542_v43, %v10598_v24  ;;  %v4557_v50 = vcombine.high %v4549_v52, %v4549_v52  ;;  %v4565_v31 = vrot.slane %v4549_v52, %v10598_v24  ;;  %v4073_v34 = vadd.f32 %v9693_v55, %v4072_v47  ;;  %v4082_v39 = vpop.f32.mrb[63].mxu0 }
 0x5df   : > { %v4656_v40 = vrot.slane %v4642_v56, %v10598_v24  ;;  %v4657_v20 = vcombine.high %v4649_v60, %v4649_v60  ;;  %v4665_v26 = vrot.slane %v4649_v60, %v10598_v24  ;;  %v9819_v51 = vmax.f32 %v4070_v8, 0.0 }
 0x5e0   : > { %v4558_v22 = vcombine.high %v4556_v28, %v4556_v28  ;;  %v4572_v17 = vrot.slane %v4556_v28, %v10598_v24  ;;  %v4579_v5 = vrot.slane %v4557_v50, %v10598_v24  ;;  %v4587_v25 = vcombine.high %v4565_v31, %v4565_v31 }
 0x5e1   : > { %v5183_v48 = vrot.slane %v4565_v31, %v10599_v63  ;;  %v4658_v32 = vcombine.high %v4656_v40, %v4656_v40  ;;  %v4672_v9 = vrot.slane %v4656_v40, %v10598_v24  ;;  %v4679_v15 = vrot.slane %v4657_v20, %v10598_v24 }
 0x5e2   : > { %v4586_v1 = vrot.slane %v4558_v22, %v10598_v24  ;;  %v4588_v6 = vcombine.high %v4572_v17, %v4572_v17  ;;  %v4589_v61 = vcombine.high %v4579_v5, %v4579_v5  ;;  %v5187_v7 = vrot.slane %v4579_v5, %v10599_v63 }
 0x5e3   : > { %v5191_v47 = vrot.slane %v4587_v25, %v10599_v63  ;;  %v5199_v3 = vrot.slane %v4572_v17, %v10599_v63  ;;  %v5551_v19 = vsel %vm5550_vm5, %v5534_v29, %v5183_v48  ;;  %v4686_v14 = vrot.slane %v4658_v32, %v10598_v24  ;;  %v9835_v21 = vpop.f32.mrb[64].mxu0 }
 0x5e4   : > { %v4590_v2 = vcombine.high %v4586_v1, %v4586_v1  ;;  %v5195_v46 = vrot.slane %v4589_v61, %v10599_v63  ;;  %v5203_v44 = vrot.slane %v4586_v1, %v10599_v63  ;;  %v5207_v54 = vrot.slane %v4588_v6, %v10599_v63  ;;  %v4087_v36 = vpop.f32.mrb[65].mxu0 }
 0x5e5   : > { %v5552_v30 = vsel %vm5550_vm5, %v5535_v10, %v5187_v7  ;;  %v5553_v16 = vsel %vm5550_vm5, %v5536_v59, %v5191_v47  ;;  %v5555_v49 = vsel %vm5550_vm5, %v5538_v62, %v5199_v3  ;;  %v4687_v37 = vcombine.high %v4665_v26, %v4665_v26  ;;  %v9846_v56 = vpop.f32.mrb[66].mxu0 }
 0x5e6   : > { %v9841_v29 = vrot.slane %v4590_v2, %v10599_v63  ;;  %v5554_v12 = vsel %vm5550_vm5, %v5537_v4, %v5195_v46  ;;  %v5556_v43 = vsel %vm5550_vm5, %v5539_v27, %v5203_v44  ;;  %v5557_v52 = vsel %vm5550_vm5, %v5540_v13, %v5207_v54  ;;  %v4090_v62 = vpop.f32.mrb[67].mxu0 }
 0x5e7   : > { %v4688_v60 = vcombine.high %v4672_v9, %v4672_v9  ;;  %v4689_v8 = vcombine.high %v4679_v15, %v4679_v15  ;;  %v4690_v10 = vcombine.high %v4686_v14, %v4686_v14  ;;  %v5263_v59 = vrot.slane %v4665_v26, %v10599_v63 }
 0x5e8   : > { %v5267_v33 = vrot.slane %v4679_v15, %v10599_v63  ;;  %v5271_v28 = vrot.slane %v4687_v37, %v10599_v63  ;;  %v5279_v50 = vrot.slane %v4672_v9, %v10599_v63  ;;  %v5283_v4 = vrot.slane %v4686_v14, %v10599_v63 }
 0x5e9   : > { %v5275_v27 = vrot.slane %v4689_v8, %v10599_v63  ;;  %v5287_v13 = vrot.slane %v4688_v60, %v10599_v63  ;;  %v5568_v31 = vsel %vm5567_vm6, %v5551_v19, %v5263_v59  ;;  %v4742_v40 = vcombine.high %v9819_v51, %v9819_v51 }
 0x5ea   : > { %v5569_v20 = vsel %vm5567_vm6, %v5552_v30, %v5267_v33  ;;  %v5570_v26 = vsel %vm5567_vm6, %v5553_v16, %v5271_v28  ;;  %v5572_v39 = vsel %vm5567_vm6, %v5555_v49, %v5279_v50  ;;  %v5573_v22 = vsel %vm5567_vm6, %v5556_v43, %v5283_v4 }
 0x5eb   : > { %v5571_v17 = vsel %vm5567_vm6, %v5554_v12, %v5275_v27  ;;  %v5574_v5 = vsel %vm5567_vm6, %v5557_v52, %v5287_v13  ;;  %v4749_v25 = vrot.slane %v9819_v51, %v10598_v24  ;;  %v4756_v48 = vrot.slane %v4742_v40, %v10598_v24 }
 0x5ec   : > { %v9867_v32 = vmax.f32 %v4073_v34, 0.0  ;;  %v9870_v9 = vrot.slane %v4690_v10, %v10599_v63  ;;  %v5524_v15 = vsel %vm717_vm1, %v9753_v18, %v9773_v35  ;;  %v4078_v1 = vadd.f32 %v9693_v55, %v9804_v42 }
 0x5ed   : > { %v4757_v6 = vcombine.high %v4749_v25, %v4749_v25  ;;  %v4758_v61 = vcombine.high %v4756_v48, %v4756_v48  ;;  %v4765_v7 = vrot.slane %v4749_v25, %v10598_v24  ;;  %v4772_v47 = vrot.slane %v4756_v48, %v10598_v24  ;;  %v9887_v35 = vpop.f32.mrb[68].mxu0 }
 0x5ee   : > { %v4842_v34 = vcombine.high %v9867_v32, %v9867_v32  ;;  %v4849_v3 = vrot.slane %v9867_v32, %v10598_v24  ;;  %v5541_v19 = vsel %vm5533_vm4, %v5524_v15, %v9794_v58  ;;  %v9885_v18 = vmax.f32 %v4078_v1, 0.0  ;;  %v4095_v44 = vpop.f32.mrb[69].mxu0 }
 0x5ef   : > { %v4779_v42 = vrot.slane %v4757_v6, %v10598_v24  ;;  %v4786_v14 = vrot.slane %v4758_v61, %v10598_v24  ;;  %v4787_v2 = vcombine.high %v4765_v7, %v4765_v7  ;;  %v4788_v46 = vcombine.high %v4772_v47, %v4772_v47  ;;  %v9894_v37 = vpop.f32.mrb[70].mxu0 }
 0x5f0   : > { %v5343_v54 = vrot.slane %v4765_v7, %v10599_v63  ;;  %v5359_v30 = vrot.slane %v4772_v47, %v10599_v63  ;;  %v4856_v16 = vrot.slane %v4842_v34, %v10598_v24  ;;  %v4857_v49 = vcombine.high %v4849_v3, %v4849_v3  ;;  %v4098_v52 = vpop.f32.mrb[71].mxu0 }
 0x5f1   : > { %v4789_v58 = vcombine.high %v4779_v42, %v4779_v42  ;;  %v4790_v36 = vcombine.high %v4786_v14, %v4786_v14  ;;  %v5347_v12 = vrot.slane %v4779_v42, %v10599_v63  ;;  %v5351_v43 = vrot.slane %v4787_v2, %v10599_v63 }
 0x5f2   : > { %v5363_v60 = vrot.slane %v4786_v14, %v10599_v63  ;;  %v5367_v8 = vrot.slane %v4788_v46, %v10599_v63  ;;  %v5585_v10 = vsel %vm5584_vm7, %v5568_v31, %v5343_v54  ;;  %v5589_v59 = vsel %vm5584_vm7, %v5572_v39, %v5359_v30 }
 0x5f3   : > { %v5355_v62 = vrot.slane %v4789_v58, %v10599_v63  ;;  %v5586_v33 = vsel %vm5584_vm7, %v5569_v20, %v5347_v12  ;;  %v5587_v28 = vsel %vm5584_vm7, %v5570_v26, %v5351_v43  ;;  %v4858_v50 = vcombine.high %v4856_v16, %v4856_v16 }
 0x5f4   : > { %v5590_v4 = vsel %vm5584_vm7, %v5573_v22, %v5363_v60  ;;  %v5591_v27 = vsel %vm5584_vm7, %v5574_v5, %v5367_v8  ;;  %v4865_v13 = vrot.slane %v4849_v3, %v10598_v24  ;;  %v4872_v40 = vrot.slane %v4856_v16, %v10598_v24 }
 0x5f5   : > { %v5588_v31 = vsel %vm5584_vm7, %v5571_v17, %v5355_v62  ;;  %v4879_v39 = vrot.slane %v4857_v49, %v10598_v24  ;;  %v4886_v25 = vrot.slane %v4858_v50, %v10598_v24  ;;  %v5371_v48 = vrot.slane %v4790_v36, %v10599_v63 }
 0x5f6   : > { %v4887_v20 = vcombine.high %v4865_v13, %v4865_v13  ;;  %v4888_v15 = vcombine.high %v4872_v40, %v4872_v40  ;;  %v5423_v26 = vrot.slane %v4865_v13, %v10599_v63  ;;  %v5439_v22 = vrot.slane %v4872_v40, %v10599_v63  ;;  %v9915_v1 = vpop.f32.mrb[72].mxu0 }
 0x5f7   : > { %v4889_v5 = vcombine.high %v4879_v39, %v4879_v39  ;;  %v4890_v6 = vcombine.high %v4886_v25, %v4886_v25  ;;  %v5427_v61 = vrot.slane %v4879_v39, %v10599_v63  ;;  %v5443_v17 = vrot.slane %v4886_v25, %v10599_v63  ;;  %v4103_v7 = vpop.f32.mrb[73].mxu0 }
 0x5f8   : > { %v5431_v47 = vrot.slane %v4887_v20, %v10599_v63  ;;  %v5447_v34 = vrot.slane %v4888_v15, %v10599_v63  ;;  %v5558_v3 = vsel %vm5550_vm5, %v5541_v19, %v9841_v29  ;;  %v5602_v42 = vsel %vm5601_vm8, %v5585_v10, %v5423_v26  ;;  %v9924_v14 = vpop.f32.mrb[74].mxu0 }
 0x5f9   : > { %v5435_v2 = vrot.slane %v4889_v5, %v10599_v63  ;;  %v5451_v46 = vrot.slane %v4890_v6, %v10599_v63  ;;  %v5575_v44 = vsel %vm5567_vm6, %v5558_v3, %v9870_v9  ;;  %v5603_v54 = vsel %vm5601_vm8, %v5586_v33, %v5427_v61  ;;  %v4106_v30 = vpop.f32.mrb[75].mxu0 }
 0x5fa   : > { %v5592_v16 = vsel %vm5584_vm7, %v5575_v44, %v5371_v48  ;;  %v5604_v49 = vsel %vm5601_vm8, %v5587_v28, %v5431_v47  ;;  %v5606_v29 = vsel %vm5601_vm8, %v5589_v59, %v5439_v22  ;;  %v5607_v19 = vsel %vm5601_vm8, %v5590_v4, %v5443_v17 }
 0x5fb   : > { %v5605_v58 = vsel %vm5601_vm8, %v5588_v31, %v5435_v2  ;;  %v5608_v36 = vsel %vm5601_vm8, %v5591_v27, %v5447_v34  ;;  %v5609_v12 = vsel %vm5601_vm8, %v5592_v16, %v5451_v46  ;;  %v9939_v43 = vadd.f32 %v5602_v42, %v9696_v41 }
 0x5fc   : > { %v9942_v9 = vadd.f32 %v5603_v54, %v9703_v0  ;;  %v9945_v52 = vadd.f32 %v5604_v49, %v9721_v57  ;;  %v9948_v60 = vadd.f32 %v5605_v58, %v9723_v38  ;;  %v9951_v8 = vadd.f32 %v5606_v29, %v9782_v45 }
 0x5fd   : > { %v9954_v10 = vadd.f32 %v5607_v19, %v9784_v53  ;;  %v9957_v59 = vadd.f32 %v5608_v36, %v9819_v51  ;;  %v9960_v41 = vadd.f32 %v5609_v12, %v9867_v32  ;;  %v5635_v0 = vsel %vm5634_vm9, %v9939_v43, -inf }
 0x5fe   : > { %v5636_v57 = vrot.slane %v5635_v0, 4  ;;  %v5642_v38 = vsel %vm5634_vm9, %v9942_v9, -inf  ;;  %v5649_v45 = vsel %vm5634_vm9, %v9945_v52, -inf  ;;  %v5656_v53 = vsel %vm5634_vm9, %v9948_v60, -inf }
 0x5ff   : > { %v5643_v62 = vrot.slane %v5642_v38, 4  ;;  %v5650_v33 = vrot.slane %v5649_v45, 4  ;;  %v5657_v51 = vrot.slane %v5656_v53, 4  ;;  %v5663_v32 = vsel %vm5634_vm9, %v9951_v8, -inf }
 0x600   : > { %v5637_v28 = vmax.f32 %v5635_v0, %v5636_v57  ;;  %v5664_v50 = vrot.slane %v5663_v32, 4  ;;  %v5670_v4 = vsel %vm5634_vm9, %v9954_v10, -inf  ;;  %v5677_v27 = vsel %vm5634_vm9, %v9957_v59, -inf }
 0x601   : > { %v5644_v13 = vmax.f32 %v5642_v38, %v5643_v62  ;;  %v5651_v40 = vmax.f32 %v5649_v45, %v5650_v33  ;;  %v5658_v31 = vmax.f32 %v5656_v53, %v5657_v51  ;;  %v5671_v39 = vrot.slane %v5670_v4, 4 }
 0x602   : > { %v5638_v25 = vrot.slane %v5637_v28, 2  ;;  %v5665_v48 = vmax.f32 %v5663_v32, %v5664_v50  ;;  %v5678_v20 = vrot.slane %v5677_v27, 4  ;;  %v5684_v15 = vsel %vm5634_vm9, %v9960_v41, -inf }
 0x603   : > { %v5645_v26 = vrot.slane %v5644_v13, 2  ;;  %v5652_v22 = vrot.slane %v5651_v40, 2  ;;  %v5659_v5 = vrot.slane %v5658_v31, 2  ;;  %v5672_v6 = vmax.f32 %v5670_v4, %v5671_v39 }
 0x604   : > { %v5639_v61 = vmax.f32 %v5637_v28, %v5638_v25  ;;  %v5666_v17 = vrot.slane %v5665_v48, 2  ;;  %v5679_v7 = vmax.f32 %v5677_v27, %v5678_v20  ;;  %v5685_v47 = vrot.slane %v5684_v15, 4 }
 0x605   : > { %v5646_v34 = vmax.f32 %v5644_v13, %v5645_v26  ;;  %v5653_v3 = vmax.f32 %v5651_v40, %v5652_v22  ;;  %v5660_v42 = vmax.f32 %v5658_v31, %v5659_v5  ;;  %v5673_v2 = vrot.slane %v5672_v6, 2 }
 0x606   : > { %v5640_v46 = vrot.slane %v5639_v61, 1  ;;  %v5667_v44 = vmax.f32 %v5665_v48, %v5666_v17  ;;  %v5680_v54 = vrot.slane %v5679_v7, 2  ;;  %v5686_v30 = vmax.f32 %v5684_v15, %v5685_v47 }
 0x607   : > { %v5647_v16 = vrot.slane %v5646_v34, 1  ;;  %v5654_v49 = vrot.slane %v5653_v3, 1  ;;  %v5661_v29 = vrot.slane %v5660_v42, 1  ;;  %v5674_v19 = vmax.f32 %v5672_v6, %v5673_v2 }
 0x608   : > { %v5641_v58 = vmax.f32 %v5639_v61, %v5640_v46  ;;  %v5668_v36 = vrot.slane %v5667_v44, 1  ;;  %v5681_v12 = vmax.f32 %v5679_v7, %v5680_v54  ;;  %v5687_v0 = vrot.slane %v5686_v30, 2 }
 0x609   : > { %v5648_v57 = vmax.f32 %v5646_v34, %v5647_v16  ;;  %v5655_v38 = vmax.f32 %v5653_v3, %v5654_v49  ;;  %v5662_v45 = vmax.f32 %v5660_v42, %v5661_v29  ;;  %v5675_v53 = vrot.slane %v5674_v19, 1 }
 0x60a   : > { %v5669_v62 = vmax.f32 %v5667_v44, %v5668_v36  ;;  %v5682_v33 = vrot.slane %v5681_v12, 1  ;;  %v5688_v51 = vmax.f32 %v5686_v30, %v5687_v0  ;;  %v5747_v32 = vsel %vm5634_vm9, %v5641_v58, -inf }
 0x60b   : > { %v5676_v28 = vmax.f32 %v5674_v19, %v5675_v53  ;;  %v5748_v50 = vsel %vm5634_vm9, %v5648_v57, -inf  ;;  %v5749_v4 = vsel %vm5634_vm9, %v5655_v38, -inf  ;;  %v5751_v27 = vsel %vm5634_vm9, %v5662_v45, -inf }
 0x60c   : > { %v5683_v13 = vmax.f32 %v5681_v12, %v5682_v33  ;;  %v5689_v40 = vrot.slane %v5688_v51, 1  ;;  %v5750_v31 = vmax.f32 %v5747_v32, %v5749_v4  ;;  %v5752_v39 = vmax.f32 %v5748_v50, %v5751_v27 }
 0x60d   : > { %v5753_v25 = vsel %vm5634_vm9, %v5669_v62, -inf  ;;  %v5755_v48 = vsel %vm5634_vm9, %v5676_v28, -inf  ;;  %v4081_v5 = vadd.f32 %v9693_v55, %v9815_v11  ;;  %v4175_v17 = vcombine.high %v9885_v18, %v9885_v18 }
 0x60e   : > { %v5690_v20 = vmax.f32 %v5688_v51, %v5689_v40  ;;  %v5754_v15 = vmax.f32 %v5750_v31, %v5753_v25  ;;  %v5756_v26 = vmax.f32 %v5752_v39, %v5755_v48  ;;  %v5757_v22 = vsel %vm5634_vm9, %v5683_v13, -inf }
 0x60f   : > { %v4182_v7 = vrot.slane %v9885_v18, %v10598_v24  ;;  %v9992_v34 = vmax.f32 %v4081_v5, 0.0  ;;  %v4189_v42 = vrot.slane %v4175_v17, %v10598_v24 }
 0x610   : > { %v5758_v6 = vmax.f32 %v5754_v15, %v5757_v22  ;;  %v5759_v61 = vsel %vm5634_vm9, %v5690_v20, -inf }
 0x611   : > { %v5760_v47 = vmax.f32 %v5756_v26, %v5759_v61  ;;  %v4190_v2 = vcombine.high %v4182_v7, %v4182_v7  ;;  %v4291_v11 = vcombine.high %v9992_v34, %v9992_v34  ;;  %v4298_v46 = vrot.slane %v9992_v34, %v10598_v24 }
 0x612   : > { %v4198_v58 = vrot.slane %v4182_v7, %v10598_v24  ;;  %v4191_v36 = vcombine.high %v4189_v42, %v4189_v42  ;;  %v4205_v38 = vrot.slane %v4189_v42, %v10598_v24 }
 0x613   : > { %v9994_v3 = vmax.f32 %v5758_v6, %v5760_v47 }
 0x614   : > { %v4220_v62 = vcombine.high %v4198_v58, %v4198_v58  ;;  %v10032_v28 = vrot.slane %v4191_v36, %v10598_v24  ;;  %v4221_v25 = vcombine.high %v4205_v38, %v4205_v38 }
 0x615   : > { %v5777_v44 = vsub.f32 %v9939_v43, %v9994_v3  ;;  %v5779_v54 = vsub.f32 %v9945_v52, %v9994_v3  ;;  %v5780_v30 = vsub.f32 %v9948_v60, %v9994_v3  ;;  %v5781_v16 = vsub.f32 %v9951_v8, %v9994_v3 }
 0x616   : > { %v5782_v49 = vsub.f32 %v9954_v10, %v9994_v3  ;;  %v5783_v29 = vsub.f32 %v9957_v59, %v9994_v3  ;;  %v5784_v19 = vsub.f32 %v9960_v41, %v9994_v3  ;;  %v4086_v43 = vadd.f32 %v9693_v55, %v9835_v21 }
 0x617   : > { %v4305_v52 = vrot.slane %v4291_v11, %v10598_v24  ;;  %v4306_v60 = vcombine.high %v4298_v46, %v4298_v46  ;;  %v4212_v8 = vrot.slane %v4190_v2, %v10598_v24  ;;  %v4314_v10 = vrot.slane %v4298_v46, %v10598_v24 }
 0x618   : > { %v10023_v57 = vmax.f32 %v4086_v43, 0.0  ;;  %v5793_v61 = vmul.f32 1.442695, %v5777_v44  ;;  %v5797_v42 = vmul.f32 1.442695, %v5779_v54  ;;  %v4089_v2 = vadd.f32 %v9693_v55, %v9846_v56 }
 0x619   : > { %v4307_v12 = vcombine.high %v4305_v52, %v4305_v52  ;;  %v4321_v0 = vrot.slane %v4305_v52, %v10598_v24  ;;  %v4328_v59 = vrot.slane %v4306_v60, %v10598_v24  ;;  %v4336_v45 = vcombine.high %v4314_v10, %v4314_v10 }
 0x61a   : > { %v4975_v53 = vrot.slane %v4314_v10, %v10599_v63  ;;  %v4222_v50 = vcombine.high %v4212_v8, %v4212_v8  ;;  %v4398_v39 = vrot.slane %v10023_v57, %v10598_v24  ;;  %v4391_v15 = vcombine.high %v10023_v57, %v10023_v57 }
 0x61b   : > { %v10027_v21 = vrot.slane %v4307_v12, %v10598_v24  ;;  %v4337_v33 = vcombine.high %v4321_v0, %v4321_v0  ;;  %v4338_v51 = vcombine.high %v4328_v59, %v4328_v59  ;;  %v4979_v32 = vrot.slane %v4328_v59, %v10599_v63 }
 0x61c   : > { %v4983_v4 = vrot.slane %v4336_v45, %v10599_v63  ;;  %v4991_v27 = vrot.slane %v4321_v0, %v10599_v63  ;;  %v5509_v48 = vsel %vm5500_vm15, %v4198_v58, %v4975_v53  ;;  %v4406_v7 = vcombine.high %v4398_v39, %v4398_v39 }
 0x61d   : > { %v4987_v13 = vrot.slane %v4338_v51, %v10599_v63  ;;  %v4995_v40 = vrot.slane %v10027_v21, %v10599_v63  ;;  %v4999_v31 = vrot.slane %v4337_v33, %v10599_v63  ;;  %v5510_v20 = vsel %vm5500_vm15, %v4212_v8, %v4979_v32 }
 0x61e   : > { %v5511_v26 = vsel %vm5500_vm15, %v4220_v62, %v4983_v4  ;;  %v5513_v5 = vsel %vm5500_vm15, %v4205_v38, %v4991_v27  ;;  %v4405_v47 = vrot.slane %v4391_v15, %v10598_v24  ;;  %7634 = vpow2.f32 %v5793_v61 }
 0x61f   : > { %v5512_v22 = vsel %vm5500_vm15, %v4222_v50, %v4987_v13  ;;  %v5514_v6 = vsel %vm5500_vm15, %v10032_v28, %v4995_v40  ;;  %v5515_v17 = vsel %vm5500_vm15, %v4221_v25, %v4999_v31  ;;  %v4414_v11 = vrot.slane %v4398_v39, %v10598_v24 }
 0x620   : > { %v4428_v46 = vrot.slane %v4406_v7, %v10598_v24  ;;  %v4407_v43 = vcombine.high %v4405_v47, %v4405_v47  ;;  %v4421_v52 = vrot.slane %v4405_v47, %v10598_v24  ;;  %7636 = vpow2.f32 %v5797_v42 }
 0x621   : > { %v10058_v58 = vmax.f32 %v4089_v2, 0.0  ;;  %v4436_v44 = vcombine.high %v4414_v11, %v4414_v11  ;;  %v5799_v36 = vmul.f32 1.442695, %v5780_v30  ;;  %v5801_v12 = vmul.f32 1.442695, %v5781_v16 }
 0x622   : > { %v4438_v60 = vcombine.high %v4428_v46, %v4428_v46  ;;  %v4435_v8 = vrot.slane %v4407_v43, %v10598_v24  ;;  %v4437_v54 = vcombine.high %v4421_v52, %v4421_v52  ;;  %v5055_v10 = vrot.slane %v4414_v11, %v10599_v63 }
 0x623   : > { %v5803_v56 = vmul.f32 1.442695, %v5782_v49  ;;  %v5059_v0 = vrot.slane %v4428_v46, %v10599_v63  ;;  %v4491_v59 = vcombine.high %v10058_v58, %v10058_v58  ;;  %v5805_v38 = vmul.f32 1.442695, %v5783_v29 }
 0x624   : > { %v5063_v45 = vrot.slane %v4436_v44, %v10599_v63  ;;  %v5067_v53 = vrot.slane %v4438_v60, %v10599_v63  ;;  %7638 = vpow2.f32 %v5799_v36  ;;  %v5807_v30 = vmul.f32 1.442695, %v5784_v19 }
 0x625   : > { %v5071_v16 = vrot.slane %v4421_v52, %v10599_v63  ;;  %v5075_v49 = vrot.slane %v4435_v8, %v10599_v63  ;;  %7640 = vpow2.f32 %v5801_v12  ;;  %v5079_v33 = vrot.slane %v4437_v54, %v10599_v63 }
 0x626   : > { %v5525_v29 = vsel %vm717_vm1, %v5509_v48, %v5055_v10  ;;  %v4498_v51 = vrot.slane %v10058_v58, %v10598_v24  ;;  %7642 = vpow2.f32 %v5803_v56  ;;  %v4339_v32 = vcombine.high %v10027_v21, %v10027_v21 }
 0x627   : > { %v5526_v50 = vsel %vm717_vm1, %v5510_v20, %v5059_v0  ;;  %v4505_v41 = vrot.slane %v4491_v59, %v10598_v24  ;;  %v4439_v4 = vcombine.high %v4435_v8, %v4435_v8  ;;  %v5527_v27 = vsel %vm717_vm1, %v5511_v26, %v5063_v45 }
 0x628   : > { %v10067_v62 = vpop.eup %7634  ;;  %v5528_v13 = vsel %vm717_vm1, %v5512_v22, %v5067_v53  ;;  %7644 = vpow2.f32 %v5805_v38  ;;  %v5529_v31 = vsel %vm717_vm1, %v5513_v5, %v5071_v16  ;;  %v5530_v21 = vsel %vm717_vm1, %v5514_v6, %v5075_v49 }
 0x629   : > { %v10084_v19 = vsel %vm5634_vm9, %v10067_v62, 0.0  ;;  %v4094_v39 = vadd.f32 %v9693_v55, %v9887_v35  ;;  %7646 = vpow2.f32 %v5807_v30  ;;  %v4223_v25 = vcombine.high %v10032_v28, %v10032_v28 }
 0x62a   : > { %v10088_v40 = vpop.eup %7636  ;;  %v5531_v48 = vsel %vm717_vm1, %v5515_v17, %v5079_v33  ;;  %v4506_v20 = vcombine.high %v4498_v51, %v4498_v51  ;;  %v5826_v15 = vrot.slane %v10084_v19, 4  ;;  %v5003_v26 = vrot.slane %v4339_v32, %v10599_v63 }
 0x62b   : > { %v4507_v22 = vcombine.high %v4505_v41, %v4505_v41  ;;  %v4514_v61 = vrot.slane %v4498_v51, %v10598_v24  ;;  %v10102_v5 = vsel %vm5634_vm9, %v10088_v40, 0.0  ;;  %v5083_v35 = vrot.slane %v4439_v4, %v10599_v63 }
 0x62c   : > { %v4521_v6 = vrot.slane %v4505_v41, %v10598_v24  ;;  %v4528_v28 = vrot.slane %v4506_v20, %v10598_v24  ;;  %v10109_v42 = vmax.f32 %v4094_v39, 0.0  ;;  %v4105_v41 = vadd.f32 %v9693_v55, %v9924_v14 }
 0x62d   : > { %v4535_v17 = vrot.slane %v4507_v22, %v10598_v24  ;;  %v4536_v7 = vcombine.high %v4514_v61, %v4514_v61  ;;  %v5135_v47 = vrot.slane %v4514_v61, %v10599_v63  ;;  %v5516_v4 = vsel %vm5500_vm15, %v4223_v25, %v5003_v26 }
 0x62e   : > { %v4537_v2 = vcombine.high %v4521_v6, %v4521_v6  ;;  %v4538_v11 = vcombine.high %v4528_v28, %v4528_v28  ;;  %v5139_v46 = vrot.slane %v4528_v28, %v10599_v63  ;;  %v5151_v43 = vrot.slane %v4521_v6, %v10599_v63  ;;  %v10113_v52 = vpop.eup %7638 }
 0x62f   : > { %v4539_v44 = vcombine.high %v4535_v17, %v4535_v17  ;;  %v5143_v60 = vrot.slane %v4536_v7, %v10599_v63  ;;  %v5155_v36 = vrot.slane %v4535_v17, %v10599_v63  ;;  %v5542_v8 = vsel %vm5533_vm4, %v5525_v29, %v5135_v47  ;;  %v10118_v12 = vpop.eup %7640 }
 0x630   : > { %v5147_v54 = vrot.slane %v4538_v11, %v10599_v63  ;;  %v5159_v10 = vrot.slane %v4537_v2, %v10599_v63  ;;  %v5543_v56 = vsel %vm5533_vm4, %v5526_v50, %v5139_v46  ;;  %v5546_v0 = vsel %vm5533_vm4, %v5529_v31, %v5151_v43  ;;  %v10124_v59 = vpop.eup %7642 }
 0x631   : > { %v10127_v38 = vrot.slane %v4539_v44, %v10599_v63  ;;  %v5544_v45 = vsel %vm5533_vm4, %v5527_v27, %v5143_v60  ;;  %v5547_v53 = vsel %vm5533_vm4, %v5530_v21, %v5155_v36  ;;  %v4591_v30 = vcombine.high %v10109_v42, %v10109_v42 }
 0x632   : > { %v5545_v16 = vsel %vm5533_vm4, %v5528_v13, %v5147_v54  ;;  %v5548_v49 = vsel %vm5533_vm4, %v5531_v48, %v5159_v10  ;;  %v4598_v33 = vrot.slane %v10109_v42, %v10598_v24  ;;  %v4097_v29 = vadd.f32 %v9693_v55, %v9894_v37  ;;  %v10139_v51 = vpop.eup %7644 }
 0x633   : > { %v4605_v32 = vrot.slane %v4591_v30, %v10598_v24  ;;  %v4102_v50 = vadd.f32 %v9693_v55, %v9915_v1  ;;  %v10147_v27 = vpop.eup %7646  ;;  %v10153_v37 = vsel %vm717_vm1, %v5516_v4, %v5083_v35  ;;  %v10158_v1 = vmax.f32 %v4105_v41, 0.0 }
 0x634   : > { %v4606_v13 = vcombine.high %v4598_v33, %v4598_v33  ;;  %v4614_v31 = vrot.slane %v4598_v33, %v10598_v24  ;;  %v10150_v21 = vmax.f32 %v4097_v29, 0.0  ;;  %vm5985_vm1 = vcmask 15360  }
 0x635   : > { %v4607_v39 = vcombine.high %v4605_v32, %v4605_v32  ;;  %v4621_v48 = vrot.slane %v4605_v32, %v10598_v24  ;;  %v10156_v20 = vmax.f32 %v4102_v50, 0.0  ;;  %vm6105_vm15 = vcmask 1047559  }
 0x636   : > { %v4628_v55 = vrot.slane %v4606_v13, %v10598_v24  ;;  %v4636_v14 = vcombine.high %v4614_v31, %v4614_v31  ;;  %v5215_v25 = vrot.slane %v4614_v31, %v10599_v63  ;;  %v4691_v26 = vcombine.high %v10150_v21, %v10150_v21 }
 0x637   : > { %v4635_v22 = vrot.slane %v4607_v39, %v10598_v24  ;;  %v4637_v61 = vcombine.high %v4621_v48, %v4621_v48  ;;  %v5231_v35 = vrot.slane %v4621_v48, %v10599_v63  ;;  %v4698_v6 = vrot.slane %v10150_v21, %v10598_v24 }
 0x638   : > { %v4638_v28 = vcombine.high %v4628_v55, %v4628_v55  ;;  %v5219_v17 = vrot.slane %v4628_v55, %v10599_v63  ;;  %v5223_v7 = vrot.slane %v4636_v14, %v10599_v63  ;;  %v5559_v47 = vsel %vm5550_vm5, %v5542_v8, %v5215_v25 }
 0x639   : > { %v4639_v2 = vcombine.high %v4635_v22, %v4635_v22  ;;  %v5235_v11 = vrot.slane %v4635_v22, %v10599_v63  ;;  %v5239_v46 = vrot.slane %v4637_v61, %v10599_v63  ;;  %v5563_v43 = vsel %vm5550_vm5, %v5546_v0, %v5231_v35 }
 0x63a   : > { %v5227_v44 = vrot.slane %v4638_v28, %v10599_v63  ;;  %v5560_v60 = vsel %vm5550_vm5, %v5543_v56, %v5219_v17  ;;  %v5561_v36 = vsel %vm5550_vm5, %v5544_v45, %v5223_v7  ;;  %v4705_v54 = vrot.slane %v4691_v26, %v10598_v24 }
 0x63b   : > { %v10179_v10 = vrot.slane %v4639_v2, %v10599_v63  ;;  %v5564_v8 = vsel %vm5550_vm5, %v5547_v53, %v5235_v11  ;;  %v5565_v30 = vsel %vm5550_vm5, %v5548_v49, %v5239_v46  ;;  %v4706_v33 = vcombine.high %v4698_v6, %v4698_v6 }
 0x63c   : > { %v5562_v29 = vsel %vm5550_vm5, %v5545_v16, %v5227_v44  ;;  %v4707_v32 = vcombine.high %v4705_v54, %v4705_v54  ;;  %v4714_v0 = vrot.slane %v4698_v6, %v10598_v24  ;;  %v4721_v50 = vrot.slane %v4705_v54, %v10598_v24 }
 0x63d   : > { %v4728_v56 = vrot.slane %v4706_v33, %v10598_v24  ;;  %v4791_v45 = vcombine.high %v10156_v20, %v10156_v20  ;;  %v4798_v41 = vrot.slane %v10156_v20, %v10598_v24  ;;  %v4891_v53 = vcombine.high %v10158_v1, %v10158_v1 }
 0x63e   : > { %v4735_v49 = vrot.slane %v4707_v32, %v10598_v24  ;;  %v4736_v4 = vcombine.high %v4714_v0, %v4714_v0  ;;  %v4737_v16 = vcombine.high %v4721_v50, %v4721_v50  ;;  %v5295_v13 = vrot.slane %v4714_v0, %v10599_v63 }
 0x63f   : > { %v4738_v31 = vcombine.high %v4728_v56, %v4728_v56  ;;  %v5299_v39 = vrot.slane %v4728_v56, %v10599_v63  ;;  %v5311_v48 = vrot.slane %v4721_v50, %v10599_v63  ;;  %v4805_v55 = vrot.slane %v4791_v45, %v10598_v24 }
 0x640   : > { %v4739_v14 = vcombine.high %v4735_v49, %v4735_v49  ;;  %v5303_v25 = vrot.slane %v4736_v4, %v10599_v63  ;;  %v5315_v26 = vrot.slane %v4735_v49, %v10599_v63  ;;  %v5319_v22 = vrot.slane %v4737_v16, %v10599_v63 }
 0x641   : > { %v5307_v61 = vrot.slane %v4738_v31, %v10599_v63  ;;  %v5576_v35 = vsel %vm5567_vm6, %v5559_v47, %v5295_v13  ;;  %v5577_v6 = vsel %vm5567_vm6, %v5560_v60, %v5299_v39  ;;  %v5580_v28 = vsel %vm5567_vm6, %v5563_v43, %v5311_v48 }
 0x642   : > { %v5578_v17 = vsel %vm5567_vm6, %v5561_v36, %v5303_v25  ;;  %v5581_v7 = vsel %vm5567_vm6, %v5564_v8, %v5315_v26  ;;  %v5582_v2 = vsel %vm5567_vm6, %v5565_v30, %v5319_v22  ;;  %v4806_v11 = vcombine.high %v4798_v41, %v4798_v41 }
 0x643   : > { %v5579_v46 = vsel %vm5567_vm6, %v5562_v29, %v5307_v61  ;;  %v4807_v44 = vcombine.high %v4805_v55, %v4805_v55  ;;  %v4814_v54 = vrot.slane %v4798_v41, %v10598_v24  ;;  %v4821_v33 = vrot.slane %v4805_v55, %v10598_v24 }
 0x644   : > { %v4828_v47 = vrot.slane %v4806_v11, %v10598_v24  ;;  %v4898_v60 = vrot.slane %v10158_v1, %v10598_v24  ;;  %v4905_v43 = vrot.slane %v4891_v53, %v10598_v24  ;;  %v5323_v36 = vrot.slane %v4739_v14, %v10599_v63 }
 0x645   : > { %v4835_v8 = vrot.slane %v4807_v44, %v10598_v24  ;;  %v4836_v30 = vcombine.high %v4814_v54, %v4814_v54  ;;  %v4837_v32 = vcombine.high %v4821_v33, %v4821_v33  ;;  %v5375_v29 = vrot.slane %v4814_v54, %v10599_v63 }
 0x646   : > { %v4838_v0 = vcombine.high %v4828_v47, %v4828_v47  ;;  %v5379_v50 = vrot.slane %v4828_v47, %v10599_v63  ;;  %v5391_v56 = vrot.slane %v4821_v33, %v10599_v63  ;;  %v4906_v45 = vcombine.high %v4898_v60, %v4898_v60 }
 0x647   : > { %v4839_v41 = vcombine.high %v4835_v8, %v4835_v8  ;;  %v5383_v49 = vrot.slane %v4836_v30, %v10599_v63  ;;  %v5395_v4 = vrot.slane %v4835_v8, %v10599_v63  ;;  %v5399_v53 = vrot.slane %v4837_v32, %v10599_v63 }
 0x648   : > { %v5387_v16 = vrot.slane %v4838_v0, %v10599_v63  ;;  %v5593_v13 = vsel %vm5584_vm7, %v5576_v35, %v5375_v29  ;;  %v5594_v31 = vsel %vm5584_vm7, %v5577_v6, %v5379_v50  ;;  %v5597_v39 = vsel %vm5584_vm7, %v5580_v28, %v5391_v56 }
 0x649   : > { %v5595_v48 = vsel %vm5584_vm7, %v5578_v17, %v5383_v49  ;;  %v5598_v55 = vsel %vm5584_vm7, %v5581_v7, %v5395_v4  ;;  %v5599_v14 = vsel %vm5584_vm7, %v5582_v2, %v5399_v53  ;;  %v4907_v25 = vcombine.high %v4905_v43, %v4905_v43 }
 0x64a   : > { %v5596_v26 = vsel %vm5584_vm7, %v5579_v46, %v5387_v16  ;;  %v4914_v22 = vrot.slane %v4898_v60, %v10598_v24  ;;  %v4921_v61 = vrot.slane %v4905_v43, %v10598_v24  ;;  %v4928_v11 = vrot.slane %v4906_v45, %v10598_v24 }
 0x64b   : > { %v4935_v35 = vrot.slane %v4907_v25, %v10598_v24  ;;  %v5403_v6 = vrot.slane %v4839_v41, %v10599_v63  ;;  %v5549_v28 = vsel %vm5533_vm4, %v10153_v37, %v10127_v38  ;;  %v5778_v17 = vsub.f32 %v9942_v9, %v9994_v3 }
 0x64c   : > { %v4936_v7 = vcombine.high %v4914_v22, %v4914_v22  ;;  %v4937_v2 = vcombine.high %v4921_v61, %v4921_v61  ;;  %v4938_v46 = vcombine.high %v4928_v11, %v4928_v11  ;;  %v5455_v44 = vrot.slane %v4914_v22, %v10599_v63 }
 0x64d   : > { %v4939_v54 = vcombine.high %v4935_v35, %v4935_v35  ;;  %v5459_v33 = vrot.slane %v4928_v11, %v10599_v63  ;;  %v5471_v47 = vrot.slane %v4921_v61, %v10599_v63  ;;  %v5475_v24 = vrot.slane %v4935_v35, %v10599_v63 }
 0x64e   : > { %v5463_v60 = vrot.slane %v4936_v7, %v10599_v63  ;;  %v5467_v43 = vrot.slane %v4938_v46, %v10599_v63  ;;  %v5479_v38 = vrot.slane %v4937_v2, %v10599_v63  ;;  %v5566_v37 = vsel %vm5550_vm5, %v5549_v28, %v10179_v10 }
 0x64f   : > { %v5483_v8 = vrot.slane %v4939_v54, %v10599_v63  ;;  %v5583_v30 = vsel %vm5567_vm6, %v5566_v37, %v5323_v36  ;;  %v5610_v32 = vsel %vm5601_vm8, %v5593_v13, %v5455_v44  ;;  %v5611_v29 = vsel %vm5601_vm8, %v5594_v31, %v5459_v33 }
 0x650   : > { %v5600_v0 = vsel %vm5584_vm7, %v5583_v30, %v5403_v6  ;;  %v5612_v50 = vsel %vm5601_vm8, %v5595_v48, %v5463_v60  ;;  %v5613_v56 = vsel %vm5601_vm8, %v5596_v26, %v5467_v43  ;;  %v5614_v45 = vsel %vm5601_vm8, %v5597_v39, %v5471_v47 }
 0x651   : > { %v5615_v41 = vsel %vm5601_vm8, %v5598_v55, %v5475_v24  ;;  %v5616_v10 = vsel %vm5601_vm8, %v5599_v14, %v5479_v38  ;;  %v5617_v63 = vsel %vm5601_vm8, %v5600_v0, %v5483_v8  ;;  %v10262_v36 = vadd.f32 %v5610_v32, %v9885_v18 }
 0x652   : > { %v10265_v49 = vadd.f32 %v5611_v29, %v9992_v34  ;;  %v10268_v4 = vadd.f32 %v5612_v50, %v10023_v57  ;;  %v10271_v53 = vadd.f32 %v5613_v56, %v10058_v58  ;;  %v10274_v16 = vadd.f32 %v5614_v45, %v10109_v42 }
 0x653   : > { %v10277_v13 = vadd.f32 %v5615_v41, %v10150_v21  ;;  %v10280_v31 = vadd.f32 %v5616_v10, %v10156_v20  ;;  %v10283_v18 = vadd.f32 %v5617_v63, %v10158_v1  ;;  %v5691_v34 = vsel %vm5634_vm9, %v10262_v36, -inf }
 0x654   : > { %v5692_v57 = vrot.slane %v5691_v34, 4  ;;  %v5698_v58 = vsel %vm5634_vm9, %v10265_v49, -inf  ;;  %v5705_v42 = vsel %vm5634_vm9, %v10268_v4, -inf  ;;  %v5712_v21 = vsel %vm5634_vm9, %v10271_v53, -inf }
 0x655   : > { %v5699_v39 = vrot.slane %v5698_v58, 4  ;;  %v5706_v48 = vrot.slane %v5705_v42, 4  ;;  %v5713_v20 = vrot.slane %v5712_v21, 4  ;;  %v5719_v1 = vsel %vm5634_vm9, %v10274_v16, -inf }
 0x656   : > { %v5693_v55 = vmax.f32 %v5691_v34, %v5692_v57  ;;  %v5720_v14 = vrot.slane %v5719_v1, 4  ;;  %v5726_v25 = vsel %vm5634_vm9, %v10277_v13, -inf  ;;  %v5733_v26 = vsel %vm5634_vm9, %v10280_v31, -inf }
 0x657   : > { %v5700_v22 = vmax.f32 %v5698_v58, %v5699_v39  ;;  %v5707_v61 = vmax.f32 %v5705_v42, %v5706_v48  ;;  %v5714_v11 = vmax.f32 %v5712_v21, %v5713_v20  ;;  %v5727_v35 = vrot.slane %v5726_v25, 4 }
 0x658   : > { %v5694_v6 = vrot.slane %v5693_v55, 2  ;;  %v5721_v28 = vmax.f32 %v5719_v1, %v5720_v14  ;;  %v5734_v7 = vrot.slane %v5733_v26, 4  ;;  %v5740_v2 = vsel %vm5634_vm9, %v10283_v18, -inf }
 0x659   : > { %v5701_v46 = vrot.slane %v5700_v22, 2  ;;  %v5708_v44 = vrot.slane %v5707_v61, 2  ;;  %v5715_v54 = vrot.slane %v5714_v11, 2  ;;  %v5728_v33 = vmax.f32 %v5726_v25, %v5727_v35 }
 0x65a   : > { %v5695_v47 = vmax.f32 %v5693_v55, %v5694_v6  ;;  %v5722_v24 = vrot.slane %v5721_v28, 2  ;;  %v5735_v60 = vmax.f32 %v5733_v26, %v5734_v7  ;;  %v5741_v43 = vrot.slane %v5740_v2, 4 }
 0x65b   : > { %v5702_v38 = vmax.f32 %v5700_v22, %v5701_v46  ;;  %v5709_v37 = vmax.f32 %v5707_v61, %v5708_v44  ;;  %v5716_v8 = vmax.f32 %v5714_v11, %v5715_v54  ;;  %v5729_v30 = vrot.slane %v5728_v33, 2 }
 0x65c   : > { %v5696_v32 = vrot.slane %v5695_v47, 1  ;;  %v5723_v29 = vmax.f32 %v5721_v28, %v5722_v24  ;;  %v5736_v0 = vrot.slane %v5735_v60, 2  ;;  %v5742_v50 = vmax.f32 %v5740_v2, %v5741_v43 }
 0x65d   : > { %v5703_v56 = vrot.slane %v5702_v38, 1  ;;  %v5710_v45 = vrot.slane %v5709_v37, 1  ;;  %v5717_v41 = vrot.slane %v5716_v8, 1  ;;  %v5730_v10 = vmax.f32 %v5728_v33, %v5729_v30 }
 0x65e   : > { %v5697_v63 = vmax.f32 %v5695_v47, %v5696_v32  ;;  %v5724_v34 = vrot.slane %v5723_v29, 1  ;;  %v5737_v57 = vmax.f32 %v5735_v60, %v5736_v0  ;;  %v5743_v58 = vrot.slane %v5742_v50, 2 }
 0x65f   : > { %v5704_v42 = vmax.f32 %v5702_v38, %v5703_v56  ;;  %v5711_v21 = vmax.f32 %v5709_v37, %v5710_v45  ;;  %v5718_v39 = vmax.f32 %v5716_v8, %v5717_v41  ;;  %v5731_v48 = vrot.slane %v5730_v10, 1 }
 0x660   : > { %v5725_v20 = vmax.f32 %v5723_v29, %v5724_v34  ;;  %v5738_v1 = vrot.slane %v5737_v57, 1  ;;  %v5744_v55 = vmax.f32 %v5742_v50, %v5743_v58  ;;  %v5762_v14 = vsel %vm5634_vm9, %v5697_v63, -inf }
 0x661   : > { %v5732_v25 = vmax.f32 %v5730_v10, %v5731_v48  ;;  %v5763_v26 = vsel %vm5634_vm9, %v5704_v42, -inf  ;;  %v5764_v22 = vsel %vm5634_vm9, %v5711_v21, -inf  ;;  %v5766_v61 = vsel %vm5634_vm9, %v5718_v39, -inf }
 0x662   : > { %v5739_v11 = vmax.f32 %v5737_v57, %v5738_v1  ;;  %v5745_v35 = vrot.slane %v5744_v55, 1  ;;  %v5765_v6 = vmax.f32 %v5762_v14, %v5764_v22  ;;  %v5767_v28 = vmax.f32 %v5763_v26, %v5766_v61 }
 0x663   : > { %v5768_v7 = vsel %vm5634_vm9, %v5725_v20, -inf  ;;  %v5770_v2 = vsel %vm5634_vm9, %v5732_v25, -inf  ;;  %v5795_v46 = vmul.f32 1.442695, %v5778_v17  ;;  %v5840_v47 = vrot.slane %v10102_v5, 4 }
 0x664   : > { %v5746_v44 = vmax.f32 %v5744_v55, %v5745_v35  ;;  %v5769_v54 = vmax.f32 %v5765_v6, %v5768_v7  ;;  %v5771_v33 = vmax.f32 %v5767_v28, %v5770_v2  ;;  %v5772_v24 = vsel %vm5634_vm9, %v5739_v11, -inf }
 0x665   : > { %7648 = vpow2.f32 %v5795_v46  ;;  %v5827_v60 = vadd.f32 %v5826_v15, %v10084_v19  ;;  %v5846_v43 = vsel %vm5634_vm9, %v10113_v52, 0.0  ;;  %v5853_v9 = vsel %vm5634_vm9, %v10118_v12, 0.0 }
 0x666   : > { %v5773_v38 = vmax.f32 %v5769_v54, %v5772_v24  ;;  %v5774_v37 = vsel %vm5634_vm9, %v5746_v44, -inf  ;;  %v5847_v17 = vrot.slane %v5846_v43, 4  ;;  %v5841_v32 = vadd.f32 %v5840_v47, %v10102_v5 }
 0x667   : > { %v5775_v3 = vmax.f32 %v5771_v33, %v5774_v37  ;;  %v5828_v30 = vrot.slane %v5827_v60, 2  ;;  %v5854_v29 = vrot.slane %v5853_v9, 4  ;;  %v5860_v0 = vsel %vm5634_vm9, %v10124_v59, 0.0 }
 0x668   : > { %v5848_v63 = vadd.f32 %v5847_v17, %v5846_v43  ;;  %v5861_v34 = vrot.slane %v5860_v0, 4  ;;  %vm6107_vm4 = vcmask 64512  }
 0x669   : > { %v5776_v8 = vmax.f32 %v5773_v38, %v5775_v3  ;;  %v5829_v42 = vadd.f32 %v5828_v30, %v5827_v60 }
 0x66a   : > { %v5849_v21 = vrot.slane %v5848_v63, 2  ;;  %v5862_v55 = vadd.f32 %v5861_v34, %v5860_v0 }
 0x66b   : > { %v5786_v19 = vsub.f32 %v10265_v49, %v5776_v8  ;;  %v5787_v15 = vsub.f32 %v10268_v4, %v5776_v8  ;;  %v5788_v50 = vsub.f32 %v10271_v53, %v5776_v8  ;;  %v5789_v56 = vsub.f32 %v10274_v16, %v5776_v8 }
 0x66c   : > { %v5790_v45 = vsub.f32 %v10277_v13, %v5776_v8  ;;  %v5791_v41 = vsub.f32 %v10280_v31, %v5776_v8  ;;  %v5792_v10 = vsub.f32 %v10283_v18, %v5776_v8  ;;  %v5785_v5 = vsub.f32 %v10262_v36, %v5776_v8 }
 0x66d   : > { %v5811_v57 = vmul.f32 1.442695, %v5786_v19  ;;  %v5813_v58 = vmul.f32 1.442695, %v5787_v15  ;;  %v5867_v49 = vsel %vm5634_vm9, %v10139_v51, 0.0  ;;  %v5874_v4 = vsel %vm5634_vm9, %v10147_v27, 0.0 }
 0x66e   : > { %v5815_v53 = vmul.f32 1.442695, %v5788_v50  ;;  %v5817_v13 = vmul.f32 1.442695, %v5789_v56  ;;  %v5842_v31 = vrot.slane %v5841_v32, 2  ;;  %v5855_v18 = vadd.f32 %v5854_v29, %v5853_v9 }
 0x66f   : > { %v10335_v16 = vpop.eup %7648  ;;  %7650 = vpow2.f32 %v5811_v57  ;;  %v5868_v39 = vrot.slane %v5867_v49, 4  ;;  %v5875_v48 = vrot.slane %v5874_v4, 4  ;;  %v5830_v1 = vrot.slane %v5829_v42, 1 }
 0x670   : > { %7652 = vpow2.f32 %v5813_v58  ;;  %v5832_v36 = vsel %vm5634_vm9, %v10335_v16, 0.0  ;;  %v5819_v14 = vmul.f32 1.442695, %v5790_v45  ;;  %v5843_v26 = vadd.f32 %v5842_v31, %v5841_v32 }
 0x671   : > { %v5833_v20 = vrot.slane %v5832_v36, 4  ;;  %7654 = vpow2.f32 %v5815_v53  ;;  %v5856_v22 = vrot.slane %v5855_v18, 2  ;;  %v5821_v61 = vmul.f32 1.442695, %v5791_v41 }
 0x672   : > { %7656 = vpow2.f32 %v5817_v13  ;;  %v5850_v11 = vadd.f32 %v5849_v21, %v5848_v63  ;;  %v5869_v35 = vadd.f32 %v5868_v39, %v5867_v49  ;;  %v5876_v6 = vadd.f32 %v5875_v48, %v5874_v4 }
 0x673   : > { %v5834_v25 = vadd.f32 %v5833_v20, %v5832_v36  ;;  %v5831_v7 = vadd.f32 %v5830_v1, %v5829_v42  ;;  %v5863_v2 = vrot.slane %v5862_v55, 2  ;;  %v5809_v46 = vmul.f32 1.442695, %v5785_v5 }
 0x674   : > { %7658 = vpow2.f32 %v5819_v14  ;;  %v5823_v44 = vmul.f32 1.442695, %v5792_v10  ;;  %v5844_v33 = vrot.slane %v5843_v26, 1  ;;  %v5857_v47 = vadd.f32 %v5856_v22, %v5855_v18 }
 0x675   : > { %v5835_v28 = vrot.slane %v5834_v25, 2  ;;  %7660 = vpow2.f32 %v5821_v61  ;;  %v5851_v60 = vrot.slane %v5850_v11, 1  ;;  %v5870_v43 = vrot.slane %v5869_v35, 2 }
 0x676   : > { %v5877_v38 = vrot.slane %v5876_v6, 2  ;;  %v5864_v3 = vadd.f32 %v5863_v2, %v5862_v55  ;;  %v5937_v8 = vsel %vm5634_vm9, %v5831_v7, 0.0  ;;  %7662 = vpow2.f32 %v5809_v46 }
 0x677   : > { %v5836_v54 = vadd.f32 %v5835_v28, %v5834_v25  ;;  %7664 = vpow2.f32 %v5823_v44  ;;  %v5845_v19 = vadd.f32 %v5844_v33, %v5843_v26  ;;  %v5858_v50 = vrot.slane %v5857_v47, 1 }
 0x678   : > { %v5871_v56 = vadd.f32 %v5870_v43, %v5869_v35  ;;  %v5878_v45 = vadd.f32 %v5877_v38, %v5876_v6  ;;  %v5865_v10 = vrot.slane %v5864_v3, 1  ;;  %v5852_v57 = vadd.f32 %v5851_v60, %v5850_v11 }
 0x679   : > { %v10339_v24 = vpop.eup %7650  ;;  %v5837_v37 = vrot.slane %v5836_v54, 1  ;;  %v5859_v4 = vadd.f32 %v5858_v50, %v5857_v47  ;;  %v5940_v31 = vsel %vm5634_vm9, %v5845_v19, 0.0 }
 0x67a   : > { %v10341_v9 = vpop.eup %7652  ;;  %v5888_v17 = vsel %vm5634_vm9, %v10339_v24, 0.0  ;;  %v5872_v53 = vrot.slane %v5871_v56, 1  ;;  %v5879_v13 = vrot.slane %v5878_v45, 1  ;;  %v5866_v36 = vadd.f32 %v5865_v10, %v5864_v3 }
 0x67b   : > { %v5889_v30 = vrot.slane %v5888_v17, 4  ;;  %v5895_v32 = vsel %vm5634_vm9, %v10341_v9, 0.0  ;;  %v5838_v29 = vadd.f32 %v5837_v37, %v5836_v54  ;;  %v10348_v0 = vpop.eup %7654  ;;  %v5942_v55 = vsel %vm5634_vm9, %v5852_v57, 0.0 }
 0x67c   : > { %v10350_v15 = vpop.eup %7656  ;;  %v5896_v63 = vrot.slane %v5895_v32, 4  ;;  %v5902_v58 = vsel %vm5634_vm9, %v10348_v0, 0.0  ;;  %v5873_v61 = vadd.f32 %v5872_v53, %v5871_v56  ;;  %v5880_v11 = vadd.f32 %v5879_v13, %v5878_v45 }
 0x67d   : > { %v5938_v41 = vsel %vm5634_vm9, %v5838_v29, 0.0  ;;  %v5890_v5 = vadd.f32 %v5889_v30, %v5888_v17  ;;  %v5909_v42 = vsel %vm5634_vm9, %v10350_v15, 0.0  ;;  %v5903_v20 = vrot.slane %v5902_v58, 4 }
 0x67e   : > { %v5939_v34 = vadd.f32 %v5938_v41, %v5937_v8  ;;  %v10357_v49 = vpop.eup %7658  ;;  %v5897_v39 = vadd.f32 %v5896_v63, %v5895_v32  ;;  %v5910_v1 = vrot.slane %v5909_v42, 4  ;;  %v5944_v35 = vsel %vm5634_vm9, %v5859_v4, 0.0 }
 0x67f   : > { %v10360_v18 = vpop.eup %7660  ;;  %v5891_v21 = vrot.slane %v5890_v5, 2  ;;  %v5916_v25 = vsel %vm5634_vm9, %v10357_v49, 0.0  ;;  %v5946_v28 = vsel %vm5634_vm9, %v5866_v36, 0.0  ;;  %v5904_v44 = vadd.f32 %v5903_v20, %v5902_v58 }
 0x680   : > { %v5941_v48 = vadd.f32 %v5940_v31, %v5939_v34  ;;  %v10363_v14 = vpop.eup %7662  ;;  %v5923_v6 = vsel %vm5634_vm9, %v10360_v18, 0.0  ;;  %v5898_v2 = vrot.slane %v5897_v39, 2  ;;  %v5911_v54 = vadd.f32 %v5910_v1, %v5909_v42 }
 0x681   : > { %v10367_v22 = vpop.eup %7664  ;;  %v5892_v7 = vadd.f32 %v5891_v21, %v5890_v5  ;;  %v5917_v33 = vrot.slane %v5916_v25, 4  ;;  %v5881_v47 = vsel %vm5634_vm9, %v10363_v14, 0.0  ;;  %v5924_v60 = vrot.slane %v5923_v6, 4 }
 0x682   : > { %v5943_v26 = vadd.f32 %v5942_v55, %v5941_v48  ;;  %v5930_v43 = vsel %vm5634_vm9, %v10367_v22, 0.0  ;;  %v5882_v37 = vrot.slane %v5881_v47, 4  ;;  %v5948_v3 = vsel %vm5634_vm9, %v5873_v61, 0.0 }
 0x683   : > { %v5893_v17 = vrot.slane %v5892_v7, 1  ;;  %v5899_v8 = vadd.f32 %v5898_v2, %v5897_v39  ;;  %v5950_v29 = vsel %vm5634_vm9, %v5880_v11, 0.0  ;;  %v5905_v19 = vrot.slane %v5904_v44, 2 }
 0x684   : > { %v5945_v46 = vadd.f32 %v5944_v35, %v5943_v26  ;;  %v5883_v32 = vadd.f32 %v5882_v37, %v5881_v47  ;;  %v5918_v50 = vadd.f32 %v5917_v33, %v5916_v25  ;;  %v5931_v56 = vrot.slane %v5930_v43, 4 }
 0x685   : > { %v5912_v45 = vrot.slane %v5911_v54, 2  ;;  %v5925_v41 = vadd.f32 %v5924_v60, %v5923_v6  ;;  %v5894_v63 = vadd.f32 %v5893_v17, %v5892_v7  ;;  %v5900_v34 = vrot.slane %v5899_v8, 1 }
 0x686   : > { %v5947_v38 = vadd.f32 %v5946_v28, %v5945_v46  ;;  %v5884_v5 = vrot.slane %v5883_v32, 2  ;;  %v5906_v58 = vadd.f32 %v5905_v19, %v5904_v44  ;;  %v5919_v42 = vrot.slane %v5918_v50, 2 }
 0x687   : > { %v5913_v4 = vadd.f32 %v5912_v45, %v5911_v54  ;;  %v5926_v53 = vrot.slane %v5925_v41, 2  ;;  %v5932_v13 = vadd.f32 %v5931_v56, %v5930_v43  ;;  %v5901_v36 = vadd.f32 %v5900_v34, %v5899_v8 }
 0x688   : > { %v5949_v30 = vadd.f32 %v5948_v3, %v5947_v38  ;;  %v5885_v57 = vadd.f32 %v5884_v5, %v5883_v32  ;;  %v5953_v39 = vsel %vm5634_vm9, %v5894_v63, 0.0  ;;  %v5907_v48 = vrot.slane %v5906_v58, 1 }
 0x689   : > { %v5920_v20 = vadd.f32 %v5919_v42, %v5918_v50  ;;  %v5914_v1 = vrot.slane %v5913_v4, 1  ;;  %v5927_v55 = vadd.f32 %v5926_v53, %v5925_v41  ;;  %v5933_v25 = vrot.slane %v5932_v13, 2 }
 0x68a   : > { %v5951_v10 = vadd.f32 %v5950_v29, %v5949_v30  ;;  %v5886_v31 = vrot.slane %v5885_v57, 1  ;;  %v5955_v11 = vsel %vm5634_vm9, %v5901_v36, 0.0  ;;  %v5908_v35 = vadd.f32 %v5907_v48, %v5906_v58 }
 0x68b   : > { %v5915_v7 = vadd.f32 %v5914_v1, %v5913_v4  ;;  %v5921_v2 = vrot.slane %v5920_v20, 1  ;;  %v5928_v46 = vrot.slane %v5927_v55, 1  ;;  %v5934_v44 = vadd.f32 %v5933_v25, %v5932_v13  ;;  %v10603_v25 = vld [vmem:[#allocation8_spill] sm:$0xff] }
 0x68c   : > { %7666 = vrcp.f32 %v5951_v10  ;;  %v5887_v21 = vadd.f32 %v5886_v31, %v5885_v57  ;;  %v10602_v48 = vlaneseq }
 0x68e   : > { %v5952_v26 = vsel %vm5634_vm9, %v5887_v21, 0.0 }
 0x68f   : > { %v5954_v61 = vadd.f32 %v5953_v39, %v5952_v26 }
 0x691   : > { %v5956_v6 = vadd.f32 %v5955_v11, %v5954_v61 }
 0x696   : > { %v7667_v28 = vpop.eup %7666 }
 0x697   : > { %v5969_v54 = vmul.f32 %v7667_v28, %v10335_v16  ;;  %v5968_v33 = vmul.f32 %v7667_v28, %v10067_v62  ;;  %v5972_v47 = vmul.f32 %v7667_v28, %v10118_v12  ;;  %v5970_v60 = vmul.f32 %v7667_v28, %v10088_v40 }
 0x698   : > { %v5974_v43 = vmul.f32 %v7667_v28, %v10139_v51  ;;  %v5971_v38 = vmul.f32 %v7667_v28, %v10113_v52  ;;  %v5975_v37 = vmul.f32 %v7667_v28, %v10147_v27  ;;  %v5973_v3 = vmul.f32 %v7667_v28, %v10124_v59 }
 0x699   : > { %v6005_v16 = vsel %vm5634_vm9, %v5969_v54, 0.0  ;;  %5987 = vst.msk [vmem:[%s10386_s0 + $0x8] sm:$0xff] %vm5985_vm1, %v5969_v54  ;;  %v6002_v62 = vsel %vm5634_vm9, %v5968_v33, 0.0  ;;  %5986 = vst.msk [vmem:[%s10386_s0] sm:$0xff] %vm5985_vm1, %v5968_v33  ;;  %v5922_v40 = vadd.f32 %v5921_v2, %v5920_v20  ;;  %v5935_v12 = vrot.slane %v5934_v44, 1 }
 0x69a   : > { %5990 = vst.msk [vmem:[%s10386_s0 + $0x20] sm:$0xff] %vm5985_vm1, %v5972_v47  ;;  %5988 = vst.msk [vmem:[%s10386_s0 + $0x10] sm:$0xff] %vm5985_vm1, %v5970_v60  ;;  %6006 = vadd.xlane.f32.xlu1 %v6005_v16  ;;  %6003 = vadd.xlane.f32.xlu0 %v6002_v62  ;;  %v5957_v52 = vsel %vm5634_vm9, %v5908_v35, 0.0  ;;  %v5929_v51 = vadd.f32 %v5928_v46, %v5927_v55  ;;  %v5959_v27 = vsel %vm5634_vm9, %v5915_v7, 0.0  ;;  %v6014_v17 = vsel %vm5634_vm9, %v5972_v47, 0.0 }
 0x69b   : > { %5992 = vst.msk [vmem:[%s10386_s0 + $0x30] sm:$0xff] %vm5985_vm1, %v5974_v43  ;;  %5989 = vst.msk [vmem:[%s10386_s0 + $0x18] sm:$0xff] %vm5985_vm1, %v5971_v38  ;;  %v5958_v59 = vadd.f32 %v5957_v52, %v5956_v6  ;;  %v6008_v8 = vsel %vm5634_vm9, %v5970_v60, 0.0  ;;  %v5936_v32 = vadd.f32 %v5935_v12, %v5934_v44  ;;  %v5961_v29 = vsel %vm5634_vm9, %v5922_v40, 0.0  ;;  %v6051_v12 = vld [vmem:[%s10458_s26 + $0x8] sm:$0xff] }
 0x69c   : > { %5993 = vst.msk [vmem:[%s10386_s0 + $0x38] sm:$0xff] %vm5985_vm1, %v5975_v37  ;;  %5991 = vst.msk [vmem:[%s10386_s0 + $0x28] sm:$0xff] %vm5985_vm1, %v5973_v3  ;;  %v5963_v50 = vsel %vm5634_vm9, %v5929_v51, 0.0  ;;  %v6020_v56 = vsel %vm5634_vm9, %v5974_v43, 0.0  ;;  %v6011_v45 = vsel %vm5634_vm9, %v5971_v38, 0.0  ;;  %v6023_v63 = vsel %vm5634_vm9, %v5975_v37, 0.0 }
 0x69d   : > { %v5960_v30 = vadd.f32 %v5959_v27, %v5958_v59  ;;  %v5965_v10 = vsel %vm5634_vm9, %v5936_v32, 0.0  ;;  %v6017_v34 = vsel %vm5634_vm9, %v5973_v3, 0.0  ;;  %v6061_v20 = vand.u32 127, %v10602_v48 }
 0x69e   : > { %6015 = vadd.xlane.f32.xlu1 %v6014_v17  ;;  %6009 = vadd.xlane.f32.xlu0 %v6008_v8 }
 0x69f   : > { %v5962_v19 = vadd.f32 %v5961_v29, %v5960_v30  ;;  %v6064_v26 = vsub.s32 %v6061_v20, %v10603_v25 }
 0x6a1   : > { %v5964_v41 = vadd.f32 %v5963_v50, %v5962_v19 }
 0x6a2   : > { %6021 = vadd.xlane.f32.xlu1 %v6020_v56  ;;  %6012 = vadd.xlane.f32.xlu0 %v6011_v45 }
 0x6a3   : > { %v5966_v5 = vadd.f32 %v5965_v10, %v5964_v41 }
 0x6a5   : > { %7668 = vrcp.f32 %v5966_v5 }
 0x6a6   : > { %6024 = vadd.xlane.f32.xlu1 %v6023_v63  ;;  %6018 = vadd.xlane.f32.xlu0 %v6017_v34 }
 0x6af   : > { %v7669_v57 = vpop.eup %7668 }
 0x6b0   : > { %v5977_v58 = vmul.f32 %v7669_v57, %v10363_v14  ;;  %v5978_v42 = vmul.f32 %v7669_v57, %v10339_v24  ;;  %v5981_v4 = vmul.f32 %v7669_v57, %v10350_v15  ;;  %v5979_v53 = vmul.f32 %v7669_v57, %v10341_v9  ;;  %v6050_v15 = vld [vmem:[%s10458_s26] sm:$0xff]  ;;  %s7670_s26 = scalar_lea.vmem %s10490_s27, 256 }
 0x6b1   : > { %v5983_v13 = vmul.f32 %v7669_v57, %v10360_v18  ;;  %v5980_v31 = vmul.f32 %v7669_v57, %v10348_v0  ;;  %v5982_v36 = vmul.f32 %v7669_v57, %v10357_v49  ;;  %v5984_v21 = vmul.f32 %v7669_v57, %v10367_v22  ;;  %6749 = vmatpush3.msra.mxu1 %v6050_v15  ;;  %p7671_p11 = scmp.ne.s32.totalorder %s10490_s27, %s7670_s26  ;;  %p7678_p1 = scmp.lt.s32.totalorder %s7676_s1, %s7670_s26 }
 0x6b2   : > { %v6026_v14 = vsel %vm5634_vm9, %v5977_v58, 0.0  ;;  %5994 = vst.msk [vmem:[%s10386_s0 + $0x40] sm:$0xff] %vm5985_vm1, %v5977_v58  ;;  %5995 = vst.msk [vmem:[%s10386_s0 + $0x48] sm:$0xff] %vm5985_vm1, %v5978_v42  ;;  %v6029_v24 = vsel %vm5634_vm9, %v5978_v42, 0.0  ;;  %v6038_v9 = vsel %vm5634_vm9, %v5981_v4, 0.0  ;;  %v6032_v0 = vsel %vm5634_vm9, %v5979_v53, 0.0  ;;  %6753 = vmatprep.subr.mxu1 %v10589_v23 }
 0x6b3   : > { %5998 = vst.msk [vmem:[%s10386_s0 + $0x60] sm:$0xff] %vm5985_vm1, %v5981_v4  ;;  %5996 = vst.msk [vmem:[%s10386_s0 + $0x50] sm:$0xff] %vm5985_vm1, %v5979_v53  ;;  %6027 = vadd.xlane.f32.xlu1 %v6026_v14  ;;  %6030 = vadd.xlane.f32.xlu0 %v6029_v24  ;;  %v6044_v49 = vsel %vm5634_vm9, %v5983_v13, 0.0  ;;  %v6035_v18 = vsel %vm5634_vm9, %v5980_v31, 0.0  ;;  %v6041_v22 = vsel %vm5634_vm9, %v5982_v36, 0.0  ;;  %v6047_v39 = vsel %vm5634_vm9, %v5984_v21, 0.0  ;;  %p7672_p12 = pnand %p7671_p11, %p7861_p5  ;;  %p7679_p2 = por %p7678_p1, %p7677_p0 }
 0x6b4   : > { %6000 = vst.msk [vmem:[%s10386_s0 + $0x70] sm:$0xff] %vm5985_vm1, %v5983_v13  ;;  %5997 = vst.msk [vmem:[%s10386_s0 + $0x58] sm:$0xff] %vm5985_vm1, %v5980_v31 }
 0x6b5   : > { %5999 = vst.msk [vmem:[%s10386_s0 + $0x68] sm:$0xff] %vm5985_vm1, %v5982_v36  ;;  %6001 = vst.msk [vmem:[%s10386_s0 + $0x78] sm:$0xff] %vm5985_vm1, %v5984_v21  ;;  %p7673_p13 = pneg %p7672_p12 }
 0x6b7   : > { %6039 = vadd.xlane.f32.xlu1 %v6038_v9  ;;  %6033 = vadd.xlane.f32.xlu0 %v6032_v0  ;;  %p7680_p3 = pnand %p7679_p2, %p7673_p13 }
 0x6bb   : > { %6045 = vadd.xlane.f32.xlu1 %v6044_v49  ;;  %6036 = vadd.xlane.f32.xlu0 %v6035_v18 }
 0x6bf   : > { %6042 = vadd.xlane.f32.xlu0 %v6041_v22 }
 0x6c3   : > { %6048 = vadd.xlane.f32.xlu0 %v6047_v39 }
 0x727   : > { %v6007_v1 = vpop.xlane.xlu1 %6006  ;;  %v6004_v55 = vpop.xlane.xlu0 %6003 }
 0x728   : > { %v6069_v35 = vrot.slane %v6007_v1, %v6064_v26  ;;  %v6065_v6 = vrot.slane %v6004_v55, %v6064_v26 }
 0x72a   : > { %v6094_v46 = vsel %vm782_vm3, %v6069_v35, %v6065_v6 }
 0x72b   : > { %v6016_v61 = vpop.xlane.xlu1 %6015  ;;  %v6010_v11 = vpop.xlane.xlu0 %6009 }
 0x72c   : > { %v6073_v28 = vrot.slane %v6010_v11, %v6064_v26  ;;  %v6081_v47 = vrot.slane %v6016_v61, %v6064_v26 }
 0x72e   : > { %v6096_v54 = vsel %vm6095_vm10, %v6073_v28, %v6094_v46 }
 0x72f   : > { %v6022_v7 = vpop.xlane.xlu1 %6021  ;;  %v6013_v2 = vpop.xlane.xlu0 %6012 }
 0x730   : > { %v6077_v44 = vrot.slane %v6013_v2, %v6064_v26  ;;  %v6089_v37 = vrot.slane %v6022_v7, %v6064_v26 }
 0x732   : > { %v6098_v33 = vsel %vm6097_vm11, %v6077_v44, %v6096_v54 }
 0x733   : > { %v6025_v60 = vpop.xlane.xlu1 %6024  ;;  %v6019_v43 = vpop.xlane.xlu0 %6018  ;;  %v6100_v3 = vsel %vm6099_vm12, %v6081_v47, %v6098_v33 }
 0x734   : > { %v6085_v38 = vrot.slane %v6019_v43, %v6064_v26  ;;  %v6093_v16 = vrot.slane %v6025_v60, %v6064_v26 }
 0x736   : > { %v6102_v62 = vsel %vm6101_vm13, %v6085_v38, %v6100_v3 }
 0x737   : > { %v6104_v40 = vsel %vm6103_vm14, %v6089_v37, %v6102_v62 }
 0x738   : > { %v6106_v52 = vsel %vm6105_vm15, %v6093_v16, %v6104_v40 }
 0x739   : > { %6751 = vmatmul.mubr.msk.f32.vlgmr.msra.gmra.mrb[60].mxu1 %vm6107_vm4, %v6106_v52 }
 0x73a   : > { %6754 = vmatpush3.msra.mxu1 %v6051_v12  ;;  %6755 = vmatprep.mubr.msk.f32.mxu1 %vm7735_vm0, %v10589_v23 }
 0x740   : > { %v6031_v59 = vpop.xlane.xlu0 %6030  ;;  %v6028_v51 = vpop.xlane.xlu1 %6027 }
 0x741   : > { %v6191_v17 = vrot.slane %v6028_v51, %v6064_v26  ;;  %v6195_v8 = vrot.slane %v6031_v59, %v6064_v26 }
 0x743   : > { %v6220_v19 = vsel %vm782_vm3, %v6195_v8, %v6191_v17 }
 0x744   : > { %v6034_v27 = vpop.xlane.xlu0 %6033  ;;  %v6040_v32 = vpop.xlane.xlu1 %6039 }
 0x745   : > { %v6199_v30 = vrot.slane %v6034_v27, %v6064_v26  ;;  %v6207_v41 = vrot.slane %v6040_v32, %v6064_v26 }
 0x747   : > { %v6221_v56 = vsel %vm6095_vm10, %v6199_v30, %v6220_v19 }
 0x748   : > { %v6037_v29 = vpop.xlane.xlu0 %6036  ;;  %v6046_v5 = vpop.xlane.xlu1 %6045 }
 0x749   : > { %v6203_v50 = vrot.slane %v6037_v29, %v6064_v26  ;;  %v6215_v57 = vrot.slane %v6046_v5, %v6064_v26 }
 0x74b   : > { %v6222_v45 = vsel %vm6097_vm11, %v6203_v50, %v6221_v56 }
 0x74c   : > { %v6043_v10 = vpop.xlane.xlu0 %6042  ;;  %v6223_v63 = vsel %vm6099_vm12, %v6207_v41, %v6222_v45 }
 0x74d   : > { %v6211_v23 = vrot.slane %v6043_v10, %v6064_v26 }
 0x74f   : > { %v6224_v34 = vsel %vm6101_vm13, %v6211_v23, %v6223_v63 }
 0x750   : > { %v6049_v58 = vpop.xlane.xlu0 %6048  ;;  %v6225_v4 = vsel %vm6103_vm14, %v6215_v57, %v6224_v34 }
 0x751   : > { %v6219_v42 = vrot.slane %v6049_v58, %v6064_v26 }
 0x753   : > { %v6226_v53 = vsel %vm6105_vm15, %v6219_v42, %v6225_v4 }
 0x754   : > { %6756 = vmatmul.mubr.msk.f32.vlgmr.msra.gmra.mrb[62].mxu1 %vm6107_vm4, %v6226_v53 }
 0x80c   : > { %v6176_v13 = vpop.f32.mrb[60].mxu1 }
 0x80d   : > { %v6299_v31 = vmul.f32 0.25, %v6176_v13  ;;  %v6752_v36 = vpop.f32.mrb[61].mxu1 }
 0x80f   : > { %6301 = vst.msk [vmem:[%s500_s28] sm:$0xff] %vm623_vm2, %v6299_v31 }
 0x827   : > { %v6295_v21 = vpop.f32.mrb[62].mxu1 }
 0x828   : > { %v6300_v14 = vmul.f32 0.25, %v6295_v21  ;;  %v6757_v24 = vpop.f32.mrb[63].mxu1 }
 0x82a   : > { %6302 = vst.msk [vmem:[%s500_s28 + $0x8] sm:$0xff] %vm623_vm2, %v6300_v14 }
 0x82b   : > { %7683 = shalt.err (!%p7680_p3)
}
 0x82c   : > { %s7684_s21 = scalar_lea.hbm %s10495_s20, 256  ;;  %s7688_s0 = scalar_lea.hbm %s10553_s14, 512 }
 0x82d   : > { %p7685_p4 = scmp.ne.s32.totalorder %s10495_s20, %s7684_s21  ;;  %p7689_p9 = scmp.lt.u32.totalorder %s10495_s20, %s10553_s14 }
 0x82e   : > { %p7690_p10 = scmp.lt.u32.totalorder %s7688_s0, %s7684_s21  ;;  %p7692_p12 = scmp.lt.u32.totalorder %s7684_s21, %s10495_s20 }
 0x82f   : > { %p7686_p7 = pnand %p7685_p4, %p7861_p5 }
 0x830   : > { %p7691_p11 = por %p7690_p10, %p7689_p9 }
 0x831   : > { %p7687_p8 = pneg %p7686_p7 }
 0x832   : > { %p7693_p13 = por %p7692_p12, %p7691_p11 }
 0x834   : > { %p7694_p0 = pnand %p7693_p13, %p7687_p8 }
 0x836   : > { %7697 = shalt.err (!%p7694_p0)
}
 0x837   : > { %s7746_s1 = smov 128   ;;  %s7747_s26 = smov 8  }
 0x838   : > { %6774 = dma.vmem_to_hbm [thread:$0]  (%p7861_p5), %s10490_s27, 256, %s10495_s20, %s10498_s18, %s7746_s1, %s7746_s1, %s7747_s26  }
 0x839 PF: > { %p6780_p1 = scmp.ge.s32.totalorder %s7732_s16, 2  ;;  %s6351_s25 = sand.u32 1, %s7720_s29  }
 0x83a   : > { %s6352_s21 = scalar_lea.sflag [#allocation6], %s6351_s25 }
 0x83b   : > { %p6777_p2 = pnand %p6780_p1, %p7865_p6 }
 0x83d   : > { %7715 = dma.done.wait (!%p6777_p2), %s6352_s21, 256  }
 0x83e   : > { %7717 = vsyncadd (!%p6777_p2), %s6352_s21, 4294967040  ;;  %p25_p3 = scmp.ge.s32.totalorder %s7848_s19, 4   ;;  %s10604_s29 = smov %s7724_s30 }
 0x83f   : > { %s10605_s30 = smov %s7728_s15  ;;  %s10606_s15 = smov %s7859_s22 }
 0x840   : > { %s10607_s16 = smov %s7848_s19  ;;  %27 = sbr.rel (!%p25_p3) target bundleno = 8 (0x8), region = 134 }
 0x847   :  { %6357 = vsyncpa [#allocation6], 1 }
 0x848   :  { %6359 = vsyncpa [#allocation6 + $0x1], 1 }

</bundles_post_ra>
